<compile_context>
chip_gen: v7x
topology: tpu7x:2x2x1
jax: 0.10.0
libtpu: 0.0.40
codegen_flags: <defaults>
</compile_context>

<pallas_src>
import functools

import numpy as np
import jax
import jax.numpy as jnp
from jax import lax
from jax.experimental import pallas as pl
from jax.experimental.pallas import tpu as pltpu

CONV_DTYPE = jnp.bfloat16      # MXU-friendly dtype for conv im2col matmul inputs/outputs
HP = 128                       # LSTM hidden padded to one full lane group

CFG = dict(
    batch=2, frames=4, height=32, width=32,
    cnn_channels=(4, 8, 8),
    cnn_output_size=32,        # 8 ch * 2 * 2 spatial after the conv stack
    dnn_shapes=(32, 32), window=2, nz=16,
)


def _round_up(n, m):
    return (n + m - 1) // m * m


# ------------------------------ Pallas kernels ------------------------------

def _conv_mm_kernel(a_ref, w_ref, b_ref, o_ref):
    # relu(a @ w + b), f32 accumulate, bf16 store (next layer consumes bf16).
    acc = jnp.dot(a_ref[...], w_ref[...], preferred_element_type=jnp.float32)
    acc = jnp.maximum(acc + b_ref[...], 0.0)
    o_ref[...] = acc.astype(o_ref.dtype)


def conv_matmul_relu(a, w, b):
    """relu(a @ w + b).  a:(M,K) bf16; w:(K,Cout) bf16; b:(1,Cout) f32.
    Output dim is the true channel count (masked narrow stores beat 128-lane
    padding at these sizes); M is split into at most 2 'parallel' blocks so
    v7x's two TensorCores can share the big conv1 call while v5e/v6e see at
    most 2 (usually 1) grid steps of overhead."""
    M, K = a.shape
    _, N = w.shape
    nblk = 2 if M >= 2048 else 1
    tm = _round_up(-(-M // nblk), 8)
    Mp = _round_up(M, tm)
    if Mp != M:
        a = jnp.pad(a, ((0, Mp - M), (0, 0)))
    out = pl.pallas_call(
        _conv_mm_kernel,
        out_shape=jax.ShapeDtypeStruct((Mp, N), CONV_DTYPE),
        grid=(Mp // tm,),
        in_specs=[pl.BlockSpec((tm, K), lambda i: (i, 0)),
                  pl.BlockSpec((K, N), lambda i: (0, 0)),   # weights stay resident
                  pl.BlockSpec((1, N), lambda i: (0, 0))],
        out_specs=pl.BlockSpec((tm, N), lambda i: (i, 0)),
        compiler_params=pltpu.CompilerParams(dimension_semantics=("parallel",)),
    )(a, w, b)
    return out[:M] if Mp != M else out


def _head_lstm_kernel(*refs, n_layers, T, Bp, hp):
    """Fused LinearEncoder MLP + DeltaEncoder + LSTM (x-projection + recurrence).
    All intermediates stay in VMEM/vregs; the only serial work is h @ W_hh."""
    feat_ref = refs[0]
    lin_refs = refs[1:1 + 2 * n_layers]
    (dm_ref, wih0_ref, wih1_ref, wih2_ref, bg_ref, whh_ref,
     h0_ref, c0_ref, yseq_ref, hn_ref, cn_ref) = refs[1 + 2 * n_layers:]
    f32 = jnp.float32

    # --- LinearEncoder: Linear + ReLU per layer (bf16 into MXU, f32 accumulate)
    # TODO(synk): LinearEncoder source not provided; plain Linear+ReLU stack assumed.
    h = feat_ref[...]
    for li in range(n_layers):
        w = lin_refs[2 * li][...]
        b = lin_refs[2 * li + 1][...]
        h = jnp.dot(h.astype(w.dtype), w, preferred_element_type=f32) + b
        h = jnp.maximum(h, 0.0)

    # --- DeltaEncoder: delta along time is linear -> precomputed block-diag matmul
    # TODO(synk): DeltaEncoder source not provided; standard regression delta assumed.
    dm = dm_ref[...]
    d1 = jnp.dot(dm, h, preferred_element_type=f32)
    d2 = jnp.dot(dm, d1, preferred_element_type=f32)

    # --- LSTM input projection for all time steps at once (hoisted out of the
    # recurrence); W_ih is pre-split over [y, d1, d2] so no lane-concat is needed.
    bf = wih0_ref.dtype
    xg = (jnp.dot(h.astype(bf), wih0_ref[...], preferred_element_type=f32)
          + jnp.dot(d1.astype(bf), wih1_ref[...], preferred_element_type=f32)
          + jnp.dot(d2.astype(bf), wih2_ref[...], preferred_element_type=f32)
          + bg_ref[...])

    # --- Recurrence (PyTorch gate order i,f,g,o), fully unrolled over static T.
    # Batch is padded to 8 sublanes so all slices/stores are (8,128)-aligned.
    whh = whh_ref[...]
    h_t = h0_ref[...]
    c_t = c0_ref[...]
    for t in range(T):
        g = xg[t * Bp:(t + 1) * Bp, :] + jnp.dot(
            h_t.astype(whh.dtype), whh, preferred_element_type=f32)
        i_g = jax.nn.sigmoid(g[:, 0 * hp:1 * hp])     # 128-lane-aligned gate slices
        f_g = jax.nn.sigmoid(g[:, 1 * hp:2 * hp])
        g_g = jnp.tanh(g[:, 2 * hp:3 * hp])
        o_g = jax.nn.sigmoid(g[:, 3 * hp:4 * hp])
        c_t = f_g * c_t + i_g * g_g
        h_t = o_g * jnp.tanh(c_t)
        yseq_ref[t] = h_t
    hn_ref[...] = h_t
    cn_ref[...] = c_t


def head_lstm(feat_tm, pp, h0_p, c0_p, T, Bp):
    """One pallas_call for everything after the conv stack."""
    lin_ws, lin_bs = pp["lin_ws"], pp["lin_bs"]
    n_layers = len(lin_ws)
    dm = pp["delta_m"]
    wih0, wih1, wih2 = pp["wih_chunks"]
    bg, whh = pp["lstm_b_p"], pp["whh_p"]

    def full(shape):
        return pl.BlockSpec(shape, lambda i: tuple(0 for _ in shape))

    args = [feat_tm]
    in_specs = [full(feat_tm.shape)]
    for w, b in zip(lin_ws, lin_bs):
        args.extend([w, b])
        in_specs.extend([full(w.shape), full(b.shape)])
    tail = [dm, wih0, wih1, wih2, bg, whh, h0_p, c0_p]
    args.extend(tail)
    in_specs.extend([full(a.shape) for a in tail])

    yseq, hn, cn = pl.pallas_call(
        functools.partial(_head_lstm_kernel, n_layers=n_layers, T=T, Bp=Bp, hp=HP),
        out_shape=(jax.ShapeDtypeStruct((T, Bp, HP), jnp.float32),
                   jax.ShapeDtypeStruct((Bp, HP), jnp.float32),
                   jax.ShapeDtypeStruct((Bp, HP), jnp.float32)),
        grid=(1,),
        in_specs=in_specs,
        out_specs=(full((T, Bp, HP)), full((Bp, HP)), full((Bp, HP))),
    )(*args)
    return yseq, hn, cn


# --------------------------------- JAX glue ---------------------------------

def conv3d_relu(x_ndhwc, w, b, ksize, stride, pad):
    """Conv3d + bias + ReLU via NDHWC im2col (stack + contiguous reshape only)
    and the M-tiled Pallas matmul kernel (bf16 in/out, f32 accumulate)."""
    kt, kh, kw = ksize
    st, sh, sw = stride
    pt, ph, pw = pad
    x = x_ndhwc.astype(CONV_DTYPE)
    xp = jnp.pad(x, ((0, 0), (pt, pt), (ph, ph), (pw, pw), (0, 0)))
    B, Tp, Hp_, Wp_, C = xp.shape
    To = (Tp - kt) // st + 1
    Ho = (Hp_ - kh) // sh + 1
    Wo = (Wp_ - kw) // sw + 1
    cols = []
    for dt in range(kt):
        for dh in range(kh):
            for dw in range(kw):
                cols.append(xp[:, dt:dt + To * st:st,
                               dh:dh + Ho * sh:sh,
                               dw:dw + Wo * sw:sw, :])
    patches = jnp.stack(cols, axis=-1)                          # (B,To,Ho,Wo,C,k3)
    patches = patches.reshape(B * To * Ho * Wo, C * kt * kh * kw)
    cout = w.shape[1]
    y = conv_matmul_relu(patches, w, b)
    return y.reshape(B, To, Ho, Wo, cout)


def maxpool_hw(x):
    # MaxPool3d((1,2,2),(1,2,2)) in NDHWC layout (dtype-matched init for bf16).
    neg_inf = jnp.array(-jnp.inf, dtype=x.dtype)
    return lax.reduce_window(x, neg_inf, lax.max,
                             (1, 1, 2, 2, 1), (1, 1, 2, 2, 1), "VALID")


# ---------------------------- parameter preparation -------------------------

def prepare_params(raw):
    """One-time layout prep: reshape/transpose, bf16-cast and lane-pad every
    weight once so no per-call padding/slicing glue remains in the forward."""
    cfg = CFG
    H, Hp = cfg["nz"], HP
    pp = {}

    # Conv weights -> (Cin*k^3, Cout) bf16, bias -> (1, Cout) f32 (no lane padding).
    for name in ("conv1", "conv2", "conv3"):
        w, b = raw[name + "_w"], raw[name + "_b"]
        cout = w.shape[0]
        pp[name + "_w"] = w.reshape(cout, -1).T.astype(CONV_DTYPE)
        pp[name + "_b"] = b.astype(jnp.float32).reshape(1, -1)

    # LinearEncoder weights in bf16, biases in f32.
    pp["lin_ws"] = [w.astype(jnp.bfloat16) for w in raw["lin_ws"]]
    pp["lin_bs"] = [b.astype(jnp.float32).reshape(1, -1) for b in raw["lin_bs"]]

    # LSTM: transpose, pad each gate to its own 128-lane slot (i,f,g,o order),
    # bf16 weights / f32 bias; W_ih split into [y, d1, d2] row chunks.
    wih_t = raw["lstm_w_ih"].T.astype(jnp.float32)               # (3*dnn_last, 4H)
    whh_t = raw["lstm_w_hh"].T.astype(jnp.float32)               # (H, 4H)
    bias = (raw["lstm_b_ih"] + raw["lstm_b_hh"]).astype(jnp.float32)
    In = wih_t.shape[0]
    wih_p = jnp.zeros((In, 4 * Hp), jnp.float32)
    whh_p = jnp.zeros((Hp, 4 * Hp), jnp.float32)
    b_p = jnp.zeros((1, 4 * Hp), jnp.float32)
    for g in range(4):                                           # gate-strided, lane aligned
        wih_p = wih_p.at[:, g * Hp:g * Hp + H].set(wih_t[:, g * H:(g + 1) * H])
        whh_p = whh_p.at[:H, g * Hp:g * Hp + H].set(whh_t[:, g * H:(g + 1) * H])
        b_p = b_p.at[0, g * Hp:g * Hp + H].set(bias[g * H:(g + 1) * H])
    D = In // 3
    pp["wih_chunks"] = [wih_p[i * D:(i + 1) * D, :].astype(jnp.bfloat16) for i in range(3)]
    pp["whh_p"] = whh_p.astype(jnp.bfloat16)
    pp["lstm_b_p"] = b_p

    # Delta (and delta-delta) as a precomputed linear map along time, laid out
    # for time-major rows (r = t*Bp + b): Dm = kron(delta_T, I_Bp).
    # TODO(synk): DeltaEncoder source not provided; standard delta (edge padding) assumed.
    T, B, W = cfg["frames"], cfg["batch"], cfg["window"]
    Bp = _round_up(B, 8)
    denom = 2.0 * sum(w * w for w in range(1, W + 1))
    dmat = np.zeros((T, T), np.float32)
    for t in range(T):
        for w in range(1, W + 1):
            dmat[t, min(t + w, T - 1)] += w / denom
            dmat[t, max(t - w, 0)] -= w / denom
    pp["delta_m"] = jnp.asarray(np.kron(dmat, np.eye(Bp, dtype=np.float32)))
    return pp


# --------------------------------- Encoder1 ---------------------------------

def encoder1_forward(pp, x, h0, c0):
    cfg = CFG
    H = cfg["nz"]

    # --- Conv3dEncoder (NCDHW -> NDHWC once) ---
    # TODO(synk): Dropout / Dropout3d treated as identity (inference mode).
    h = jnp.transpose(x, (0, 2, 3, 4, 1))
    h = conv3d_relu(h, pp["conv1_w"], pp["conv1_b"], (3, 3, 3), (1, 2, 2), (1, 2, 2))
    h = maxpool_hw(h)
    h = conv3d_relu(h, pp["conv2_w"], pp["conv2_b"], (3, 3, 3), (1, 1, 1), (1, 2, 2))
    h = maxpool_hw(h)
    h = conv3d_relu(h, pp["conv3_w"], pp["conv3_b"], (3, 3, 3), (1, 1, 1), (1, 1, 1))
    h = maxpool_hw(h)

    # permute(2,0,1,3,4).view(T,B,-1) == time-major features flattened (C,Hs,Ws).
    B, T, Hs, Ws, C = h.shape
    feat = jnp.transpose(h, (1, 0, 4, 2, 3)).reshape(T, B, C * Hs * Ws)

    # Pad batch to 8 sublanes; rows ordered time-major (r = t*Bp + b).
    Bp = _round_up(B, 8)
    feat_p = jnp.zeros((T, Bp, feat.shape[-1]), CONV_DTYPE).at[:, :B, :].set(feat)
    feat_tm = feat_p.reshape(T * Bp, -1)

    h0_p = jnp.zeros((Bp, HP), jnp.float32).at[:B, :H].set(h0)
    c0_p = jnp.zeros((Bp, HP), jnp.float32).at[:B, :H].set(c0)

    # --- Fused LinearEncoder + DeltaEncoder + LSTM (one pallas_call) ---
    yseq, hn, cn = head_lstm(feat_tm, pp, h0_p, c0_p, T, Bp)
    z1 = jnp.transpose(yseq[:, :B, :H], (1, 0, 2))               # (B, T, nz)
    h_n = hn[:B, :H].reshape(1, B, H)
    c_n = cn[:B, :H].reshape(1, B, H)
    return z1, (h_n, c_n)


if __name__ == "__main__":
    cfg = CFG
    key = jax.random.PRNGKey(0)
    ks = jax.random.split(key, 20)
    ch0, ch1, ch2 = cfg["cnn_channels"]

    def init(k, shape, scale=0.1):
        return scale * jax.random.normal(k, shape, dtype=jnp.float32)

    shapes = cfg["dnn_shapes"]
    lin_dims = [cfg["cnn_output_size"]] + list(shapes)
    lin_ws, lin_bs, kidx = [], [], 6
    for li in range(len(shapes)):
        lin_ws.append(init(ks[kidx], (lin_dims[li], lin_dims[li + 1]))); kidx += 1
        lin_bs.append(init(ks[kidx], (lin_dims[li + 1],))); kidx += 1

    nz = cfg["nz"]
    lstm_in = shapes[-1] * 3
    raw = dict(
        conv1_w=init(ks[0], (ch0, 1, 3, 3, 3)), conv1_b=init(ks[1], (ch0,)),
        conv2_w=init(ks[2], (ch1, ch0, 3, 3, 3)), conv2_b=init(ks[3], (ch1,)),
        conv3_w=init(ks[4], (ch2, ch1, 3, 3, 3)), conv3_b=init(ks[5], (ch2,)),
        lin_ws=lin_ws, lin_bs=lin_bs,
        lstm_w_ih=init(ks[10], (4 * nz, lstm_in)),
        lstm_w_hh=init(ks[11], (4 * nz, nz)),
        lstm_b_ih=init(ks[12], (4 * nz,)),
        lstm_b_hh=init(ks[13], (4 * nz,)),
    )
    params = prepare_params(raw)      # one-time weight layout / padding prep

    B, T = cfg["batch"], cfg["frames"]
    x = jax.random.normal(ks[14], (B, 1, T, cfg["height"], cfg["width"]), dtype=jnp.float32)
    h0 = init(ks[15], (B, nz), scale=1.0)
    c0 = init(ks[16], (B, nz), scale=1.0)

    fwd = jax.jit(encoder1_forward)
    z1, (h_n, c_n) = fwd(params, x, h0, c0)
    jax.block_until_ready((z1, h_n, c_n))

    assert z1.shape == (B, T, nz)
    assert h_n.shape == (1, B, nz)
    assert c_n.shape == (1, B, nz)
    assert bool(jnp.all(jnp.isfinite(z1)))
    print("KERNEL_OK")
</pallas_src>

<mosaic_0001>
module attributes {stable_mosaic.version = 11 : i64} {
  func.func @_conv_mm_kernel(%arg0: i32, %arg1: memref<1160x27xbf16, #tpu.memory_space<vmem>>, %arg2: memref<27x4xbf16, #tpu.memory_space<vmem>>, %arg3: memref<1x4xf32, #tpu.memory_space<vmem>>, %arg4: memref<1160x4xbf16, #tpu.memory_space<vmem>>) attributes {dimension_semantics = [#tpu.dimension_semantics<parallel>], iteration_bounds = array<i64: 2>, scalar_prefetch = 0 : i64, scratch_operands = 0 : i64, tpu.core_type = #tpu.core_type<tc>, window_params = [{transform_indices = @transform_0, window_bounds = array<i64: 1160, 27>}, {pipeline_mode = #tpu.pipeline_mode<synchronous>, transform_indices = @transform_1, window_bounds = array<i64: 27, 4>}, {pipeline_mode = #tpu.pipeline_mode<synchronous>, transform_indices = @transform_2, window_bounds = array<i64: 1, 4>}, {transform_indices = @transform_3, window_bounds = array<i64: 1160, 4>}]} {
    %c0 = arith.constant 0 : index
    %c0_0 = arith.constant 0 : index
    %0 = vector.load %arg1[%c0, %c0_0] : memref<1160x27xbf16, #tpu.memory_space<vmem>>, vector<1160x27xbf16>
    %c0_1 = arith.constant 0 : index
    %c0_2 = arith.constant 0 : index
    %1 = vector.load %arg2[%c0_1, %c0_2] : memref<27x4xbf16, #tpu.memory_space<vmem>>, vector<27x4xbf16>
    %cst = arith.constant dense<0.000000e+00> : vector<1160x4xf32>
    %2 = tpu.matmul %0, %1, %cst {dimension_numbers = #tpu.dot_dimension_numbers<[1], [0], [0], [1], [0, 0, 1, 1], [], []>} : vector<1160x27xbf16>, vector<27x4xbf16>, vector<1160x4xf32> -> vector<1160x4xf32>
    %c0_3 = arith.constant 0 : index
    %c0_4 = arith.constant 0 : index
    %3 = vector.load %arg3[%c0_3, %c0_4] : memref<1x4xf32, #tpu.memory_space<vmem>>, vector<1x4xf32>
    %4 = vector.broadcast %3 : vector<1x4xf32> to vector<1160x4xf32>
    %5 = arith.addf %2, %4 : vector<1160x4xf32>
    %cst_5 = arith.constant 0.000000e+00 : f32
    %6 = vector.broadcast %cst_5 : f32 to vector<1160x4xf32>
    %7 = arith.maximumf %5, %6 : vector<1160x4xf32>
    %8 = arith.truncf %7 : vector<1160x4xf32> to vector<1160x4xbf16>
    %c0_6 = arith.constant 0 : index
    %c0_7 = arith.constant 0 : index
    %9 = vector.load %arg4[%c0_6, %c0_7] : memref<1160x4xbf16, #tpu.memory_space<vmem>>, vector<1160x4xbf16>
    tpu.vector_store %arg4[%c0_6, %c0_7], %8 {strides = array<i32>} : memref<1160x4xbf16, #tpu.memory_space<vmem>>, vector<1160x4xbf16>,
    return
  }
  func.func @transform_0(%arg0: i32) -> (i32, i32) {
    %c0_i32 = arith.constant 0 : i32
    %c0_i32_0 = arith.constant 0 : i32
    return %arg0, %c0_i32 : i32, i32
  }
  func.func @transform_1(%arg0: i32) -> (i32, i32) {
    %c0_i32 = arith.constant 0 : i32
    %c0_i32_0 = arith.constant 0 : i32
    %c0_i32_1 = arith.constant 0 : i32
    return %c0_i32, %c0_i32_0 : i32, i32
  }
  func.func @transform_2(%arg0: i32) -> (i32, i32) {
    %c0_i32 = arith.constant 0 : i32
    %c0_i32_0 = arith.constant 0 : i32
    %c0_i32_1 = arith.constant 0 : i32
    return %c0_i32, %c0_i32_0 : i32, i32
  }
  func.func @transform_3(%arg0: i32) -> (i32, i32) {
    %c0_i32 = arith.constant 0 : i32
    %c0_i32_0 = arith.constant 0 : i32
    return %arg0, %c0_i32 : i32, i32
  }
}

module attributes {stable_mosaic.version = 11 : i64} {
  func.func @_conv_mm_kernel(%arg0: i32, %arg1: memref<800x108xbf16, #tpu.memory_space<vmem>>, %arg2: memref<108x8xbf16, #tpu.memory_space<vmem>>, %arg3: memref<1x8xf32, #tpu.memory_space<vmem>>, %arg4: memref<800x8xbf16, #tpu.memory_space<vmem>>) attributes {dimension_semantics = [#tpu.dimension_semantics<parallel>], iteration_bounds = array<i64: 1>, scalar_prefetch = 0 : i64, scratch_operands = 0 : i64, tpu.core_type = #tpu.core_type<tc>, window_params = [{transform_indices = @transform_0, window_bounds = array<i64: 800, 108>}, {pipeline_mode = #tpu.pipeline_mode<synchronous>, transform_indices = @transform_1, window_bounds = array<i64: 108, 8>}, {pipeline_mode = #tpu.pipeline_mode<synchronous>, transform_indices = @transform_2, window_bounds = array<i64: 1, 8>}, {transform_indices = @transform_3, window_bounds = array<i64: 800, 8>}]} {
    %c0 = arith.constant 0 : index
    %c0_0 = arith.constant 0 : index
    %0 = vector.load %arg1[%c0, %c0_0] : memref<800x108xbf16, #tpu.memory_space<vmem>>, vector<800x108xbf16>
    %c0_1 = arith.constant 0 : index
    %c0_2 = arith.constant 0 : index
    %1 = vector.load %arg2[%c0_1, %c0_2] : memref<108x8xbf16, #tpu.memory_space<vmem>>, vector<108x8xbf16>
    %cst = arith.constant dense<0.000000e+00> : vector<800x8xf32>
    %2 = tpu.matmul %0, %1, %cst {dimension_numbers = #tpu.dot_dimension_numbers<[1], [0], [0], [1], [0, 0, 1, 1], [], []>} : vector<800x108xbf16>, vector<108x8xbf16>, vector<800x8xf32> -> vector<800x8xf32>
    %c0_3 = arith.constant 0 : index
    %c0_4 = arith.constant 0 : index
    %3 = vector.load %arg3[%c0_3, %c0_4] : memref<1x8xf32, #tpu.memory_space<vmem>>, vector<1x8xf32>
    %4 = vector.broadcast %3 : vector<1x8xf32> to vector<800x8xf32>
    %5 = arith.addf %2, %4 : vector<800x8xf32>
    %cst_5 = arith.constant 0.000000e+00 : f32
    %6 = vector.broadcast %cst_5 : f32 to vector<800x8xf32>
    %7 = arith.maximumf %5, %6 : vector<800x8xf32>
    %8 = arith.truncf %7 : vector<800x8xf32> to vector<800x8xbf16>
    %c0_6 = arith.constant 0 : index
    %c0_7 = arith.constant 0 : index
    %9 = vector.load %arg4[%c0_6, %c0_7] : memref<800x8xbf16, #tpu.memory_space<vmem>>, vector<800x8xbf16>
    tpu.vector_store %arg4[%c0_6, %c0_7], %8 {strides = array<i32>} : memref<800x8xbf16, #tpu.memory_space<vmem>>, vector<800x8xbf16>,
    return
  }
  func.func @transform_0(%arg0: i32) -> (i32, i32) {
    %c0_i32 = arith.constant 0 : i32
    %c0_i32_0 = arith.constant 0 : i32
    return %arg0, %c0_i32 : i32, i32
  }
  func.func @transform_1(%arg0: i32) -> (i32, i32) {
    %c0_i32 = arith.constant 0 : i32
    %c0_i32_0 = arith.constant 0 : i32
    %c0_i32_1 = arith.constant 0 : i32
    return %c0_i32, %c0_i32_0 : i32, i32
  }
  func.func @transform_2(%arg0: i32) -> (i32, i32) {
    %c0_i32 = arith.constant 0 : i32
    %c0_i32_0 = arith.constant 0 : i32
    %c0_i32_1 = arith.constant 0 : i32
    return %c0_i32, %c0_i32_0 : i32, i32
  }
  func.func @transform_3(%arg0: i32) -> (i32, i32) {
    %c0_i32 = arith.constant 0 : i32
    %c0_i32_0 = arith.constant 0 : i32
    return %arg0, %c0_i32 : i32, i32
  }
}

module attributes {stable_mosaic.version = 11 : i64} {
  func.func @_conv_mm_kernel(%arg0: i32, %arg1: memref<200x216xbf16, #tpu.memory_space<vmem>>, %arg2: memref<216x8xbf16, #tpu.memory_space<vmem>>, %arg3: memref<1x8xf32, #tpu.memory_space<vmem>>, %arg4: memref<200x8xbf16, #tpu.memory_space<vmem>>) attributes {dimension_semantics = [#tpu.dimension_semantics<parallel>], iteration_bounds = array<i64: 1>, scalar_prefetch = 0 : i64, scratch_operands = 0 : i64, tpu.core_type = #tpu.core_type<tc>, window_params = [{transform_indices = @transform_0, window_bounds = array<i64: 200, 216>}, {pipeline_mode = #tpu.pipeline_mode<synchronous>, transform_indices = @transform_1, window_bounds = array<i64: 216, 8>}, {pipeline_mode = #tpu.pipeline_mode<synchronous>, transform_indices = @transform_2, window_bounds = array<i64: 1, 8>}, {transform_indices = @transform_3, window_bounds = array<i64: 200, 8>}]} {
    %c0 = arith.constant 0 : index
    %c0_0 = arith.constant 0 : index
    %0 = vector.load %arg1[%c0, %c0_0] : memref<200x216xbf16, #tpu.memory_space<vmem>>, vector<200x216xbf16>
    %c0_1 = arith.constant 0 : index
    %c0_2 = arith.constant 0 : index
    %1 = vector.load %arg2[%c0_1, %c0_2] : memref<216x8xbf16, #tpu.memory_space<vmem>>, vector<216x8xbf16>
    %cst = arith.constant dense<0.000000e+00> : vector<200x8xf32>
    %2 = tpu.matmul %0, %1, %cst {dimension_numbers = #tpu.dot_dimension_numbers<[1], [0], [0], [1], [0, 0, 1, 1], [], []>} : vector<200x216xbf16>, vector<216x8xbf16>, vector<200x8xf32> -> vector<200x8xf32>
    %c0_3 = arith.constant 0 : index
    %c0_4 = arith.constant 0 : index
    %3 = vector.load %arg3[%c0_3, %c0_4] : memref<1x8xf32, #tpu.memory_space<vmem>>, vector<1x8xf32>
    %4 = vector.broadcast %3 : vector<1x8xf32> to vector<200x8xf32>
    %5 = arith.addf %2, %4 : vector<200x8xf32>
    %cst_5 = arith.constant 0.000000e+00 : f32
    %6 = vector.broadcast %cst_5 : f32 to vector<200x8xf32>
    %7 = arith.maximumf %5, %6 : vector<200x8xf32>
    %8 = arith.truncf %7 : vector<200x8xf32> to vector<200x8xbf16>
    %c0_6 = arith.constant 0 : index
    %c0_7 = arith.constant 0 : index
    %9 = vector.load %arg4[%c0_6, %c0_7] : memref<200x8xbf16, #tpu.memory_space<vmem>>, vector<200x8xbf16>
    tpu.vector_store %arg4[%c0_6, %c0_7], %8 {strides = array<i32>} : memref<200x8xbf16, #tpu.memory_space<vmem>>, vector<200x8xbf16>,
    return
  }
  func.func @transform_0(%arg0: i32) -> (i32, i32) {
    %c0_i32 = arith.constant 0 : i32
    %c0_i32_0 = arith.constant 0 : i32
    return %arg0, %c0_i32 : i32, i32
  }
  func.func @transform_1(%arg0: i32) -> (i32, i32) {
    %c0_i32 = arith.constant 0 : i32
    %c0_i32_0 = arith.constant 0 : i32
    %c0_i32_1 = arith.constant 0 : i32
    return %c0_i32, %c0_i32_0 : i32, i32
  }
  func.func @transform_2(%arg0: i32) -> (i32, i32) {
    %c0_i32 = arith.constant 0 : i32
    %c0_i32_0 = arith.constant 0 : i32
    %c0_i32_1 = arith.constant 0 : i32
    return %c0_i32, %c0_i32_0 : i32, i32
  }
  func.func @transform_3(%arg0: i32) -> (i32, i32) {
    %c0_i32 = arith.constant 0 : i32
    %c0_i32_0 = arith.constant 0 : i32
    return %arg0, %c0_i32 : i32, i32
  }
}

module attributes {stable_mosaic.version = 11 : i64} {
  func.func @_head_lstm_kernel(%arg0: i32, %arg1: memref<32x32xbf16, #tpu.memory_space<vmem>>, %arg2: memref<32x32xbf16, #tpu.memory_space<vmem>>, %arg3: memref<1x32xf32, #tpu.memory_space<vmem>>, %arg4: memref<32x32xbf16, #tpu.memory_space<vmem>>, %arg5: memref<1x32xf32, #tpu.memory_space<vmem>>, %arg6: memref<32x32xf32, #tpu.memory_space<vmem>>, %arg7: memref<32x512xbf16, #tpu.memory_space<vmem>>, %arg8: memref<32x512xbf16, #tpu.memory_space<vmem>>, %arg9: memref<32x512xbf16, #tpu.memory_space<vmem>>, %arg10: memref<1x512xf32, #tpu.memory_space<vmem>>, %arg11: memref<128x512xbf16, #tpu.memory_space<vmem>>, %arg12: memref<8x128xf32, #tpu.memory_space<vmem>>, %arg13: memref<8x128xf32, #tpu.memory_space<vmem>>, %arg14: memref<4x8x128xf32, #tpu.memory_space<vmem>>, %arg15: memref<8x128xf32, #tpu.memory_space<vmem>>, %arg16: memref<8x128xf32, #tpu.memory_space<vmem>>) attributes {dimension_semantics = [#tpu.dimension_semantics<arbitrary>], iteration_bounds = array<i64: 1>, scalar_prefetch = 0 : i64, scratch_operands = 0 : i64, tpu.core_type = #tpu.core_type<tc>, window_params = [{pipeline_mode = #tpu.pipeline_mode<synchronous>, transform_indices = @transform_0, window_bounds = array<i64: 32, 32>}, {pipeline_mode = #tpu.pipeline_mode<synchronous>, transform_indices = @transform_1, window_bounds = array<i64: 32, 32>}, {pipeline_mode = #tpu.pipeline_mode<synchronous>, transform_indices = @transform_2, window_bounds = array<i64: 1, 32>}, {pipeline_mode = #tpu.pipeline_mode<synchronous>, transform_indices = @transform_3, window_bounds = array<i64: 32, 32>}, {pipeline_mode = #tpu.pipeline_mode<synchronous>, transform_indices = @transform_4, window_bounds = array<i64: 1, 32>}, {pipeline_mode = #tpu.pipeline_mode<synchronous>, transform_indices = @transform_5, window_bounds = array<i64: 32, 32>}, {pipeline_mode = #tpu.pipeline_mode<synchronous>, transform_indices = @transform_6, window_bounds = array<i64: 32, 512>}, {pipeline_mode = #tpu.pipeline_mode<synchronous>, transform_indices = @transform_7, window_bounds = array<i64: 32, 512>}, {pipeline_mode = #tpu.pipeline_mode<synchronous>, transform_indices = @transform_8, window_bounds = array<i64: 32, 512>}, {pipeline_mode = #tpu.pipeline_mode<synchronous>, transform_indices = @transform_9, window_bounds = array<i64: 1, 512>}, {pipeline_mode = #tpu.pipeline_mode<synchronous>, transform_indices = @transform_10, window_bounds = array<i64: 128, 512>}, {pipeline_mode = #tpu.pipeline_mode<synchronous>, transform_indices = @transform_11, window_bounds = array<i64: 8, 128>}, {pipeline_mode = #tpu.pipeline_mode<synchronous>, transform_indices = @transform_12, window_bounds = array<i64: 8, 128>}, {pipeline_mode = #tpu.pipeline_mode<synchronous>, transform_indices = @transform_13, window_bounds = array<i64: 4, 8, 128>}, {pipeline_mode = #tpu.pipeline_mode<synchronous>, transform_indices = @transform_14, window_bounds = array<i64: 8, 128>}, {pipeline_mode = #tpu.pipeline_mode<synchronous>, transform_indices = @transform_15, window_bounds = array<i64: 8, 128>}]} {
    %c0 = arith.constant 0 : index
    %c0_0 = arith.constant 0 : index
    %0 = vector.load %arg1[%c0, %c0_0] : memref<32x32xbf16, #tpu.memory_space<vmem>>, vector<32x32xbf16>
    %c0_1 = arith.constant 0 : index
    %c0_2 = arith.constant 0 : index
    %1 = vector.load %arg2[%c0_1, %c0_2] : memref<32x32xbf16, #tpu.memory_space<vmem>>, vector<32x32xbf16>
    %c0_3 = arith.constant 0 : index
    %c0_4 = arith.constant 0 : index
    %2 = vector.load %arg3[%c0_3, %c0_4] : memref<1x32xf32, #tpu.memory_space<vmem>>, vector<1x32xf32>
    %cst = arith.constant dense<0.000000e+00> : vector<32x32xf32>
    %3 = tpu.matmul %0, %1, %cst {dimension_numbers = #tpu.dot_dimension_numbers<[1], [0], [0], [1], [0, 0, 1, 1], [], []>} : vector<32x32xbf16>, vector<32x32xbf16>, vector<32x32xf32> -> vector<32x32xf32>
    %4 = vector.broadcast %2 : vector<1x32xf32> to vector<32x32xf32>
    %5 = arith.addf %3, %4 : vector<32x32xf32>
    %cst_5 = arith.constant 0.000000e+00 : f32
    %6 = vector.broadcast %cst_5 : f32 to vector<32x32xf32>
    %7 = arith.maximumf %5, %6 : vector<32x32xf32>
    %c0_6 = arith.constant 0 : index
    %c0_7 = arith.constant 0 : index
    %8 = vector.load %arg4[%c0_6, %c0_7] : memref<32x32xbf16, #tpu.memory_space<vmem>>, vector<32x32xbf16>
    %c0_8 = arith.constant 0 : index
    %c0_9 = arith.constant 0 : index
    %9 = vector.load %arg5[%c0_8, %c0_9] : memref<1x32xf32, #tpu.memory_space<vmem>>, vector<1x32xf32>
    %10 = arith.truncf %7 : vector<32x32xf32> to vector<32x32xbf16>
    %cst_10 = arith.constant dense<0.000000e+00> : vector<32x32xf32>
    %11 = tpu.matmul %10, %8, %cst_10 {dimension_numbers = #tpu.dot_dimension_numbers<[1], [0], [0], [1], [0, 0, 1, 1], [], []>} : vector<32x32xbf16>, vector<32x32xbf16>, vector<32x32xf32> -> vector<32x32xf32>
    %12 = vector.broadcast %9 : vector<1x32xf32> to vector<32x32xf32>
    %13 = arith.addf %11, %12 : vector<32x32xf32>
    %cst_11 = arith.constant 0.000000e+00 : f32
    %14 = vector.broadcast %cst_11 : f32 to vector<32x32xf32>
    %15 = arith.maximumf %13, %14 : vector<32x32xf32>
    %c0_12 = arith.constant 0 : index
    %c0_13 = arith.constant 0 : index
    %16 = vector.load %arg6[%c0_12, %c0_13] : memref<32x32xf32, #tpu.memory_space<vmem>>, vector<32x32xf32>
    %cst_14 = arith.constant dense<0.000000e+00> : vector<32x32xf32>
    %17 = tpu.matmul %16, %15, %cst_14 {dimension_numbers = #tpu.dot_dimension_numbers<[1], [0], [0], [1], [0, 0, 1, 1], [], []>} : vector<32x32xf32>, vector<32x32xf32>, vector<32x32xf32> -> vector<32x32xf32>
    %cst_15 = arith.constant dense<0.000000e+00> : vector<32x32xf32>
    %18 = tpu.matmul %16, %17, %cst_15 {dimension_numbers = #tpu.dot_dimension_numbers<[1], [0], [0], [1], [0, 0, 1, 1], [], []>} : vector<32x32xf32>, vector<32x32xf32>, vector<32x32xf32> -> vector<32x32xf32>
    %19 = arith.truncf %15 : vector<32x32xf32> to vector<32x32xbf16>
    %c0_16 = arith.constant 0 : index
    %c0_17 = arith.constant 0 : index
    %20 = vector.load %arg7[%c0_16, %c0_17] : memref<32x512xbf16, #tpu.memory_space<vmem>>, vector<32x512xbf16>
    %cst_18 = arith.constant dense<0.000000e+00> : vector<32x512xf32>
    %21 = tpu.matmul %19, %20, %cst_18 {dimension_numbers = #tpu.dot_dimension_numbers<[1], [0], [0], [1], [0, 0, 1, 1], [], []>} : vector<32x32xbf16>, vector<32x512xbf16>, vector<32x512xf32> -> vector<32x512xf32>
    %22 = arith.truncf %17 : vector<32x32xf32> to vector<32x32xbf16>
    %c0_19 = arith.constant 0 : index
    %c0_20 = arith.constant 0 : index
    %23 = vector.load %arg8[%c0_19, %c0_20] : memref<32x512xbf16, #tpu.memory_space<vmem>>, vector<32x512xbf16>
    %cst_21 = arith.constant dense<0.000000e+00> : vector<32x512xf32>
    %24 = tpu.matmul %22, %23, %cst_21 {dimension_numbers = #tpu.dot_dimension_numbers<[1], [0], [0], [1], [0, 0, 1, 1], [], []>} : vector<32x32xbf16>, vector<32x512xbf16>, vector<32x512xf32> -> vector<32x512xf32>
    %25 = arith.addf %21, %24 : vector<32x512xf32>
    %26 = arith.truncf %18 : vector<32x32xf32> to vector<32x32xbf16>
    %c0_22 = arith.constant 0 : index
    %c0_23 = arith.constant 0 : index
    %27 = vector.load %arg9[%c0_22, %c0_23] : memref<32x512xbf16, #tpu.memory_space<vmem>>, vector<32x512xbf16>
    %cst_24 = arith.constant dense<0.000000e+00> : vector<32x512xf32>
    %28 = tpu.matmul %26, %27, %cst_24 {dimension_numbers = #tpu.dot_dimension_numbers<[1], [0], [0], [1], [0, 0, 1, 1], [], []>} : vector<32x32xbf16>, vector<32x512xbf16>, vector<32x512xf32> -> vector<32x512xf32>
    %29 = arith.addf %25, %28 : vector<32x512xf32>
    %c0_25 = arith.constant 0 : index
    %c0_26 = arith.constant 0 : index
    %30 = vector.load %arg10[%c0_25, %c0_26] : memref<1x512xf32, #tpu.memory_space<vmem>>, vector<1x512xf32>
    %31 = vector.broadcast %30 : vector<1x512xf32> to vector<32x512xf32>
    %32 = arith.addf %29, %31 : vector<32x512xf32>
    %c0_27 = arith.constant 0 : index
    %c0_28 = arith.constant 0 : index
    %33 = vector.load %arg11[%c0_27, %c0_28] : memref<128x512xbf16, #tpu.memory_space<vmem>>, vector<128x512xbf16>
    %c0_29 = arith.constant 0 : index
    %c0_30 = arith.constant 0 : index
    %34 = vector.load %arg12[%c0_29, %c0_30] : memref<8x128xf32, #tpu.memory_space<vmem>>, vector<8x128xf32>
    %c0_31 = arith.constant 0 : index
    %c0_32 = arith.constant 0 : index
    %35 = vector.load %arg13[%c0_31, %c0_32] : memref<8x128xf32, #tpu.memory_space<vmem>>, vector<8x128xf32>
    %36 = vector.extract_strided_slice %32 {offsets = [0, 0], sizes = [8, 512], strides = [1, 1]} : vector<32x512xf32> to vector<8x512xf32>
    %37 = arith.truncf %34 : vector<8x128xf32> to vector<8x128xbf16>
    %cst_33 = arith.constant dense<0.000000e+00> : vector<8x512xf32>
    %38 = tpu.matmul %37, %33, %cst_33 {dimension_numbers = #tpu.dot_dimension_numbers<[1], [0], [0], [1], [0, 0, 1, 1], [], []>} : vector<8x128xbf16>, vector<128x512xbf16>, vector<8x512xf32> -> vector<8x512xf32>
    %39 = arith.addf %36, %38 : vector<8x512xf32>
    %40 = vector.extract_strided_slice %39 {offsets = [0, 0], sizes = [8, 128], strides = [1, 1]} : vector<8x512xf32> to vector<8x128xf32>
    %41 = arith.negf %40 : vector<8x128xf32>
    %42 = math.exp %41 : vector<8x128xf32>
    %cst_34 = arith.constant 1.000000e+00 : f32
    %43 = vector.broadcast %cst_34 : f32 to vector<8x128xf32>
    %44 = arith.addf %43, %42 : vector<8x128xf32>
    %45 = arith.divf %43, %44 : vector<8x128xf32>
    %46 = vector.extract_strided_slice %39 {offsets = [0, 128], sizes = [8, 128], strides = [1, 1]} : vector<8x512xf32> to vector<8x128xf32>
    %47 = arith.negf %46 : vector<8x128xf32>
    %48 = math.exp %47 : vector<8x128xf32>
    %cst_35 = arith.constant 1.000000e+00 : f32
    %49 = vector.broadcast %cst_35 : f32 to vector<8x128xf32>
    %50 = arith.addf %49, %48 : vector<8x128xf32>
    %51 = arith.divf %49, %50 : vector<8x128xf32>
    %52 = vector.extract_strided_slice %39 {offsets = [0, 256], sizes = [8, 128], strides = [1, 1]} : vector<8x512xf32> to vector<8x128xf32>
    %53 = math.tanh %52 : vector<8x128xf32>
    %54 = vector.extract_strided_slice %39 {offsets = [0, 384], sizes = [8, 128], strides = [1, 1]} : vector<8x512xf32> to vector<8x128xf32>
    %55 = arith.negf %54 : vector<8x128xf32>
    %56 = math.exp %55 : vector<8x128xf32>
    %cst_36 = arith.constant 1.000000e+00 : f32
    %57 = vector.broadcast %cst_36 : f32 to vector<8x128xf32>
    %58 = arith.addf %57, %56 : vector<8x128xf32>
    %59 = arith.divf %57, %58 : vector<8x128xf32>
    %60 = arith.mulf %51, %35 : vector<8x128xf32>
    %61 = arith.mulf %45, %53 : vector<8x128xf32>
    %62 = arith.addf %60, %61 : vector<8x128xf32>
    %63 = math.tanh %62 : vector<8x128xf32>
    %64 = arith.mulf %59, %63 : vector<8x128xf32>
    %c0_37 = arith.constant 0 : index
    %c0_38 = arith.constant 0 : index
    %c0_39 = arith.constant 0 : index
    %65 = vector.load %arg14[%c0_37, %c0_38, %c0_39] : memref<4x8x128xf32, #tpu.memory_space<vmem>>, vector<1x8x128xf32>
    %66 = vector.shape_cast %65 : vector<1x8x128xf32> to vector<8x128xf32>
    %67 = vector.shape_cast %64 : vector<8x128xf32> to vector<1x8x128xf32>
    tpu.vector_store %arg14[%c0_37, %c0_38, %c0_39], %67 {strides = array<i32>} : memref<4x8x128xf32, #tpu.memory_space<vmem>>, vector<1x8x128xf32>,
    %68 = vector.extract_strided_slice %32 {offsets = [8, 0], sizes = [8, 512], strides = [1, 1]} : vector<32x512xf32> to vector<8x512xf32>
    %69 = arith.truncf %64 : vector<8x128xf32> to vector<8x128xbf16>
    %cst_40 = arith.constant dense<0.000000e+00> : vector<8x512xf32>
    %70 = tpu.matmul %69, %33, %cst_40 {dimension_numbers = #tpu.dot_dimension_numbers<[1], [0], [0], [1], [0, 0, 1, 1], [], []>} : vector<8x128xbf16>, vector<128x512xbf16>, vector<8x512xf32> -> vector<8x512xf32>
    %71 = arith.addf %68, %70 : vector<8x512xf32>
    %72 = vector.extract_strided_slice %71 {offsets = [0, 0], sizes = [8, 128], strides = [1, 1]} : vector<8x512xf32> to vector<8x128xf32>
    %73 = arith.negf %72 : vector<8x128xf32>
    %74 = math.exp %73 : vector<8x128xf32>
    %cst_41 = arith.constant 1.000000e+00 : f32
    %75 = vector.broadcast %cst_41 : f32 to vector<8x128xf32>
    %76 = arith.addf %75, %74 : vector<8x128xf32>
    %77 = arith.divf %75, %76 : vector<8x128xf32>
    %78 = vector.extract_strided_slice %71 {offsets = [0, 128], sizes = [8, 128], strides = [1, 1]} : vector<8x512xf32> to vector<8x128xf32>
    %79 = arith.negf %78 : vector<8x128xf32>
    %80 = math.exp %79 : vector<8x128xf32>
    %cst_42 = arith.constant 1.000000e+00 : f32
    %81 = vector.broadcast %cst_42 : f32 to vector<8x128xf32>
    %82 = arith.addf %81, %80 : vector<8x128xf32>
    %83 = arith.divf %81, %82 : vector<8x128xf32>
    %84 = vector.extract_strided_slice %71 {offsets = [0, 256], sizes = [8, 128], strides = [1, 1]} : vector<8x512xf32> to vector<8x128xf32>
    %85 = math.tanh %84 : vector<8x128xf32>
    %86 = vector.extract_strided_slice %71 {offsets = [0, 384], sizes = [8, 128], strides = [1, 1]} : vector<8x512xf32> to vector<8x128xf32>
    %87 = arith.negf %86 : vector<8x128xf32>
    %88 = math.exp %87 : vector<8x128xf32>
    %cst_43 = arith.constant 1.000000e+00 : f32
    %89 = vector.broadcast %cst_43 : f32 to vector<8x128xf32>
    %90 = arith.addf %89, %88 : vector<8x128xf32>
    %91 = arith.divf %89, %90 : vector<8x128xf32>
    %92 = arith.mulf %83, %62 : vector<8x128xf32>
    %93 = arith.mulf %77, %85 : vector<8x128xf32>
    %94 = arith.addf %92, %93 : vector<8x128xf32>
    %95 = math.tanh %94 : vector<8x128xf32>
    %96 = arith.mulf %91, %95 : vector<8x128xf32>
    %c1 = arith.constant 1 : index
    %c0_44 = arith.constant 0 : index
    %c0_45 = arith.constant 0 : index
    %97 = vector.load %arg14[%c1, %c0_44, %c0_45] : memref<4x8x128xf32, #tpu.memory_space<vmem>>, vector<1x8x128xf32>
    %98 = vector.shape_cast %97 : vector<1x8x128xf32> to vector<8x128xf32>
    %99 = vector.shape_cast %96 : vector<8x128xf32> to vector<1x8x128xf32>
    tpu.vector_store %arg14[%c1, %c0_44, %c0_45], %99 {strides = array<i32>} : memref<4x8x128xf32, #tpu.memory_space<vmem>>, vector<1x8x128xf32>,
    %100 = vector.extract_strided_slice %32 {offsets = [16, 0], sizes = [8, 512], strides = [1, 1]} : vector<32x512xf32> to vector<8x512xf32>
    %101 = arith.truncf %96 : vector<8x128xf32> to vector<8x128xbf16>
    %cst_46 = arith.constant dense<0.000000e+00> : vector<8x512xf32>
    %102 = tpu.matmul %101, %33, %cst_46 {dimension_numbers = #tpu.dot_dimension_numbers<[1], [0], [0], [1], [0, 0, 1, 1], [], []>} : vector<8x128xbf16>, vector<128x512xbf16>, vector<8x512xf32> -> vector<8x512xf32>
    %103 = arith.addf %100, %102 : vector<8x512xf32>
    %104 = vector.extract_strided_slice %103 {offsets = [0, 0], sizes = [8, 128], strides = [1, 1]} : vector<8x512xf32> to vector<8x128xf32>
    %105 = arith.negf %104 : vector<8x128xf32>
    %106 = math.exp %105 : vector<8x128xf32>
    %cst_47 = arith.constant 1.000000e+00 : f32
    %107 = vector.broadcast %cst_47 : f32 to vector<8x128xf32>
    %108 = arith.addf %107, %106 : vector<8x128xf32>
    %109 = arith.divf %107, %108 : vector<8x128xf32>
    %110 = vector.extract_strided_slice %103 {offsets = [0, 128], sizes = [8, 128], strides = [1, 1]} : vector<8x512xf32> to vector<8x128xf32>
    %111 = arith.negf %110 : vector<8x128xf32>
    %112 = math.exp %111 : vector<8x128xf32>
    %cst_48 = arith.constant 1.000000e+00 : f32
    %113 = vector.broadcast %cst_48 : f32 to vector<8x128xf32>
    %114 = arith.addf %113, %112 : vector<8x128xf32>
    %115 = arith.divf %113, %114 : vector<8x128xf32>
    %116 = vector.extract_strided_slice %103 {offsets = [0, 256], sizes = [8, 128], strides = [1, 1]} : vector<8x512xf32> to vector<8x128xf32>
    %117 = math.tanh %116 : vector<8x128xf32>
    %118 = vector.extract_strided_slice %103 {offsets = [0, 384], sizes = [8, 128], strides = [1, 1]} : vector<8x512xf32> to vector<8x128xf32>
    %119 = arith.negf %118 : vector<8x128xf32>
    %120 = math.exp %119 : vector<8x128xf32>
    %cst_49 = arith.constant 1.000000e+00 : f32
    %121 = vector.broadcast %cst_49 : f32 to vector<8x128xf32>
    %122 = arith.addf %121, %120 : vector<8x128xf32>
    %123 = arith.divf %121, %122 : vector<8x128xf32>
    %124 = arith.mulf %115, %94 : vector<8x128xf32>
    %125 = arith.mulf %109, %117 : vector<8x128xf32>
    %126 = arith.addf %124, %125 : vector<8x128xf32>
    %127 = math.tanh %126 : vector<8x128xf32>
    %128 = arith.mulf %123, %127 : vector<8x128xf32>
    %c2 = arith.constant 2 : index
    %c0_50 = arith.constant 0 : index
    %c0_51 = arith.constant 0 : index
    %129 = vector.load %arg14[%c2, %c0_50, %c0_51] : memref<4x8x128xf32, #tpu.memory_space<vmem>>, vector<1x8x128xf32>
    %130 = vector.shape_cast %129 : vector<1x8x128xf32> to vector<8x128xf32>
    %131 = vector.shape_cast %128 : vector<8x128xf32> to vector<1x8x128xf32>
    tpu.vector_store %arg14[%c2, %c0_50, %c0_51], %131 {strides = array<i32>} : memref<4x8x128xf32, #tpu.memory_space<vmem>>, vector<1x8x128xf32>,
    %132 = vector.extract_strided_slice %32 {offsets = [24, 0], sizes = [8, 512], strides = [1, 1]} : vector<32x512xf32> to vector<8x512xf32>
    %133 = arith.truncf %128 : vector<8x128xf32> to vector<8x128xbf16>
    %cst_52 = arith.constant dense<0.000000e+00> : vector<8x512xf32>
    %134 = tpu.matmul %133, %33, %cst_52 {dimension_numbers = #tpu.dot_dimension_numbers<[1], [0], [0], [1], [0, 0, 1, 1], [], []>} : vector<8x128xbf16>, vector<128x512xbf16>, vector<8x512xf32> -> vector<8x512xf32>
    %135 = arith.addf %132, %134 : vector<8x512xf32>
    %136 = vector.extract_strided_slice %135 {offsets = [0, 0], sizes = [8, 128], strides = [1, 1]} : vector<8x512xf32> to vector<8x128xf32>
    %137 = arith.negf %136 : vector<8x128xf32>
    %138 = math.exp %137 : vector<8x128xf32>
    %cst_53 = arith.constant 1.000000e+00 : f32
    %139 = vector.broadcast %cst_53 : f32 to vector<8x128xf32>
    %140 = arith.addf %139, %138 : vector<8x128xf32>
    %141 = arith.divf %139, %140 : vector<8x128xf32>
    %142 = vector.extract_strided_slice %135 {offsets = [0, 128], sizes = [8, 128], strides = [1, 1]} : vector<8x512xf32> to vector<8x128xf32>
    %143 = arith.negf %142 : vector<8x128xf32>
    %144 = math.exp %143 : vector<8x128xf32>
    %cst_54 = arith.constant 1.000000e+00 : f32
    %145 = vector.broadcast %cst_54 : f32 to vector<8x128xf32>
    %146 = arith.addf %145, %144 : vector<8x128xf32>
    %147 = arith.divf %145, %146 : vector<8x128xf32>
    %148 = vector.extract_strided_slice %135 {offsets = [0, 256], sizes = [8, 128], strides = [1, 1]} : vector<8x512xf32> to vector<8x128xf32>
    %149 = math.tanh %148 : vector<8x128xf32>
    %150 = vector.extract_strided_slice %135 {offsets = [0, 384], sizes = [8, 128], strides = [1, 1]} : vector<8x512xf32> to vector<8x128xf32>
    %151 = arith.negf %150 : vector<8x128xf32>
    %152 = math.exp %151 : vector<8x128xf32>
    %cst_55 = arith.constant 1.000000e+00 : f32
    %153 = vector.broadcast %cst_55 : f32 to vector<8x128xf32>
    %154 = arith.addf %153, %152 : vector<8x128xf32>
    %155 = arith.divf %153, %154 : vector<8x128xf32>
    %156 = arith.mulf %147, %126 : vector<8x128xf32>
    %157 = arith.mulf %141, %149 : vector<8x128xf32>
    %158 = arith.addf %156, %157 : vector<8x128xf32>
    %159 = math.tanh %158 : vector<8x128xf32>
    %160 = arith.mulf %155, %159 : vector<8x128xf32>
    %c3 = arith.constant 3 : index
    %c0_56 = arith.constant 0 : index
    %c0_57 = arith.constant 0 : index
    %161 = vector.load %arg14[%c3, %c0_56, %c0_57] : memref<4x8x128xf32, #tpu.memory_space<vmem>>, vector<1x8x128xf32>
    %162 = vector.shape_cast %161 : vector<1x8x128xf32> to vector<8x128xf32>
    %163 = vector.shape_cast %160 : vector<8x128xf32> to vector<1x8x128xf32>
    tpu.vector_store %arg14[%c3, %c0_56, %c0_57], %163 {strides = array<i32>} : memref<4x8x128xf32, #tpu.memory_space<vmem>>, vector<1x8x128xf32>,
    %c0_58 = arith.constant 0 : index
    %c0_59 = arith.constant 0 : index
    %164 = vector.load %arg15[%c0_58, %c0_59] : memref<8x128xf32, #tpu.memory_space<vmem>>, vector<8x128xf32>
    tpu.vector_store %arg15[%c0_58, %c0_59], %160 {strides = array<i32>} : memref<8x128xf32, #tpu.memory_space<vmem>>, vector<8x128xf32>,
    %c0_60 = arith.constant 0 : index
    %c0_61 = arith.constant 0 : index
    %165 = vector.load %arg16[%c0_60, %c0_61] : memref<8x128xf32, #tpu.memory_space<vmem>>, vector<8x128xf32>
    tpu.vector_store %arg16[%c0_60, %c0_61], %158 {strides = array<i32>} : memref<8x128xf32, #tpu.memory_space<vmem>>, vector<8x128xf32>,
    return
  }
  func.func @transform_0(%arg0: i32) -> (i32, i32) {
    %c0_i32 = arith.constant 0 : i32
    %c0_i32_0 = arith.constant 0 : i32
    %c0_i32_1 = arith.constant 0 : i32
    return %c0_i32, %c0_i32_0 : i32, i32
  }
  func.func @transform_1(%arg0: i32) -> (i32, i32) {
    %c0_i32 = arith.constant 0 : i32
    %c0_i32_0 = arith.constant 0 : i32
    %c0_i32_1 = arith.constant 0 : i32
    return %c0_i32, %c0_i32_0 : i32, i32
  }
  func.func @transform_2(%arg0: i32) -> (i32, i32) {
    %c0_i32 = arith.constant 0 : i32
    %c0_i32_0 = arith.constant 0 : i32
    %c0_i32_1 = arith.constant 0 : i32
    return %c0_i32, %c0_i32_0 : i32, i32
  }
  func.func @transform_3(%arg0: i32) -> (i32, i32) {
    %c0_i32 = arith.constant 0 : i32
    %c0_i32_0 = arith.constant 0 : i32
    %c0_i32_1 = arith.constant 0 : i32
    return %c0_i32, %c0_i32_0 : i32, i32
  }
  func.func @transform_4(%arg0: i32) -> (i32, i32) {
    %c0_i32 = arith.constant 0 : i32
    %c0_i32_0 = arith.constant 0 : i32
    %c0_i32_1 = arith.constant 0 : i32
    return %c0_i32, %c0_i32_0 : i32, i32
  }
  func.func @transform_5(%arg0: i32) -> (i32, i32) {
    %c0_i32 = arith.constant 0 : i32
    %c0_i32_0 = arith.constant 0 : i32
    %c0_i32_1 = arith.constant 0 : i32
    return %c0_i32, %c0_i32_0 : i32, i32
  }
  func.func @transform_6(%arg0: i32) -> (i32, i32) {
    %c0_i32 = arith.constant 0 : i32
    %c0_i32_0 = arith.constant 0 : i32
    %c0_i32_1 = arith.constant 0 : i32
    return %c0_i32, %c0_i32_0 : i32, i32
  }
  func.func @transform_7(%arg0: i32) -> (i32, i32) {
    %c0_i32 = arith.constant 0 : i32
    %c0_i32_0 = arith.constant 0 : i32
    %c0_i32_1 = arith.constant 0 : i32
    return %c0_i32, %c0_i32_0 : i32, i32
  }
  func.func @transform_8(%arg0: i32) -> (i32, i32) {
    %c0_i32 = arith.constant 0 : i32
    %c0_i32_0 = arith.constant 0 : i32
    %c0_i32_1 = arith.constant 0 : i32
    return %c0_i32, %c0_i32_0 : i32, i32
  }
  func.func @transform_9(%arg0: i32) -> (i32, i32) {
    %c0_i32 = arith.constant 0 : i32
    %c0_i32_0 = arith.constant 0 : i32
    %c0_i32_1 = arith.constant 0 : i32
    return %c0_i32, %c0_i32_0 : i32, i32
  }
  func.func @transform_10(%arg0: i32) -> (i32, i32) {
    %c0_i32 = arith.constant 0 : i32
    %c0_i32_0 = arith.constant 0 : i32
    %c0_i32_1 = arith.constant 0 : i32
    return %c0_i32, %c0_i32_0 : i32, i32
  }
  func.func @transform_11(%arg0: i32) -> (i32, i32) {
    %c0_i32 = arith.constant 0 : i32
    %c0_i32_0 = arith.constant 0 : i32
    %c0_i32_1 = arith.constant 0 : i32
    return %c0_i32, %c0_i32_0 : i32, i32
  }
  func.func @transform_12(%arg0: i32) -> (i32, i32) {
    %c0_i32 = arith.constant 0 : i32
    %c0_i32_0 = arith.constant 0 : i32
    %c0_i32_1 = arith.constant 0 : i32
    return %c0_i32, %c0_i32_0 : i32, i32
  }
  func.func @transform_13(%arg0: i32) -> (i32, i32, i32) {
    %c0_i32 = arith.constant 0 : i32
    %c0_i32_0 = arith.constant 0 : i32
    %c0_i32_1 = arith.constant 0 : i32
    %c0_i32_2 = arith.constant 0 : i32
    return %c0_i32, %c0_i32_0, %c0_i32_1 : i32, i32, i32
  }
  func.func @transform_14(%arg0: i32) -> (i32, i32) {
    %c0_i32 = arith.constant 0 : i32
    %c0_i32_0 = arith.constant 0 : i32
    %c0_i32_1 = arith.constant 0 : i32
    return %c0_i32, %c0_i32_0 : i32, i32
  }
  func.func @transform_15(%arg0: i32) -> (i32, i32) {
    %c0_i32 = arith.constant 0 : i32
    %c0_i32_0 = arith.constant 0 : i32
    %c0_i32_1 = arith.constant 0 : i32
    return %c0_i32, %c0_i32_0 : i32, i32
  }
}

</mosaic_0001>

<bundles_post_ra>
// kernel: encoder1_forward.4
= control target key start
LH: loop header
LB: loop body
LE: loop exit
PB: predicated region body
PF: predicated region fallthrough
CT: control target
= control target key end

     0   :  { %s3417_s12 = smov 0   ;;  %s4192_s0 = inlined_call_operand.vmem [shape: bf16[2320,27], index: 0, kind: input, shape index: {}]   ;;  %s4193_s1 = inlined_call_operand.vmem [shape: bf16[27,4], index: 1, kind: input, shape index: {}]   ;;  %s4194_s2 = inlined_call_operand.vmem [shape: f32[1,4], index: 2, kind: input, shape index: {}]   ;;  %s4195_s3 = inlined_call_operand.vmem [shape: bf16[2320,4], index: 3, kind: output, shape index: {}]  }
   0x1 LB: > { %s2476_s13 = sadd.s32 4294967295, %s3392_s12   ;;  %p2480_p0 = scmp.ge.s32.totalorder %s3392_s12, 1  ;;  %s3392_s12 = sphi %s3417_s12, %s13_s12  }
   0x2   : > { %p138_p1 = scmp.lt.s32.totalorder %s3392_s12, 3 }
   0x4   : > { %p139_p2 = pnand %p2480_p0, %p138_p1 }
   0x5   : > { %v3310_v0 = vld [vmem:[%s4193_s1] sm:$0xff] (!%p139_p2)   ;;  %v3394_v1 = vmov (!%p139_p2), 0.0   ;;  %v3311_v2 = vld [vmem:[%s4193_s1 + $0x8] sm:$0x3f] (!%p139_p2)   ;;  %vm925_vm0 = vcmask (!%p139_p2), 1044480   ;;  %vm926_vm1 = vcmask (!%p139_p2), 1045504  }
   0x6   : > { %142 = sbr.rel (%p139_p2) target bundleno = 526 (0x20e), region = 32  ;;  %2999 = vmatprep.subr.bf16.mxu0 (!%p139_p2), %v3394_v1  ;;  %3295 = vmatprep.subr.bf16.mxu1 (!%p139_p2), %v3394_v1  ;;  %v3395_v3 = vmov (!%p139_p2), 65535   ;;  %vm3396_vm2 = vmmov (!%p139_p2), 0   ;;  %vm705_vm3 = vcmask (!%p139_p2), 220160   ;;  %v3663_v61 = vld [vmem:[%s4194_s2] ss:$0 sm:$0xff] (!%p139_p2) }
   0x7   : > { %3000 = vmatpush3.bf16.msra.mxu0 (!%p139_p2), %v3310_v0  ;;  %3297 = vmatpush3.bf16.msra.mxu1 (!%p139_p2), %v3310_v0  ;;  %s162_s18 = smul.u32 (!%p139_p2), 145, %s2476_s13  ;;  %v927_v4 = vsel (!%p139_p2), %vm925_vm0, 4294967295, %v3395_v3  ;;  %vm2274_vm4 = vcmask (!%p139_p2), 27648  }
   0x8   : > { %3001 = vmatprep.subr.bf16.mxu0 (!%p139_p2), %v3394_v1  ;;  %3003 = vmatprep.mubr.msk.bf16.mxu0 (!%p139_p2), %vm3396_vm2, %v3394_v1  ;;  %v928_v5 = vsel (!%p139_p2), %vm926_vm1, %v927_v4, 0 }
   0x9   : > { %p163_p3 = scmp.lt.s32.totalorder (!%p139_p2), %s162_s18, 289  ;;  %3296 = vmatprep.subr.bf16.mxu1 (!%p139_p2), %v3394_v1  ;;  %3151 = vmatprep.mubr.msk.bf16.mxu1 (!%p139_p2), %vm3396_vm2, %v3394_v1  ;;  %v930_v6 = vand.u32 (!%p139_p2), %v3311_v2, %v928_v5 }
   0xb   : > { %3002 = vmatpush3.bf16.msra.mxu0 (!%p139_p2), %v930_v6  ;;  %3298 = vmatpush3.bf16.msra.mxu1 (!%p139_p2), %v930_v6 }
   0xd   : > { %s4197_s18 = smov (!%p163_p3, %s162_s18), 289 }
   0xe   : > { %s2481_s19 = sshll.u32 %s4197_s18, 2 }
   0xf   : > { %s3447_s22 = scalar_lea.vmem %s4192_s0, %s2481_s19  ;;  %s3680_s27 = scalar_lea.vmem %s4195_s3, %s2481_s19 }
  0x10   : > { %v3312_v7 = vld [vmem:[%s3447_s22] sm:$0xff]   ;;  %v3313_v8 = vld [vmem:[%s3447_s22 + $0x128] sm:$0xff]   ;;  %v3315_v10 = vld [vmem:[%s3447_s22 + $0x130] sm:$0xff]  }
  0x11   : > { %3004 = vmatmul.mubr.msk.bf16.vlgmr.msra.gmra.mrb[0].mxu0 %vm705_vm3, %v3312_v7  ;;  %3152 = vmatmul.mubr.msk.bf16.vlgmr.msra.gmra.mrb[0].mxu1 %vm705_vm3, %v3313_v8  ;;  %v3314_v9 = vld [vmem:[%s3447_s22 + $0x8] sm:$0xff]   ;;  %v3316_v11 = vld [vmem:[%s3447_s22 + $0x10] sm:$0xff]   ;;  %v3317_v12 = vld [vmem:[%s3447_s22 + $0x138] sm:$0xff]  }
  0x12   : > { %3007 = vmatprep.mubr.msk.bf16.mxu0 %vm3396_vm2, %v3394_v1  ;;  %3155 = vmatprep.mubr.msk.bf16.mxu1 %vm3396_vm2, %v3394_v1  ;;  %v3318_v13 = vld [vmem:[%s3447_s22 + $0x18] sm:$0xff]   ;;  %v3319_v14 = vld [vmem:[%s3447_s22 + $0x140] sm:$0xff]   ;;  %v3321_v16 = vld [vmem:[%s3447_s22 + $0x148] sm:$0xff]  }
  0x13   : > { %v3320_v15 = vld [vmem:[%s3447_s22 + $0x20] sm:$0xff]   ;;  %v3322_v17 = vld [vmem:[%s3447_s22 + $0x28] sm:$0xff]   ;;  %v3323_v18 = vld [vmem:[%s3447_s22 + $0x150] sm:$0xff]  }
  0x14   : > { %v3324_v19 = vld [vmem:[%s3447_s22 + $0x30] sm:$0xff]   ;;  %v3325_v20 = vld [vmem:[%s3447_s22 + $0x158] sm:$0xff]   ;;  %v3327_v22 = vld [vmem:[%s3447_s22 + $0x160] sm:$0xff]  }
  0x15   : > { %v3326_v21 = vld [vmem:[%s3447_s22 + $0x38] sm:$0xff]   ;;  %v3328_v23 = vld [vmem:[%s3447_s22 + $0x40] sm:$0xff]   ;;  %v3329_v24 = vld [vmem:[%s3447_s22 + $0x168] sm:$0xff]  }
  0x16   : > { %v3330_v25 = vld [vmem:[%s3447_s22 + $0x48] sm:$0xff]   ;;  %v3331_v26 = vld [vmem:[%s3447_s22 + $0x170] sm:$0xff]   ;;  %v3333_v28 = vld [vmem:[%s3447_s22 + $0x178] sm:$0xff]  }
  0x17   : > { %v3332_v27 = vld [vmem:[%s3447_s22 + $0x50] sm:$0xff]   ;;  %v3334_v29 = vld [vmem:[%s3447_s22 + $0x58] sm:$0xff]   ;;  %v3335_v30 = vld [vmem:[%s3447_s22 + $0x180] sm:$0xff]  }
  0x18   : > { %v3336_v31 = vld [vmem:[%s3447_s22 + $0x60] sm:$0xff]   ;;  %v3337_v32 = vld [vmem:[%s3447_s22 + $0x188] sm:$0xff]   ;;  %v3339_v34 = vld [vmem:[%s3447_s22 + $0x190] sm:$0xff]  }
  0x19   : > { %3008 = vmatmul.mubr.msk.bf16.gmra.mrb[4].mxu0 %vm705_vm3, %v3314_v9  ;;  %3156 = vmatmul.mubr.msk.bf16.gmra.mrb[4].mxu1 %vm705_vm3, %v3315_v10  ;;  %v3338_v33 = vld [vmem:[%s3447_s22 + $0x68] sm:$0xff]   ;;  %v3340_v35 = vld [vmem:[%s3447_s22 + $0x70] sm:$0xff]   ;;  %v3341_v36 = vld [vmem:[%s3447_s22 + $0x198] sm:$0xff]  }
  0x1a   : > { %3011 = vmatprep.mubr.msk.bf16.mxu0 %vm3396_vm2, %v3394_v1  ;;  %3159 = vmatprep.mubr.msk.bf16.mxu1 %vm3396_vm2, %v3394_v1  ;;  %v3342_v37 = vld [vmem:[%s3447_s22 + $0x78] sm:$0xff]   ;;  %v3343_v38 = vld [vmem:[%s3447_s22 + $0x1a0] sm:$0xff]   ;;  %v3345_v40 = vld [vmem:[%s3447_s22 + $0x1a8] sm:$0xff]  }
  0x1b   : > { %v3344_v39 = vld [vmem:[%s3447_s22 + $0x80] sm:$0xff]   ;;  %v3346_v41 = vld [vmem:[%s3447_s22 + $0x88] sm:$0xff]   ;;  %v3347_v42 = vld [vmem:[%s3447_s22 + $0x1b0] sm:$0xff]  }
  0x1c   : > { %v3348_v43 = vld [vmem:[%s3447_s22 + $0x90] sm:$0xff]   ;;  %v3349_v44 = vld [vmem:[%s3447_s22 + $0x1b8] sm:$0xff]   ;;  %v3351_v46 = vld [vmem:[%s3447_s22 + $0x1c0] sm:$0xff]  }
  0x1d   : > { %v3350_v45 = vld [vmem:[%s3447_s22 + $0x98] sm:$0xff]   ;;  %v3352_v47 = vld [vmem:[%s3447_s22 + $0xa0] sm:$0xff]   ;;  %v3353_v48 = vld [vmem:[%s3447_s22 + $0x1c8] sm:$0xff]  }
  0x1e   : > { %v3354_v49 = vld [vmem:[%s3447_s22 + $0xa8] sm:$0xff]   ;;  %v3355_v50 = vld [vmem:[%s3447_s22 + $0x1d0] sm:$0xff]   ;;  %v3357_v52 = vld [vmem:[%s3447_s22 + $0x1d8] sm:$0xff]  }
  0x1f   : > { %v3356_v51 = vld [vmem:[%s3447_s22 + $0xb0] sm:$0xff]   ;;  %v3358_v53 = vld [vmem:[%s3447_s22 + $0xb8] sm:$0xff]   ;;  %v3359_v54 = vld [vmem:[%s3447_s22 + $0x1e0] sm:$0xff]  }
  0x20   : > { %v3360_v55 = vld [vmem:[%s3447_s22 + $0xc0] sm:$0xff]   ;;  %v3361_v56 = vld [vmem:[%s3447_s22 + $0x1e8] sm:$0xff]   ;;  %v3363_v58 = vld [vmem:[%s3447_s22 + $0x1f0] sm:$0xff]  }
  0x21   : > { %3012 = vmatmul.mubr.msk.bf16.gmra.mrb[8].mxu0 %vm705_vm3, %v3316_v11  ;;  %3160 = vmatmul.mubr.msk.bf16.gmra.mrb[8].mxu1 %vm705_vm3, %v3317_v12  ;;  %v3362_v57 = vld [vmem:[%s3447_s22 + $0xc8] sm:$0xff]   ;;  %v3364_v59 = vld [vmem:[%s3447_s22 + $0xd0] sm:$0xff]   ;;  %v3365_v60 = vld [vmem:[%s3447_s22 + $0x1f8] sm:$0xff]  }
  0x22   : > { %3015 = vmatprep.mubr.msk.bf16.mxu0 %vm3396_vm2, %v3394_v1  ;;  %3163 = vmatprep.mubr.msk.bf16.mxu1 %vm3396_vm2, %v3394_v1  ;;  %v3366_v2 = vld [vmem:[%s3447_s22 + $0xd8] sm:$0xff]   ;;  %v3367_v7 = vld [vmem:[%s3447_s22 + $0x200] sm:$0xff]  }
  0x29   : > { %3016 = vmatmul.mubr.msk.bf16.gmra.mrb[12].mxu0 %vm705_vm3, %v3318_v13  ;;  %3164 = vmatmul.mubr.msk.bf16.gmra.mrb[12].mxu1 %vm705_vm3, %v3319_v14 }
  0x2a   : > { %3019 = vmatprep.mubr.msk.bf16.mxu0 %vm3396_vm2, %v3394_v1  ;;  %3167 = vmatprep.mubr.msk.bf16.mxu1 %vm3396_vm2, %v3394_v1 }
  0x31   : > { %3020 = vmatmul.mubr.msk.bf16.gmra.mrb[16].mxu0 %vm705_vm3, %v3320_v15  ;;  %3168 = vmatmul.mubr.msk.bf16.gmra.mrb[16].mxu1 %vm705_vm3, %v3321_v16 }
  0x32   : > { %3023 = vmatprep.mubr.msk.bf16.mxu0 %vm3396_vm2, %v3394_v1  ;;  %3171 = vmatprep.mubr.msk.bf16.mxu1 %vm3396_vm2, %v3394_v1 }
  0x39   : > { %3024 = vmatmul.mubr.msk.bf16.gmra.mrb[20].mxu0 %vm705_vm3, %v3322_v17  ;;  %3172 = vmatmul.mubr.msk.bf16.gmra.mrb[20].mxu1 %vm705_vm3, %v3323_v18 }
  0x3a   : > { %3027 = vmatprep.mubr.msk.bf16.mxu0 %vm3396_vm2, %v3394_v1  ;;  %3175 = vmatprep.mubr.msk.bf16.mxu1 %vm3396_vm2, %v3394_v1 }
  0x41   : > { %3028 = vmatmul.mubr.msk.bf16.gmra.mrb[24].mxu0 %vm705_vm3, %v3324_v19  ;;  %3176 = vmatmul.mubr.msk.bf16.gmra.mrb[24].mxu1 %vm705_vm3, %v3325_v20 }
  0x42   : > { %3031 = vmatprep.mubr.msk.bf16.mxu0 %vm3396_vm2, %v3394_v1  ;;  %3179 = vmatprep.mubr.msk.bf16.mxu1 %vm3396_vm2, %v3394_v1 }
  0x49   : > { %3032 = vmatmul.mubr.msk.bf16.gmra.mrb[28].mxu0 %vm705_vm3, %v3326_v21  ;;  %3180 = vmatmul.mubr.msk.bf16.gmra.mrb[28].mxu1 %vm705_vm3, %v3327_v22 }
  0x4a   : > { %3035 = vmatprep.mubr.msk.bf16.mxu0 %vm3396_vm2, %v3394_v1  ;;  %3183 = vmatprep.mubr.msk.bf16.mxu1 %vm3396_vm2, %v3394_v1 }
  0x51   : > { %3036 = vmatmul.mubr.msk.bf16.gmra.mrb[32].mxu0 %vm705_vm3, %v3328_v23  ;;  %3184 = vmatmul.mubr.msk.bf16.gmra.mrb[32].mxu1 %vm705_vm3, %v3329_v24  ;;  %v3368_v24 = vld [vmem:[%s3447_s22 + $0xe0] sm:$0xff]  }
  0x52   : > { %3039 = vmatprep.mubr.msk.bf16.mxu0 %vm3396_vm2, %v3394_v1  ;;  %3187 = vmatprep.mubr.msk.bf16.mxu1 %vm3396_vm2, %v3394_v1 }
  0x59   : > { %3040 = vmatmul.mubr.msk.bf16.gmra.mrb[36].mxu0 %vm705_vm3, %v3330_v25  ;;  %3188 = vmatmul.mubr.msk.bf16.gmra.mrb[36].mxu1 %vm705_vm3, %v3331_v26 }
  0x5a   : > { %3043 = vmatprep.mubr.msk.bf16.mxu0 %vm3396_vm2, %v3394_v1  ;;  %3191 = vmatprep.mubr.msk.bf16.mxu1 %vm3396_vm2, %v3394_v1 }
  0x61   : > { %3044 = vmatmul.mubr.msk.bf16.gmra.mrb[40].mxu0 %vm705_vm3, %v3332_v27  ;;  %3192 = vmatmul.mubr.msk.bf16.gmra.mrb[40].mxu1 %vm705_vm3, %v3333_v28 }
  0x62   : > { %3047 = vmatprep.mubr.msk.bf16.mxu0 %vm3396_vm2, %v3394_v1  ;;  %3195 = vmatprep.mubr.msk.bf16.mxu1 %vm3396_vm2, %v3394_v1 }
  0x69   : > { %3048 = vmatmul.mubr.msk.bf16.gmra.mrb[44].mxu0 %vm705_vm3, %v3334_v29  ;;  %3196 = vmatmul.mubr.msk.bf16.gmra.mrb[44].mxu1 %vm705_vm3, %v3335_v30  ;;  %v3369_v29 = vld [vmem:[%s3447_s22 + $0x208] sm:$0xff]  }
  0x6a   : > { %3051 = vmatprep.mubr.msk.bf16.mxu0 %vm3396_vm2, %v3394_v1  ;;  %3199 = vmatprep.mubr.msk.bf16.mxu1 %vm3396_vm2, %v3394_v1 }
  0x71   : > { %3052 = vmatmul.mubr.msk.bf16.gmra.mrb[48].mxu0 %vm705_vm3, %v3336_v31  ;;  %3200 = vmatmul.mubr.msk.bf16.gmra.mrb[48].mxu1 %vm705_vm3, %v3337_v32 }
  0x72   : > { %3055 = vmatprep.mubr.msk.bf16.mxu0 %vm3396_vm2, %v3394_v1  ;;  %3203 = vmatprep.mubr.msk.bf16.mxu1 %vm3396_vm2, %v3394_v1 }
  0x79   : > { %3056 = vmatmul.mubr.msk.bf16.gmra.mrb[52].mxu0 %vm705_vm3, %v3338_v33  ;;  %3204 = vmatmul.mubr.msk.bf16.gmra.mrb[52].mxu1 %vm705_vm3, %v3339_v34 }
  0x7a   : > { %3059 = vmatprep.mubr.msk.bf16.mxu0 %vm3396_vm2, %v3394_v1  ;;  %3207 = vmatprep.mubr.msk.bf16.mxu1 %vm3396_vm2, %v3394_v1 }
  0x81   : > { %3060 = vmatmul.mubr.msk.bf16.gmra.mrb[56].mxu0 %vm705_vm3, %v3340_v35  ;;  %3208 = vmatmul.mubr.msk.bf16.gmra.mrb[56].mxu1 %vm705_vm3, %v3341_v36 }
  0x82   : > { %3063 = vmatprep.mubr.msk.bf16.mxu0 %vm3396_vm2, %v3394_v1  ;;  %3211 = vmatprep.mubr.msk.bf16.mxu1 %vm3396_vm2, %v3394_v1 }
  0x89   : > { %3064 = vmatmul.mubr.msk.bf16.gmra.mrb[60].mxu0 %vm705_vm3, %v3342_v37  ;;  %3212 = vmatmul.mubr.msk.bf16.gmra.mrb[60].mxu1 %vm705_vm3, %v3343_v38 }
  0x8a   : > { %3067 = vmatprep.mubr.msk.bf16.mxu0 %vm3396_vm2, %v3394_v1  ;;  %3215 = vmatprep.mubr.msk.bf16.mxu1 %vm3396_vm2, %v3394_v1 }
  0x91   : > { %3068 = vmatmul.mubr.msk.bf16.gmra.mrb[64].mxu0 %vm705_vm3, %v3344_v39  ;;  %3216 = vmatmul.mubr.msk.bf16.gmra.mrb[64].mxu1 %vm705_vm3, %v3345_v40 }
  0x92   : > { %3071 = vmatprep.mubr.msk.bf16.mxu0 %vm3396_vm2, %v3394_v1  ;;  %3219 = vmatprep.mubr.msk.bf16.mxu1 %vm3396_vm2, %v3394_v1 }
  0x99   : > { %3072 = vmatmul.mubr.msk.bf16.gmra.mrb[68].mxu0 %vm705_vm3, %v3346_v41  ;;  %3220 = vmatmul.mubr.msk.bf16.gmra.mrb[68].mxu1 %vm705_vm3, %v3347_v42 }
  0x9a   : > { %3075 = vmatprep.mubr.msk.bf16.mxu0 %vm3396_vm2, %v3394_v1  ;;  %3223 = vmatprep.mubr.msk.bf16.mxu1 %vm3396_vm2, %v3394_v1 }
  0xa1   : > { %3076 = vmatmul.mubr.msk.bf16.gmra.mrb[72].mxu0 %vm705_vm3, %v3348_v43  ;;  %3224 = vmatmul.mubr.msk.bf16.gmra.mrb[72].mxu1 %vm705_vm3, %v3349_v44 }
  0xa2   : > { %3079 = vmatprep.mubr.msk.bf16.mxu0 %vm3396_vm2, %v3394_v1  ;;  %3227 = vmatprep.mubr.msk.bf16.mxu1 %vm3396_vm2, %v3394_v1 }
  0xa9   : > { %3080 = vmatmul.mubr.msk.bf16.gmra.mrb[76].mxu0 %vm705_vm3, %v3350_v45  ;;  %3228 = vmatmul.mubr.msk.bf16.gmra.mrb[76].mxu1 %vm705_vm3, %v3351_v46  ;;  %v3370_v46 = vld [vmem:[%s3447_s22 + $0xe8] sm:$0xff]  }
  0xaa   : > { %3083 = vmatprep.mubr.msk.bf16.mxu0 %vm3396_vm2, %v3394_v1  ;;  %3231 = vmatprep.mubr.msk.bf16.mxu1 %vm3396_vm2, %v3394_v1 }
  0xb1   : > { %3084 = vmatmul.mubr.msk.bf16.gmra.mrb[80].mxu0 %vm705_vm3, %v3352_v47  ;;  %3232 = vmatmul.mubr.msk.bf16.gmra.mrb[80].mxu1 %vm705_vm3, %v3353_v48 }
  0xb2   : > { %3087 = vmatprep.mubr.msk.bf16.mxu0 %vm3396_vm2, %v3394_v1  ;;  %3235 = vmatprep.mubr.msk.bf16.mxu1 %vm3396_vm2, %v3394_v1 }
  0xb9   : > { %3088 = vmatmul.mubr.msk.bf16.gmra.mrb[84].mxu0 %vm705_vm3, %v3354_v49  ;;  %3236 = vmatmul.mubr.msk.bf16.gmra.mrb[84].mxu1 %vm705_vm3, %v3355_v50 }
  0xba   : > { %3091 = vmatprep.mubr.msk.bf16.mxu0 %vm3396_vm2, %v3394_v1  ;;  %3239 = vmatprep.mubr.msk.bf16.mxu1 %vm3396_vm2, %v3394_v1 }
  0xc1   : > { %3092 = vmatmul.mubr.msk.bf16.gmra.mrb[88].mxu0 %vm705_vm3, %v3356_v51  ;;  %3240 = vmatmul.mubr.msk.bf16.gmra.mrb[88].mxu1 %vm705_vm3, %v3357_v52  ;;  %v3371_v51 = vld [vmem:[%s3447_s22 + $0x210] sm:$0xff]  }
  0xc2   : > { %3095 = vmatprep.mubr.msk.bf16.mxu0 %vm3396_vm2, %v3394_v1  ;;  %3243 = vmatprep.mubr.msk.bf16.mxu1 %vm3396_vm2, %v3394_v1 }
  0xc9   : > { %3096 = vmatmul.mubr.msk.bf16.gmra.mrb[92].mxu0 %vm705_vm3, %v3358_v53  ;;  %3244 = vmatmul.mubr.msk.bf16.gmra.mrb[92].mxu1 %vm705_vm3, %v3359_v54 }
  0xca   : > { %3099 = vmatprep.mubr.msk.bf16.mxu0 %vm3396_vm2, %v3394_v1  ;;  %3247 = vmatprep.mubr.msk.bf16.mxu1 %vm3396_vm2, %v3394_v1 }
  0xd1   : > { %3100 = vmatmul.mubr.msk.bf16.gmra.mrb[96].mxu0 %vm705_vm3, %v3360_v55  ;;  %3248 = vmatmul.mubr.msk.bf16.gmra.mrb[96].mxu1 %vm705_vm3, %v3361_v56 }
  0xd2   : > { %3103 = vmatprep.mubr.msk.bf16.mxu0 %vm3396_vm2, %v3394_v1  ;;  %3251 = vmatprep.mubr.msk.bf16.mxu1 %vm3396_vm2, %v3394_v1 }
  0xd9   : > { %3104 = vmatmul.mubr.msk.bf16.gmra.mrb[100].mxu0 %vm705_vm3, %v3362_v57  ;;  %3252 = vmatmul.mubr.msk.bf16.gmra.mrb[100].mxu1 %vm705_vm3, %v3363_v58 }
  0xda   : > { %3107 = vmatprep.mubr.msk.bf16.mxu0 %vm3396_vm2, %v3394_v1  ;;  %3255 = vmatprep.mubr.msk.bf16.mxu1 %vm3396_vm2, %v3394_v1 }
  0xe1   : > { %3108 = vmatmul.mubr.msk.bf16.gmra.mrb[104].mxu0 %vm705_vm3, %v3364_v59  ;;  %3256 = vmatmul.mubr.msk.bf16.gmra.mrb[104].mxu1 %vm705_vm3, %v3365_v60 }
  0xe2   : > { %3111 = vmatprep.mubr.msk.bf16.mxu0 %vm3396_vm2, %v3394_v1  ;;  %3259 = vmatprep.mubr.msk.bf16.mxu1 %vm3396_vm2, %v3394_v1 }
  0xe4   : > { %v966_v62 = vpop.f32.mrb[0].mxu0  ;;  %v1262_v3 = vpop.f32.mrb[0].mxu1 }
  0xe5   : > { %v967_v63 = vadd.f32 %v3663_v61, %v966_v62  ;;  %v3005_v0 = vpop.f32.mrb[1].mxu0  ;;  %v1263_v5 = vadd.f32 %v3663_v61, %v1262_v3  ;;  %v3153_v6 = vpop.f32.mrb[1].mxu1 }
  0xe6   : > { %v969_v4 = vpop.f32.mrb[2].mxu0  ;;  %v1265_v11 = vpop.f32.mrb[2].mxu1  ;;  %v3372_v6 = vld [vmem:[%s3447_s22 + $0xf0] sm:$0xff]  }
  0xe7   : > { %v1548_v8 = vmax.f32 %v967_v63, 0.0  ;;  %v970_v9 = vadd.f32 %v3663_v61, %v969_v4  ;;  %v3006_v10 = vpop.f32.mrb[3].mxu0  ;;  %v1622_v12 = vmax.f32 %v1263_v5, 0.0  ;;  %v1266_v13 = vadd.f32 %v3663_v61, %v1265_v11  ;;  %v3154_v14 = vpop.f32.mrb[3].mxu1  ;;  %v3373_v11 = vld [vmem:[%s3447_s22 + $0x218] sm:$0xff]  }
  0xe9   : > { %v2779_v15 = vpack.c.bf16 %v1548_v8, %v1548_v8  ;;  %v1549_v16 = vmax.f32 %v970_v9, 0.0  ;;  %3112 = vmatmul.mubr.msk.bf16.gmra.mrb[108].mxu0 %vm705_vm3, %v3366_v2  ;;  %v2853_v17 = vpack.c.bf16 %v1622_v12, %v1622_v12  ;;  %v1623_v18 = vmax.f32 %v1266_v13, 0.0  ;;  %3260 = vmatmul.mubr.msk.bf16.gmra.mrb[108].mxu1 %vm705_vm3, %v3367_v7 }
  0xea   : > { %3115 = vmatprep.mubr.msk.bf16.mxu0 %vm3396_vm2, %v3394_v1  ;;  %3263 = vmatprep.mubr.msk.bf16.mxu1 %vm3396_vm2, %v3394_v1 }
  0xeb   : > { %2275 = vst.msk [vmem:[%s3680_s27] sm:$0xf] %vm2274_vm4, %v2779_v15  ;;  %v2780_v19 = vpack.c.bf16 %v1549_v16, %v1549_v16  ;;  %2349 = vst.msk [vmem:[%s3680_s27 + $0x128] sm:$0xf] %vm2274_vm4, %v2853_v17  ;;  %v2854_v21 = vpack.c.bf16 %v1623_v18, %v1623_v18 }
  0xec   : > { %v974_v20 = vpop.f32.mrb[4].mxu0  ;;  %v1270_v25 = vpop.f32.mrb[4].mxu1 }
  0xed   : > { %2276 = vst.msk [vmem:[%s3680_s27 + $0x4] sm:$0xf] %vm2274_vm4, %v2780_v19  ;;  %v975_v22 = vadd.f32 %v3663_v61, %v974_v20  ;;  %v3009_v23 = vpop.f32.mrb[5].mxu0  ;;  %2350 = vst.msk [vmem:[%s3680_s27 + $0x12c] sm:$0xf] %vm2274_vm4, %v2854_v21  ;;  %v1271_v27 = vadd.f32 %v3663_v61, %v1270_v25  ;;  %v3157_v28 = vpop.f32.mrb[5].mxu1 }
  0xee   : > { %v977_v26 = vpop.f32.mrb[6].mxu0  ;;  %v1273_v33 = vpop.f32.mrb[6].mxu1  ;;  %v3374_v28 = vld [vmem:[%s3447_s22 + $0xf8] sm:$0xff]  }
  0xef   : > { %v1550_v30 = vmax.f32 %v975_v22, 0.0  ;;  %v978_v31 = vadd.f32 %v3663_v61, %v977_v26  ;;  %v3010_v32 = vpop.f32.mrb[7].mxu0  ;;  %v1624_v34 = vmax.f32 %v1271_v27, 0.0  ;;  %v1274_v35 = vadd.f32 %v3663_v61, %v1273_v33  ;;  %v3158_v36 = vpop.f32.mrb[7].mxu1  ;;  %v3375_v33 = vld [vmem:[%s3447_s22 + $0x220] sm:$0xff]  }
  0xf1   : > { %v2781_v37 = vpack.c.bf16 %v1550_v30, %v1550_v30  ;;  %v1551_v38 = vmax.f32 %v978_v31, 0.0  ;;  %3116 = vmatmul.mubr.msk.bf16.gmra.mrb[112].mxu0 %vm705_vm3, %v3368_v24  ;;  %v2855_v39 = vpack.c.bf16 %v1624_v34, %v1624_v34  ;;  %v1625_v40 = vmax.f32 %v1274_v35, 0.0  ;;  %3264 = vmatmul.mubr.msk.bf16.gmra.mrb[112].mxu1 %vm705_vm3, %v3369_v29 }
  0xf2   : > { %3119 = vmatprep.mubr.msk.bf16.mxu0 %vm3396_vm2, %v3394_v1  ;;  %3267 = vmatprep.mubr.msk.bf16.mxu1 %vm3396_vm2, %v3394_v1 }
  0xf3   : > { %2277 = vst.msk [vmem:[%s3680_s27 + $0x8] sm:$0xf] %vm2274_vm4, %v2781_v37  ;;  %v2782_v41 = vpack.c.bf16 %v1551_v38, %v1551_v38  ;;  %2351 = vst.msk [vmem:[%s3680_s27 + $0x130] sm:$0xf] %vm2274_vm4, %v2855_v39  ;;  %v2856_v43 = vpack.c.bf16 %v1625_v40, %v1625_v40 }
  0xf4   : > { %v982_v42 = vpop.f32.mrb[8].mxu0  ;;  %v1278_v47 = vpop.f32.mrb[8].mxu1 }
  0xf5   : > { %2278 = vst.msk [vmem:[%s3680_s27 + $0xc] sm:$0xf] %vm2274_vm4, %v2782_v41  ;;  %v983_v44 = vadd.f32 %v3663_v61, %v982_v42  ;;  %v3013_v45 = vpop.f32.mrb[9].mxu0  ;;  %2352 = vst.msk [vmem:[%s3680_s27 + $0x134] sm:$0xf] %vm2274_vm4, %v2856_v43  ;;  %v1279_v49 = vadd.f32 %v3663_v61, %v1278_v47  ;;  %v3161_v50 = vpop.f32.mrb[9].mxu1 }
  0xf6   : > { %v985_v48 = vpop.f32.mrb[10].mxu0  ;;  %v1281_v55 = vpop.f32.mrb[10].mxu1  ;;  %v3376_v50 = vld [vmem:[%s3447_s22 + $0x100] sm:$0xff]  }
  0xf7   : > { %v1552_v52 = vmax.f32 %v983_v44, 0.0  ;;  %v986_v53 = vadd.f32 %v3663_v61, %v985_v48  ;;  %v3014_v54 = vpop.f32.mrb[11].mxu0  ;;  %v1626_v56 = vmax.f32 %v1279_v49, 0.0  ;;  %v1282_v57 = vadd.f32 %v3663_v61, %v1281_v55  ;;  %v3162_v58 = vpop.f32.mrb[11].mxu1  ;;  %v3377_v55 = vld [vmem:[%s3447_s22 + $0x228] sm:$0xff]  }
  0xf9   : > { %v2783_v59 = vpack.c.bf16 %v1552_v52, %v1552_v52  ;;  %v1553_v60 = vmax.f32 %v986_v53, 0.0  ;;  %3120 = vmatmul.mubr.msk.bf16.gmra.mrb[116].mxu0 %vm705_vm3, %v3370_v46  ;;  %v2857_v62 = vpack.c.bf16 %v1626_v56, %v1626_v56  ;;  %v1627_v63 = vmax.f32 %v1282_v57, 0.0  ;;  %3268 = vmatmul.mubr.msk.bf16.gmra.mrb[116].mxu1 %vm705_vm3, %v3371_v51 }
  0xfa   : > { %3123 = vmatprep.mubr.msk.bf16.mxu0 %vm3396_vm2, %v3394_v1  ;;  %3271 = vmatprep.mubr.msk.bf16.mxu1 %vm3396_vm2, %v3394_v1 }
  0xfb   : > { %2279 = vst.msk [vmem:[%s3680_s27 + $0x10] sm:$0xf] %vm2274_vm4, %v2783_v59  ;;  %v2784_v0 = vpack.c.bf16 %v1553_v60, %v1553_v60  ;;  %2353 = vst.msk [vmem:[%s3680_s27 + $0x138] sm:$0xf] %vm2274_vm4, %v2857_v62  ;;  %v2858_v3 = vpack.c.bf16 %v1627_v63, %v1627_v63 }
  0xfc   : > { %v990_v2 = vpop.f32.mrb[12].mxu0  ;;  %v1286_v7 = vpop.f32.mrb[12].mxu1 }
  0xfd   : > { %2280 = vst.msk [vmem:[%s3680_s27 + $0x14] sm:$0xf] %vm2274_vm4, %v2784_v0  ;;  %v991_v4 = vadd.f32 %v3663_v61, %v990_v2  ;;  %v3017_v5 = vpop.f32.mrb[13].mxu0  ;;  %2354 = vst.msk [vmem:[%s3680_s27 + $0x13c] sm:$0xf] %vm2274_vm4, %v2858_v3  ;;  %v1287_v9 = vadd.f32 %v3663_v61, %v1286_v7  ;;  %v3165_v10 = vpop.f32.mrb[13].mxu1 }
  0xfe   : > { %v993_v8 = vpop.f32.mrb[14].mxu0  ;;  %v1289_v15 = vpop.f32.mrb[14].mxu1  ;;  %v3378_v10 = vld [vmem:[%s3447_s22 + $0x108] sm:$0xff]  }
  0xff   : > { %v1554_v12 = vmax.f32 %v991_v4, 0.0  ;;  %v994_v13 = vadd.f32 %v3663_v61, %v993_v8  ;;  %v3018_v14 = vpop.f32.mrb[15].mxu0  ;;  %v1628_v16 = vmax.f32 %v1287_v9, 0.0  ;;  %v1290_v17 = vadd.f32 %v3663_v61, %v1289_v15  ;;  %v3166_v18 = vpop.f32.mrb[15].mxu1  ;;  %v3379_v15 = vld [vmem:[%s3447_s22 + $0x230] sm:$0xff]  }
 0x101   : > { %v2785_v19 = vpack.c.bf16 %v1554_v12, %v1554_v12  ;;  %v1555_v20 = vmax.f32 %v994_v13, 0.0  ;;  %3124 = vmatmul.mubr.msk.bf16.gmra.mrb[120].mxu0 %vm705_vm3, %v3372_v6  ;;  %v2859_v21 = vpack.c.bf16 %v1628_v16, %v1628_v16  ;;  %v1629_v22 = vmax.f32 %v1290_v17, 0.0  ;;  %3272 = vmatmul.mubr.msk.bf16.gmra.mrb[120].mxu1 %vm705_vm3, %v3373_v11 }
 0x102   : > { %3127 = vmatprep.mubr.msk.bf16.mxu0 %vm3396_vm2, %v3394_v1  ;;  %3275 = vmatprep.mubr.msk.bf16.mxu1 %vm3396_vm2, %v3394_v1 }
 0x103   : > { %2281 = vst.msk [vmem:[%s3680_s27 + $0x18] sm:$0xf] %vm2274_vm4, %v2785_v19  ;;  %v2786_v23 = vpack.c.bf16 %v1555_v20, %v1555_v20  ;;  %2355 = vst.msk [vmem:[%s3680_s27 + $0x140] sm:$0xf] %vm2274_vm4, %v2859_v21  ;;  %v2860_v25 = vpack.c.bf16 %v1629_v22, %v1629_v22 }
 0x104   : > { %v998_v24 = vpop.f32.mrb[16].mxu0  ;;  %v1294_v29 = vpop.f32.mrb[16].mxu1 }
 0x105   : > { %2282 = vst.msk [vmem:[%s3680_s27 + $0x1c] sm:$0xf] %vm2274_vm4, %v2786_v23  ;;  %v999_v26 = vadd.f32 %v3663_v61, %v998_v24  ;;  %v3021_v27 = vpop.f32.mrb[17].mxu0  ;;  %2356 = vst.msk [vmem:[%s3680_s27 + $0x144] sm:$0xf] %vm2274_vm4, %v2860_v25  ;;  %v1295_v31 = vadd.f32 %v3663_v61, %v1294_v29  ;;  %v3169_v32 = vpop.f32.mrb[17].mxu1 }
 0x106   : > { %v1001_v30 = vpop.f32.mrb[18].mxu0  ;;  %v1297_v37 = vpop.f32.mrb[18].mxu1  ;;  %v3380_v32 = vld [vmem:[%s3447_s22 + $0x110] sm:$0xff]  }
 0x107   : > { %v1556_v34 = vmax.f32 %v999_v26, 0.0  ;;  %v1002_v35 = vadd.f32 %v3663_v61, %v1001_v30  ;;  %v3022_v36 = vpop.f32.mrb[19].mxu0  ;;  %v1630_v38 = vmax.f32 %v1295_v31, 0.0  ;;  %v1298_v39 = vadd.f32 %v3663_v61, %v1297_v37  ;;  %v3170_v40 = vpop.f32.mrb[19].mxu1  ;;  %v3381_v37 = vld [vmem:[%s3447_s22 + $0x238] sm:$0xff]  }
 0x109   : > { %v2787_v41 = vpack.c.bf16 %v1556_v34, %v1556_v34  ;;  %v1557_v42 = vmax.f32 %v1002_v35, 0.0  ;;  %3128 = vmatmul.mubr.msk.bf16.gmra.mrb[124].mxu0 %vm705_vm3, %v3374_v28  ;;  %v2861_v43 = vpack.c.bf16 %v1630_v38, %v1630_v38  ;;  %v1631_v44 = vmax.f32 %v1298_v39, 0.0  ;;  %3276 = vmatmul.mubr.msk.bf16.gmra.mrb[124].mxu1 %vm705_vm3, %v3375_v33 }
 0x10a   : > { %3131 = vmatprep.mubr.msk.bf16.mxu0 %vm3396_vm2, %v3394_v1  ;;  %3279 = vmatprep.mubr.msk.bf16.mxu1 %vm3396_vm2, %v3394_v1 }
 0x10b   : > { %2283 = vst.msk [vmem:[%s3680_s27 + $0x20] sm:$0xf] %vm2274_vm4, %v2787_v41  ;;  %v2788_v45 = vpack.c.bf16 %v1557_v42, %v1557_v42  ;;  %2357 = vst.msk [vmem:[%s3680_s27 + $0x148] sm:$0xf] %vm2274_vm4, %v2861_v43  ;;  %v2862_v47 = vpack.c.bf16 %v1631_v44, %v1631_v44 }
 0x10c   : > { %v1006_v46 = vpop.f32.mrb[20].mxu0  ;;  %v1302_v51 = vpop.f32.mrb[20].mxu1 }
 0x10d   : > { %2284 = vst.msk [vmem:[%s3680_s27 + $0x24] sm:$0xf] %vm2274_vm4, %v2788_v45  ;;  %v1007_v48 = vadd.f32 %v3663_v61, %v1006_v46  ;;  %v3025_v49 = vpop.f32.mrb[21].mxu0  ;;  %2358 = vst.msk [vmem:[%s3680_s27 + $0x14c] sm:$0xf] %vm2274_vm4, %v2862_v47  ;;  %v1303_v53 = vadd.f32 %v3663_v61, %v1302_v51  ;;  %v3173_v54 = vpop.f32.mrb[21].mxu1 }
 0x10e   : > { %v1009_v52 = vpop.f32.mrb[22].mxu0  ;;  %v1305_v59 = vpop.f32.mrb[22].mxu1  ;;  %v3382_v54 = vld [vmem:[%s3447_s22 + $0x118] sm:$0xff]  }
 0x10f   : > { %v1558_v56 = vmax.f32 %v1007_v48, 0.0  ;;  %v1010_v57 = vadd.f32 %v3663_v61, %v1009_v52  ;;  %v3026_v58 = vpop.f32.mrb[23].mxu0  ;;  %v1632_v60 = vmax.f32 %v1303_v53, 0.0  ;;  %v1306_v62 = vadd.f32 %v3663_v61, %v1305_v59  ;;  %v3174_v63 = vpop.f32.mrb[23].mxu1  ;;  %v3383_v59 = vld [vmem:[%s3447_s22 + $0x240] ss:$0 sps:$4 sm:$0xff]  }
 0x111   : > { %v2789_v0 = vpack.c.bf16 %v1558_v56, %v1558_v56  ;;  %v1559_v2 = vmax.f32 %v1010_v57, 0.0  ;;  %3132 = vmatmul.mubr.msk.bf16.gmra.mrb[128].mxu0 %vm705_vm3, %v3376_v50  ;;  %v2863_v3 = vpack.c.bf16 %v1632_v60, %v1632_v60  ;;  %v1633_v4 = vmax.f32 %v1306_v62, 0.0  ;;  %3280 = vmatmul.mubr.msk.bf16.gmra.mrb[128].mxu1 %vm705_vm3, %v3377_v55 }
 0x112   : > { %3135 = vmatprep.mubr.msk.bf16.mxu0 %vm3396_vm2, %v3394_v1  ;;  %3283 = vmatprep.mubr.msk.bf16.mxu1 %vm3396_vm2, %v3394_v1 }
 0x113   : > { %2285 = vst.msk [vmem:[%s3680_s27 + $0x28] sm:$0xf] %vm2274_vm4, %v2789_v0  ;;  %v2790_v5 = vpack.c.bf16 %v1559_v2, %v1559_v2  ;;  %2359 = vst.msk [vmem:[%s3680_s27 + $0x150] sm:$0xf] %vm2274_vm4, %v2863_v3  ;;  %v2864_v7 = vpack.c.bf16 %v1633_v4, %v1633_v4 }
 0x114   : > { %v1014_v6 = vpop.f32.mrb[24].mxu0  ;;  %v1310_v11 = vpop.f32.mrb[24].mxu1 }
 0x115   : > { %2286 = vst.msk [vmem:[%s3680_s27 + $0x2c] sm:$0xf] %vm2274_vm4, %v2790_v5  ;;  %v1015_v8 = vadd.f32 %v3663_v61, %v1014_v6  ;;  %v3029_v9 = vpop.f32.mrb[25].mxu0  ;;  %2360 = vst.msk [vmem:[%s3680_s27 + $0x154] sm:$0xf] %vm2274_vm4, %v2864_v7  ;;  %v1311_v13 = vadd.f32 %v3663_v61, %v1310_v11  ;;  %v3177_v14 = vpop.f32.mrb[25].mxu1 }
 0x116   : > { %v1017_v12 = vpop.f32.mrb[26].mxu0  ;;  %v1313_v19 = vpop.f32.mrb[26].mxu1  ;;  %v3384_v14 = vld [vmem:[%s3447_s22 + $0x120] sm:$0xff]  }
 0x117   : > { %v1560_v16 = vmax.f32 %v1015_v8, 0.0  ;;  %v1018_v17 = vadd.f32 %v3663_v61, %v1017_v12  ;;  %v3030_v18 = vpop.f32.mrb[27].mxu0  ;;  %v1634_v20 = vmax.f32 %v1311_v13, 0.0  ;;  %v1314_v21 = vadd.f32 %v3663_v61, %v1313_v19  ;;  %v3178_v22 = vpop.f32.mrb[27].mxu1 }
 0x119   : > { %v2791_v23 = vpack.c.bf16 %v1560_v16, %v1560_v16  ;;  %v1561_v24 = vmax.f32 %v1018_v17, 0.0  ;;  %3136 = vmatmul.mubr.msk.bf16.gmra.mrb[132].mxu0 %vm705_vm3, %v3378_v10  ;;  %v2865_v25 = vpack.c.bf16 %v1634_v20, %v1634_v20  ;;  %v1635_v26 = vmax.f32 %v1314_v21, 0.0  ;;  %3284 = vmatmul.mubr.msk.bf16.gmra.mrb[132].mxu1 %vm705_vm3, %v3379_v15 }
 0x11a   : > { %3139 = vmatprep.mubr.msk.bf16.mxu0 %vm3396_vm2, %v3394_v1  ;;  %3287 = vmatprep.mubr.msk.bf16.mxu1 %vm3396_vm2, %v3394_v1 }
 0x11b   : > { %2287 = vst.msk [vmem:[%s3680_s27 + $0x30] sm:$0xf] %vm2274_vm4, %v2791_v23  ;;  %v2792_v27 = vpack.c.bf16 %v1561_v24, %v1561_v24  ;;  %2361 = vst.msk [vmem:[%s3680_s27 + $0x158] sm:$0xf] %vm2274_vm4, %v2865_v25  ;;  %v2866_v29 = vpack.c.bf16 %v1635_v26, %v1635_v26 }
 0x11c   : > { %v1022_v28 = vpop.f32.mrb[28].mxu0  ;;  %v1318_v33 = vpop.f32.mrb[28].mxu1 }
 0x11d   : > { %2288 = vst.msk [vmem:[%s3680_s27 + $0x34] sm:$0xf] %vm2274_vm4, %v2792_v27  ;;  %v1023_v30 = vadd.f32 %v3663_v61, %v1022_v28  ;;  %v3033_v31 = vpop.f32.mrb[29].mxu0  ;;  %2362 = vst.msk [vmem:[%s3680_s27 + $0x15c] sm:$0xf] %vm2274_vm4, %v2866_v29  ;;  %v1319_v35 = vadd.f32 %v3663_v61, %v1318_v33  ;;  %v3181_v36 = vpop.f32.mrb[29].mxu1 }
 0x11e   : > { %v1025_v34 = vpop.f32.mrb[30].mxu0  ;;  %v1321_v41 = vpop.f32.mrb[30].mxu1 }
 0x11f   : > { %v1562_v38 = vmax.f32 %v1023_v30, 0.0  ;;  %v1026_v39 = vadd.f32 %v3663_v61, %v1025_v34  ;;  %v3034_v40 = vpop.f32.mrb[31].mxu0  ;;  %v1636_v42 = vmax.f32 %v1319_v35, 0.0  ;;  %v1322_v43 = vadd.f32 %v3663_v61, %v1321_v41  ;;  %v3182_v44 = vpop.f32.mrb[31].mxu1 }
 0x121   : > { %v2793_v45 = vpack.c.bf16 %v1562_v38, %v1562_v38  ;;  %v1563_v46 = vmax.f32 %v1026_v39, 0.0  ;;  %3140 = vmatmul.mubr.msk.bf16.gmra.mrb[136].mxu0 %vm705_vm3, %v3380_v32  ;;  %v2867_v47 = vpack.c.bf16 %v1636_v42, %v1636_v42  ;;  %v1637_v48 = vmax.f32 %v1322_v43, 0.0  ;;  %3288 = vmatmul.mubr.msk.bf16.gmra.mrb[136].mxu1 %vm705_vm3, %v3381_v37 }
 0x122   : > { %3143 = vmatprep.mubr.msk.bf16.mxu0 %vm3396_vm2, %v3394_v1  ;;  %3291 = vmatprep.mubr.msk.bf16.mxu1 %vm3396_vm2, %v3394_v1 }
 0x123   : > { %2289 = vst.msk [vmem:[%s3680_s27 + $0x38] sm:$0xf] %vm2274_vm4, %v2793_v45  ;;  %v2794_v49 = vpack.c.bf16 %v1563_v46, %v1563_v46  ;;  %2363 = vst.msk [vmem:[%s3680_s27 + $0x160] sm:$0xf] %vm2274_vm4, %v2867_v47  ;;  %v2868_v51 = vpack.c.bf16 %v1637_v48, %v1637_v48 }
 0x124   : > { %v1030_v50 = vpop.f32.mrb[32].mxu0  ;;  %v1326_v55 = vpop.f32.mrb[32].mxu1 }
 0x125   : > { %2290 = vst.msk [vmem:[%s3680_s27 + $0x3c] sm:$0xf] %vm2274_vm4, %v2794_v49  ;;  %v1031_v52 = vadd.f32 %v3663_v61, %v1030_v50  ;;  %v3037_v53 = vpop.f32.mrb[33].mxu0  ;;  %2364 = vst.msk [vmem:[%s3680_s27 + $0x164] sm:$0xf] %vm2274_vm4, %v2868_v51  ;;  %v1327_v57 = vadd.f32 %v3663_v61, %v1326_v55  ;;  %v3185_v58 = vpop.f32.mrb[33].mxu1 }
 0x126   : > { %v1033_v56 = vpop.f32.mrb[34].mxu0  ;;  %v1329_v0 = vpop.f32.mrb[34].mxu1 }
 0x127   : > { %v1564_v60 = vmax.f32 %v1031_v52, 0.0  ;;  %v1034_v62 = vadd.f32 %v3663_v61, %v1033_v56  ;;  %v3038_v63 = vpop.f32.mrb[35].mxu0  ;;  %v1638_v2 = vmax.f32 %v1327_v57, 0.0  ;;  %v1330_v3 = vadd.f32 %v3663_v61, %v1329_v0  ;;  %v3186_v4 = vpop.f32.mrb[35].mxu1 }
 0x129   : > { %v2795_v5 = vpack.c.bf16 %v1564_v60, %v1564_v60  ;;  %v1565_v6 = vmax.f32 %v1034_v62, 0.0  ;;  %3144 = vmatmul.mubr.msk.bf16.gmra.mrb[140].mxu0 %vm705_vm3, %v3382_v54  ;;  %v2869_v7 = vpack.c.bf16 %v1638_v2, %v1638_v2  ;;  %v1639_v8 = vmax.f32 %v1330_v3, 0.0  ;;  %3292 = vmatmul.mubr.msk.bf16.gmra.mrb[140].mxu1 %vm705_vm3, %v3383_v59 }
 0x12a   : > { %3147 = vmatprep.mubr.msk.bf16.mxu0 %vm3396_vm2, %v3394_v1 }
 0x12b   : > { %2291 = vst.msk [vmem:[%s3680_s27 + $0x40] sm:$0xf] %vm2274_vm4, %v2795_v5  ;;  %v2796_v9 = vpack.c.bf16 %v1565_v6, %v1565_v6  ;;  %2365 = vst.msk [vmem:[%s3680_s27 + $0x168] sm:$0xf] %vm2274_vm4, %v2869_v7  ;;  %v2870_v11 = vpack.c.bf16 %v1639_v8, %v1639_v8 }
 0x12c   : > { %v1038_v10 = vpop.f32.mrb[36].mxu0  ;;  %v1334_v15 = vpop.f32.mrb[36].mxu1 }
 0x12d   : > { %2292 = vst.msk [vmem:[%s3680_s27 + $0x44] sm:$0xf] %vm2274_vm4, %v2796_v9  ;;  %v1039_v12 = vadd.f32 %v3663_v61, %v1038_v10  ;;  %v3041_v13 = vpop.f32.mrb[37].mxu0  ;;  %2366 = vst.msk [vmem:[%s3680_s27 + $0x16c] sm:$0xf] %vm2274_vm4, %v2870_v11  ;;  %v1335_v16 = vadd.f32 %v3663_v61, %v1334_v15  ;;  %v3189_v17 = vpop.f32.mrb[37].mxu1 }
 0x12e   : > { %v1041_v1 = vpop.f32.mrb[38].mxu0  ;;  %v1337_v21 = vpop.f32.mrb[38].mxu1 }
 0x12f   : > { %v1566_v18 = vmax.f32 %v1039_v12, 0.0  ;;  %v1042_v19 = vadd.f32 %v3663_v61, %v1041_v1  ;;  %v3042_v20 = vpop.f32.mrb[39].mxu0  ;;  %v1640_v22 = vmax.f32 %v1335_v16, 0.0  ;;  %v1338_v23 = vadd.f32 %v3663_v61, %v1337_v21  ;;  %v3190_v24 = vpop.f32.mrb[39].mxu1 }
 0x131   : > { %v2797_v25 = vpack.c.bf16 %v1566_v18, %v1566_v18  ;;  %v1567_v26 = vmax.f32 %v1042_v19, 0.0  ;;  %3148 = vmatmul.mubr.msk.bf16.gmra.mrb[144].mxu0 %vm705_vm3, %v3384_v14  ;;  %v2871_v27 = vpack.c.bf16 %v1640_v22, %v1640_v22  ;;  %v1641_v28 = vmax.f32 %v1338_v23, 0.0 }
 0x133   : > { %2293 = vst.msk [vmem:[%s3680_s27 + $0x48] sm:$0xf] %vm2274_vm4, %v2797_v25  ;;  %v2798_v29 = vpack.c.bf16 %v1567_v26, %v1567_v26  ;;  %2367 = vst.msk [vmem:[%s3680_s27 + $0x170] sm:$0xf] %vm2274_vm4, %v2871_v27  ;;  %v2872_v31 = vpack.c.bf16 %v1641_v28, %v1641_v28 }
 0x134   : > { %v1046_v30 = vpop.f32.mrb[40].mxu0  ;;  %v1342_v34 = vpop.f32.mrb[40].mxu1 }
 0x135   : > { %2294 = vst.msk [vmem:[%s3680_s27 + $0x4c] sm:$0xf] %vm2274_vm4, %v2798_v29  ;;  %v1047_v32 = vadd.f32 %v3663_v61, %v1046_v30  ;;  %v3045_v33 = vpop.f32.mrb[41].mxu0  ;;  %2368 = vst.msk [vmem:[%s3680_s27 + $0x174] sm:$0xf] %vm2274_vm4, %v2872_v31  ;;  %v1343_v36 = vadd.f32 %v3663_v61, %v1342_v34  ;;  %v3193_v37 = vpop.f32.mrb[41].mxu1 }
 0x136   : > { %v1049_v35 = vpop.f32.mrb[42].mxu0  ;;  %v1345_v41 = vpop.f32.mrb[42].mxu1 }
 0x137   : > { %v1568_v38 = vmax.f32 %v1047_v32, 0.0  ;;  %v1050_v39 = vadd.f32 %v3663_v61, %v1049_v35  ;;  %v3046_v40 = vpop.f32.mrb[43].mxu0  ;;  %v1642_v42 = vmax.f32 %v1343_v36, 0.0  ;;  %v1346_v43 = vadd.f32 %v3663_v61, %v1345_v41  ;;  %v3194_v44 = vpop.f32.mrb[43].mxu1 }
 0x139   : > { %v2799_v45 = vpack.c.bf16 %v1568_v38, %v1568_v38  ;;  %v1569_v46 = vmax.f32 %v1050_v39, 0.0  ;;  %v2873_v47 = vpack.c.bf16 %v1642_v42, %v1642_v42  ;;  %v1643_v48 = vmax.f32 %v1346_v43, 0.0 }
 0x13b   : > { %2295 = vst.msk [vmem:[%s3680_s27 + $0x50] sm:$0xf] %vm2274_vm4, %v2799_v45  ;;  %v2800_v49 = vpack.c.bf16 %v1569_v46, %v1569_v46  ;;  %2369 = vst.msk [vmem:[%s3680_s27 + $0x178] sm:$0xf] %vm2274_vm4, %v2873_v47  ;;  %v2874_v51 = vpack.c.bf16 %v1643_v48, %v1643_v48 }
 0x13c   : > { %v1054_v50 = vpop.f32.mrb[44].mxu0  ;;  %v1350_v54 = vpop.f32.mrb[44].mxu1 }
 0x13d   : > { %2296 = vst.msk [vmem:[%s3680_s27 + $0x54] sm:$0xf] %vm2274_vm4, %v2800_v49  ;;  %v1055_v52 = vadd.f32 %v3663_v61, %v1054_v50  ;;  %v3049_v53 = vpop.f32.mrb[45].mxu0  ;;  %2370 = vst.msk [vmem:[%s3680_s27 + $0x17c] sm:$0xf] %vm2274_vm4, %v2874_v51  ;;  %v1351_v56 = vadd.f32 %v3663_v61, %v1350_v54  ;;  %v3197_v57 = vpop.f32.mrb[45].mxu1 }
 0x13e   : > { %v1057_v55 = vpop.f32.mrb[46].mxu0  ;;  %v1353_v62 = vpop.f32.mrb[46].mxu1 }
 0x13f   : > { %v1570_v58 = vmax.f32 %v1055_v52, 0.0  ;;  %v1058_v59 = vadd.f32 %v3663_v61, %v1057_v55  ;;  %v3050_v60 = vpop.f32.mrb[47].mxu0  ;;  %v1644_v63 = vmax.f32 %v1351_v56, 0.0  ;;  %v1354_v0 = vadd.f32 %v3663_v61, %v1353_v62  ;;  %v3198_v2 = vpop.f32.mrb[47].mxu1 }
 0x141   : > { %v2801_v3 = vpack.c.bf16 %v1570_v58, %v1570_v58  ;;  %v1571_v4 = vmax.f32 %v1058_v59, 0.0  ;;  %v2875_v5 = vpack.c.bf16 %v1644_v63, %v1644_v63  ;;  %v1645_v6 = vmax.f32 %v1354_v0, 0.0 }
 0x143   : > { %2297 = vst.msk [vmem:[%s3680_s27 + $0x58] sm:$0xf] %vm2274_vm4, %v2801_v3  ;;  %v2802_v7 = vpack.c.bf16 %v1571_v4, %v1571_v4  ;;  %2371 = vst.msk [vmem:[%s3680_s27 + $0x180] sm:$0xf] %vm2274_vm4, %v2875_v5  ;;  %v2876_v9 = vpack.c.bf16 %v1645_v6, %v1645_v6 }
 0x144   : > { %v1062_v8 = vpop.f32.mrb[48].mxu0  ;;  %v1358_v12 = vpop.f32.mrb[48].mxu1 }
 0x145   : > { %2298 = vst.msk [vmem:[%s3680_s27 + $0x5c] sm:$0xf] %vm2274_vm4, %v2802_v7  ;;  %v1063_v10 = vadd.f32 %v3663_v61, %v1062_v8  ;;  %v3053_v11 = vpop.f32.mrb[49].mxu0  ;;  %2372 = vst.msk [vmem:[%s3680_s27 + $0x184] sm:$0xf] %vm2274_vm4, %v2876_v9  ;;  %v1359_v14 = vadd.f32 %v3663_v61, %v1358_v12  ;;  %v3201_v15 = vpop.f32.mrb[49].mxu1 }
 0x146   : > { %v1065_v13 = vpop.f32.mrb[50].mxu0  ;;  %v1361_v18 = vpop.f32.mrb[50].mxu1 }
 0x147   : > { %v1572_v1 = vmax.f32 %v1063_v10, 0.0  ;;  %v1066_v16 = vadd.f32 %v3663_v61, %v1065_v13  ;;  %v3054_v17 = vpop.f32.mrb[51].mxu0  ;;  %v1646_v19 = vmax.f32 %v1359_v14, 0.0  ;;  %v1362_v20 = vadd.f32 %v3663_v61, %v1361_v18  ;;  %v3202_v21 = vpop.f32.mrb[51].mxu1 }
 0x149   : > { %v2803_v22 = vpack.c.bf16 %v1572_v1, %v1572_v1  ;;  %v1573_v23 = vmax.f32 %v1066_v16, 0.0  ;;  %v2877_v24 = vpack.c.bf16 %v1646_v19, %v1646_v19  ;;  %v1647_v25 = vmax.f32 %v1362_v20, 0.0 }
 0x14b   : > { %2299 = vst.msk [vmem:[%s3680_s27 + $0x60] sm:$0xf] %vm2274_vm4, %v2803_v22  ;;  %v2804_v26 = vpack.c.bf16 %v1573_v23, %v1573_v23  ;;  %2373 = vst.msk [vmem:[%s3680_s27 + $0x188] sm:$0xf] %vm2274_vm4, %v2877_v24  ;;  %v2878_v28 = vpack.c.bf16 %v1647_v25, %v1647_v25 }
 0x14c   : > { %v1070_v27 = vpop.f32.mrb[52].mxu0  ;;  %v1366_v31 = vpop.f32.mrb[52].mxu1 }
 0x14d   : > { %2300 = vst.msk [vmem:[%s3680_s27 + $0x64] sm:$0xf] %vm2274_vm4, %v2804_v26  ;;  %v1071_v29 = vadd.f32 %v3663_v61, %v1070_v27  ;;  %v3057_v30 = vpop.f32.mrb[53].mxu0  ;;  %2374 = vst.msk [vmem:[%s3680_s27 + $0x18c] sm:$0xf] %vm2274_vm4, %v2878_v28  ;;  %v1367_v33 = vadd.f32 %v3663_v61, %v1366_v31  ;;  %v3205_v34 = vpop.f32.mrb[53].mxu1 }
 0x14e   : > { %v1073_v32 = vpop.f32.mrb[54].mxu0  ;;  %v1369_v38 = vpop.f32.mrb[54].mxu1 }
 0x14f   : > { %v1574_v35 = vmax.f32 %v1071_v29, 0.0  ;;  %v1074_v36 = vadd.f32 %v3663_v61, %v1073_v32  ;;  %v3058_v37 = vpop.f32.mrb[55].mxu0  ;;  %v1648_v39 = vmax.f32 %v1367_v33, 0.0  ;;  %v1370_v40 = vadd.f32 %v3663_v61, %v1369_v38  ;;  %v3206_v41 = vpop.f32.mrb[55].mxu1 }
 0x151   : > { %v2805_v42 = vpack.c.bf16 %v1574_v35, %v1574_v35  ;;  %v1575_v43 = vmax.f32 %v1074_v36, 0.0  ;;  %v2879_v44 = vpack.c.bf16 %v1648_v39, %v1648_v39  ;;  %v1649_v45 = vmax.f32 %v1370_v40, 0.0 }
 0x153   : > { %2301 = vst.msk [vmem:[%s3680_s27 + $0x68] sm:$0xf] %vm2274_vm4, %v2805_v42  ;;  %v2806_v46 = vpack.c.bf16 %v1575_v43, %v1575_v43  ;;  %2375 = vst.msk [vmem:[%s3680_s27 + $0x190] sm:$0xf] %vm2274_vm4, %v2879_v44  ;;  %v2880_v48 = vpack.c.bf16 %v1649_v45, %v1649_v45 }
 0x154   : > { %v1078_v47 = vpop.f32.mrb[56].mxu0  ;;  %v1374_v51 = vpop.f32.mrb[56].mxu1 }
 0x155   : > { %2302 = vst.msk [vmem:[%s3680_s27 + $0x6c] sm:$0xf] %vm2274_vm4, %v2806_v46  ;;  %v1079_v49 = vadd.f32 %v3663_v61, %v1078_v47  ;;  %v3061_v50 = vpop.f32.mrb[57].mxu0  ;;  %2376 = vst.msk [vmem:[%s3680_s27 + $0x194] sm:$0xf] %vm2274_vm4, %v2880_v48  ;;  %v1375_v53 = vadd.f32 %v3663_v61, %v1374_v51  ;;  %v3209_v54 = vpop.f32.mrb[57].mxu1 }
 0x156   : > { %v1081_v52 = vpop.f32.mrb[58].mxu0  ;;  %v1377_v58 = vpop.f32.mrb[58].mxu1 }
 0x157   : > { %v1576_v55 = vmax.f32 %v1079_v49, 0.0  ;;  %v1082_v56 = vadd.f32 %v3663_v61, %v1081_v52  ;;  %v3062_v57 = vpop.f32.mrb[59].mxu0  ;;  %v1650_v59 = vmax.f32 %v1375_v53, 0.0  ;;  %v1378_v60 = vadd.f32 %v3663_v61, %v1377_v58  ;;  %v3210_v62 = vpop.f32.mrb[59].mxu1 }
 0x159   : > { %v2807_v63 = vpack.c.bf16 %v1576_v55, %v1576_v55  ;;  %v1577_v0 = vmax.f32 %v1082_v56, 0.0  ;;  %v2881_v2 = vpack.c.bf16 %v1650_v59, %v1650_v59  ;;  %v1651_v3 = vmax.f32 %v1378_v60, 0.0 }
 0x15b   : > { %2303 = vst.msk [vmem:[%s3680_s27 + $0x70] sm:$0xf] %vm2274_vm4, %v2807_v63  ;;  %v2808_v4 = vpack.c.bf16 %v1577_v0, %v1577_v0  ;;  %2377 = vst.msk [vmem:[%s3680_s27 + $0x198] sm:$0xf] %vm2274_vm4, %v2881_v2  ;;  %v2882_v6 = vpack.c.bf16 %v1651_v3, %v1651_v3 }
 0x15c   : > { %v1086_v5 = vpop.f32.mrb[60].mxu0  ;;  %v1382_v9 = vpop.f32.mrb[60].mxu1 }
 0x15d   : > { %2304 = vst.msk [vmem:[%s3680_s27 + $0x74] sm:$0xf] %vm2274_vm4, %v2808_v4  ;;  %v1087_v7 = vadd.f32 %v3663_v61, %v1086_v5  ;;  %v3065_v8 = vpop.f32.mrb[61].mxu0  ;;  %2378 = vst.msk [vmem:[%s3680_s27 + $0x19c] sm:$0xf] %vm2274_vm4, %v2882_v6  ;;  %v1383_v11 = vadd.f32 %v3663_v61, %v1382_v9  ;;  %v3213_v12 = vpop.f32.mrb[61].mxu1 }
 0x15e   : > { %v1089_v10 = vpop.f32.mrb[62].mxu0  ;;  %v1385_v1 = vpop.f32.mrb[62].mxu1 }
 0x15f   : > { %v1578_v13 = vmax.f32 %v1087_v7, 0.0  ;;  %v1090_v14 = vadd.f32 %v3663_v61, %v1089_v10  ;;  %v3066_v15 = vpop.f32.mrb[63].mxu0  ;;  %v1652_v16 = vmax.f32 %v1383_v11, 0.0  ;;  %v1386_v17 = vadd.f32 %v3663_v61, %v1385_v1  ;;  %v3214_v18 = vpop.f32.mrb[63].mxu1 }
 0x161   : > { %v2809_v19 = vpack.c.bf16 %v1578_v13, %v1578_v13  ;;  %v1579_v20 = vmax.f32 %v1090_v14, 0.0  ;;  %v2883_v21 = vpack.c.bf16 %v1652_v16, %v1652_v16  ;;  %v1653_v22 = vmax.f32 %v1386_v17, 0.0 }
 0x163   : > { %2305 = vst.msk [vmem:[%s3680_s27 + $0x78] sm:$0xf] %vm2274_vm4, %v2809_v19  ;;  %v2810_v23 = vpack.c.bf16 %v1579_v20, %v1579_v20  ;;  %2379 = vst.msk [vmem:[%s3680_s27 + $0x1a0] sm:$0xf] %vm2274_vm4, %v2883_v21  ;;  %v2884_v25 = vpack.c.bf16 %v1653_v22, %v1653_v22 }
 0x164   : > { %v1094_v24 = vpop.f32.mrb[64].mxu0  ;;  %v1390_v28 = vpop.f32.mrb[64].mxu1 }
 0x165   : > { %2306 = vst.msk [vmem:[%s3680_s27 + $0x7c] sm:$0xf] %vm2274_vm4, %v2810_v23  ;;  %v1095_v26 = vadd.f32 %v3663_v61, %v1094_v24  ;;  %v3069_v27 = vpop.f32.mrb[65].mxu0  ;;  %2380 = vst.msk [vmem:[%s3680_s27 + $0x1a4] sm:$0xf] %vm2274_vm4, %v2884_v25  ;;  %v1391_v30 = vadd.f32 %v3663_v61, %v1390_v28  ;;  %v3217_v31 = vpop.f32.mrb[65].mxu1 }
 0x166   : > { %v1097_v29 = vpop.f32.mrb[66].mxu0  ;;  %v1393_v35 = vpop.f32.mrb[66].mxu1  ;;  %v3978_v23 = vld [vmem:[%s4194_s2] ss:$0 sm:$0xff] }
 0x167   : > { %v1580_v32 = vmax.f32 %v1095_v26, 0.0  ;;  %v1098_v33 = vadd.f32 %v3663_v61, %v1097_v29  ;;  %v3070_v34 = vpop.f32.mrb[67].mxu0  ;;  %v1654_v36 = vmax.f32 %v1391_v30, 0.0  ;;  %v1394_v37 = vadd.f32 %v3663_v61, %v1393_v35  ;;  %v3218_v38 = vpop.f32.mrb[67].mxu1 }
 0x169   : > { %v2811_v39 = vpack.c.bf16 %v1580_v32, %v1580_v32  ;;  %v1581_v40 = vmax.f32 %v1098_v33, 0.0  ;;  %v2885_v41 = vpack.c.bf16 %v1654_v36, %v1654_v36  ;;  %v1655_v42 = vmax.f32 %v1394_v37, 0.0 }
 0x16b   : > { %2307 = vst.msk [vmem:[%s3680_s27 + $0x80] sm:$0xf] %vm2274_vm4, %v2811_v39  ;;  %v2812_v43 = vpack.c.bf16 %v1581_v40, %v1581_v40  ;;  %2381 = vst.msk [vmem:[%s3680_s27 + $0x1a8] sm:$0xf] %vm2274_vm4, %v2885_v41  ;;  %v2886_v45 = vpack.c.bf16 %v1655_v42, %v1655_v42 }
 0x16c   : > { %v1102_v44 = vpop.f32.mrb[68].mxu0  ;;  %v1398_v48 = vpop.f32.mrb[68].mxu1 }
 0x16d   : > { %2308 = vst.msk [vmem:[%s3680_s27 + $0x84] sm:$0xf] %vm2274_vm4, %v2812_v43  ;;  %v1103_v46 = vadd.f32 %v3663_v61, %v1102_v44  ;;  %v3073_v47 = vpop.f32.mrb[69].mxu0  ;;  %2382 = vst.msk [vmem:[%s3680_s27 + $0x1ac] sm:$0xf] %vm2274_vm4, %v2886_v45  ;;  %v1399_v50 = vadd.f32 %v3663_v61, %v1398_v48  ;;  %v3221_v51 = vpop.f32.mrb[69].mxu1 }
 0x16e   : > { %v1105_v49 = vpop.f32.mrb[70].mxu0  ;;  %v1401_v55 = vpop.f32.mrb[70].mxu1 }
 0x16f   : > { %v1582_v52 = vmax.f32 %v1103_v46, 0.0  ;;  %v1106_v53 = vadd.f32 %v3663_v61, %v1105_v49  ;;  %v3074_v54 = vpop.f32.mrb[71].mxu0  ;;  %v1656_v56 = vmax.f32 %v1399_v50, 0.0  ;;  %v1402_v57 = vadd.f32 %v3663_v61, %v1401_v55  ;;  %v3222_v58 = vpop.f32.mrb[71].mxu1 }
 0x171   : > { %v2813_v59 = vpack.c.bf16 %v1582_v52, %v1582_v52  ;;  %v1583_v60 = vmax.f32 %v1106_v53, 0.0  ;;  %v2887_v62 = vpack.c.bf16 %v1656_v56, %v1656_v56  ;;  %v1657_v63 = vmax.f32 %v1402_v57, 0.0 }
 0x173   : > { %2309 = vst.msk [vmem:[%s3680_s27 + $0x88] sm:$0xf] %vm2274_vm4, %v2813_v59  ;;  %v2814_v0 = vpack.c.bf16 %v1583_v60, %v1583_v60  ;;  %2383 = vst.msk [vmem:[%s3680_s27 + $0x1b0] sm:$0xf] %vm2274_vm4, %v2887_v62  ;;  %v2888_v3 = vpack.c.bf16 %v1657_v63, %v1657_v63 }
 0x174   : > { %v1110_v2 = vpop.f32.mrb[72].mxu0  ;;  %v1406_v6 = vpop.f32.mrb[72].mxu1 }
 0x175   : > { %2310 = vst.msk [vmem:[%s3680_s27 + $0x8c] sm:$0xf] %vm2274_vm4, %v2814_v0  ;;  %v1111_v4 = vadd.f32 %v3663_v61, %v1110_v2  ;;  %v3077_v5 = vpop.f32.mrb[73].mxu0  ;;  %2384 = vst.msk [vmem:[%s3680_s27 + $0x1b4] sm:$0xf] %vm2274_vm4, %v2888_v3  ;;  %v1407_v8 = vadd.f32 %v3663_v61, %v1406_v6  ;;  %v3225_v9 = vpop.f32.mrb[73].mxu1 }
 0x176   : > { %v1113_v7 = vpop.f32.mrb[74].mxu0  ;;  %v1409_v13 = vpop.f32.mrb[74].mxu1 }
 0x177   : > { %v1584_v10 = vmax.f32 %v1111_v4, 0.0  ;;  %v1114_v11 = vadd.f32 %v3663_v61, %v1113_v7  ;;  %v3078_v12 = vpop.f32.mrb[75].mxu0  ;;  %v1658_v14 = vmax.f32 %v1407_v8, 0.0  ;;  %v1410_v15 = vadd.f32 %v3663_v61, %v1409_v13  ;;  %v3226_v1 = vpop.f32.mrb[75].mxu1 }
 0x179   : > { %v2815_v16 = vpack.c.bf16 %v1584_v10, %v1584_v10  ;;  %v1585_v17 = vmax.f32 %v1114_v11, 0.0  ;;  %v2889_v18 = vpack.c.bf16 %v1658_v14, %v1658_v14  ;;  %v1659_v19 = vmax.f32 %v1410_v15, 0.0 }
 0x17b   : > { %2311 = vst.msk [vmem:[%s3680_s27 + $0x90] sm:$0xf] %vm2274_vm4, %v2815_v16  ;;  %v2816_v20 = vpack.c.bf16 %v1585_v17, %v1585_v17  ;;  %2385 = vst.msk [vmem:[%s3680_s27 + $0x1b8] sm:$0xf] %vm2274_vm4, %v2889_v18  ;;  %v2890_v22 = vpack.c.bf16 %v1659_v19, %v1659_v19 }
 0x17c   : > { %v1118_v21 = vpop.f32.mrb[76].mxu0  ;;  %v1414_v25 = vpop.f32.mrb[76].mxu1 }
 0x17d   : > { %2312 = vst.msk [vmem:[%s3680_s27 + $0x94] sm:$0xf] %vm2274_vm4, %v2816_v20  ;;  %v1119_v61 = vadd.f32 %v3978_v23, %v1118_v21  ;;  %v3081_v24 = vpop.f32.mrb[77].mxu0  ;;  %2386 = vst.msk [vmem:[%s3680_s27 + $0x1bc] sm:$0xf] %vm2274_vm4, %v2890_v22  ;;  %v1415_v27 = vadd.f32 %v3978_v23, %v1414_v25  ;;  %v3229_v28 = vpop.f32.mrb[77].mxu1 }
 0x17e   : > { %v1121_v26 = vpop.f32.mrb[78].mxu0  ;;  %v1417_v32 = vpop.f32.mrb[78].mxu1 }
 0x17f   : > { %v1586_v29 = vmax.f32 %v1119_v61, 0.0  ;;  %v1122_v30 = vadd.f32 %v3978_v23, %v1121_v26  ;;  %v3082_v31 = vpop.f32.mrb[79].mxu0  ;;  %v1660_v33 = vmax.f32 %v1415_v27, 0.0  ;;  %v1418_v34 = vadd.f32 %v3978_v23, %v1417_v32  ;;  %v3230_v35 = vpop.f32.mrb[79].mxu1 }
 0x181   : > { %v2817_v36 = vpack.c.bf16 %v1586_v29, %v1586_v29  ;;  %v1587_v37 = vmax.f32 %v1122_v30, 0.0  ;;  %v2891_v38 = vpack.c.bf16 %v1660_v33, %v1660_v33  ;;  %v1661_v39 = vmax.f32 %v1418_v34, 0.0 }
 0x183   : > { %2313 = vst.msk [vmem:[%s3680_s27 + $0x98] sm:$0xf] %vm2274_vm4, %v2817_v36  ;;  %v2818_v40 = vpack.c.bf16 %v1587_v37, %v1587_v37  ;;  %2387 = vst.msk [vmem:[%s3680_s27 + $0x1c0] sm:$0xf] %vm2274_vm4, %v2891_v38  ;;  %v2892_v42 = vpack.c.bf16 %v1661_v39, %v1661_v39 }
 0x184   : > { %v1126_v41 = vpop.f32.mrb[80].mxu0  ;;  %v1422_v45 = vpop.f32.mrb[80].mxu1 }
 0x185   : > { %2314 = vst.msk [vmem:[%s3680_s27 + $0x9c] sm:$0xf] %vm2274_vm4, %v2818_v40  ;;  %v1127_v43 = vadd.f32 %v3978_v23, %v1126_v41  ;;  %v3085_v44 = vpop.f32.mrb[81].mxu0  ;;  %2388 = vst.msk [vmem:[%s3680_s27 + $0x1c4] sm:$0xf] %vm2274_vm4, %v2892_v42  ;;  %v1423_v47 = vadd.f32 %v3978_v23, %v1422_v45  ;;  %v3233_v48 = vpop.f32.mrb[81].mxu1 }
 0x186   : > { %v1129_v46 = vpop.f32.mrb[82].mxu0  ;;  %v1425_v52 = vpop.f32.mrb[82].mxu1 }
 0x187   : > { %v1588_v49 = vmax.f32 %v1127_v43, 0.0  ;;  %v1130_v50 = vadd.f32 %v3978_v23, %v1129_v46  ;;  %v3086_v51 = vpop.f32.mrb[83].mxu0  ;;  %v1662_v53 = vmax.f32 %v1423_v47, 0.0  ;;  %v1426_v54 = vadd.f32 %v3978_v23, %v1425_v52  ;;  %v3234_v55 = vpop.f32.mrb[83].mxu1 }
 0x189   : > { %v2819_v56 = vpack.c.bf16 %v1588_v49, %v1588_v49  ;;  %v1589_v57 = vmax.f32 %v1130_v50, 0.0  ;;  %v2893_v58 = vpack.c.bf16 %v1662_v53, %v1662_v53  ;;  %v1663_v59 = vmax.f32 %v1426_v54, 0.0 }
 0x18b   : > { %2315 = vst.msk [vmem:[%s3680_s27 + $0xa0] sm:$0xf] %vm2274_vm4, %v2819_v56  ;;  %v2820_v60 = vpack.c.bf16 %v1589_v57, %v1589_v57  ;;  %2389 = vst.msk [vmem:[%s3680_s27 + $0x1c8] sm:$0xf] %vm2274_vm4, %v2893_v58  ;;  %v2894_v63 = vpack.c.bf16 %v1663_v59, %v1663_v59 }
 0x18c   : > { %v1134_v62 = vpop.f32.mrb[84].mxu0  ;;  %v1430_v3 = vpop.f32.mrb[84].mxu1 }
 0x18d   : > { %2316 = vst.msk [vmem:[%s3680_s27 + $0xa4] sm:$0xf] %vm2274_vm4, %v2820_v60  ;;  %v1135_v0 = vadd.f32 %v3978_v23, %v1134_v62  ;;  %v3089_v2 = vpop.f32.mrb[85].mxu0  ;;  %2390 = vst.msk [vmem:[%s3680_s27 + $0x1cc] sm:$0xf] %vm2274_vm4, %v2894_v63  ;;  %v1431_v5 = vadd.f32 %v3978_v23, %v1430_v3  ;;  %v3237_v6 = vpop.f32.mrb[85].mxu1 }
 0x18e   : > { %v1137_v4 = vpop.f32.mrb[86].mxu0  ;;  %v1433_v10 = vpop.f32.mrb[86].mxu1 }
 0x18f   : > { %v1590_v7 = vmax.f32 %v1135_v0, 0.0  ;;  %v1138_v8 = vadd.f32 %v3978_v23, %v1137_v4  ;;  %v3090_v9 = vpop.f32.mrb[87].mxu0  ;;  %v1664_v11 = vmax.f32 %v1431_v5, 0.0  ;;  %v1434_v12 = vadd.f32 %v3978_v23, %v1433_v10  ;;  %v3238_v13 = vpop.f32.mrb[87].mxu1 }
 0x191   : > { %v2821_v14 = vpack.c.bf16 %v1590_v7, %v1590_v7  ;;  %v1591_v15 = vmax.f32 %v1138_v8, 0.0  ;;  %v2895_v1 = vpack.c.bf16 %v1664_v11, %v1664_v11  ;;  %v1665_v16 = vmax.f32 %v1434_v12, 0.0 }
 0x193   : > { %2317 = vst.msk [vmem:[%s3680_s27 + $0xa8] sm:$0xf] %vm2274_vm4, %v2821_v14  ;;  %v2822_v17 = vpack.c.bf16 %v1591_v15, %v1591_v15  ;;  %2391 = vst.msk [vmem:[%s3680_s27 + $0x1d0] sm:$0xf] %vm2274_vm4, %v2895_v1  ;;  %v2896_v19 = vpack.c.bf16 %v1665_v16, %v1665_v16 }
 0x194   : > { %v1142_v18 = vpop.f32.mrb[88].mxu0  ;;  %v1438_v22 = vpop.f32.mrb[88].mxu1 }
 0x195   : > { %2318 = vst.msk [vmem:[%s3680_s27 + $0xac] sm:$0xf] %vm2274_vm4, %v2822_v17  ;;  %v1143_v20 = vadd.f32 %v3978_v23, %v1142_v18  ;;  %v3093_v21 = vpop.f32.mrb[89].mxu0  ;;  %2392 = vst.msk [vmem:[%s3680_s27 + $0x1d4] sm:$0xf] %vm2274_vm4, %v2896_v19  ;;  %v1439_v24 = vadd.f32 %v3978_v23, %v1438_v22  ;;  %v3241_v25 = vpop.f32.mrb[89].mxu1 }
 0x196   : > { %v1145_v61 = vpop.f32.mrb[90].mxu0  ;;  %v1441_v29 = vpop.f32.mrb[90].mxu1 }
 0x197   : > { %v1592_v26 = vmax.f32 %v1143_v20, 0.0  ;;  %v1146_v27 = vadd.f32 %v3978_v23, %v1145_v61  ;;  %v3094_v28 = vpop.f32.mrb[91].mxu0  ;;  %v1666_v30 = vmax.f32 %v1439_v24, 0.0  ;;  %v1442_v31 = vadd.f32 %v3978_v23, %v1441_v29  ;;  %v3242_v32 = vpop.f32.mrb[91].mxu1 }
 0x199   : > { %v2823_v33 = vpack.c.bf16 %v1592_v26, %v1592_v26  ;;  %v1593_v34 = vmax.f32 %v1146_v27, 0.0  ;;  %v2897_v35 = vpack.c.bf16 %v1666_v30, %v1666_v30  ;;  %v1667_v36 = vmax.f32 %v1442_v31, 0.0 }
 0x19b   : > { %2319 = vst.msk [vmem:[%s3680_s27 + $0xb0] sm:$0xf] %vm2274_vm4, %v2823_v33  ;;  %v2824_v37 = vpack.c.bf16 %v1593_v34, %v1593_v34  ;;  %2393 = vst.msk [vmem:[%s3680_s27 + $0x1d8] sm:$0xf] %vm2274_vm4, %v2897_v35  ;;  %v2898_v39 = vpack.c.bf16 %v1667_v36, %v1667_v36 }
 0x19c   : > { %v1150_v38 = vpop.f32.mrb[92].mxu0  ;;  %v1446_v42 = vpop.f32.mrb[92].mxu1 }
 0x19d   : > { %2320 = vst.msk [vmem:[%s3680_s27 + $0xb4] sm:$0xf] %vm2274_vm4, %v2824_v37  ;;  %v1151_v40 = vadd.f32 %v3978_v23, %v1150_v38  ;;  %v3097_v41 = vpop.f32.mrb[93].mxu0  ;;  %2394 = vst.msk [vmem:[%s3680_s27 + $0x1dc] sm:$0xf] %vm2274_vm4, %v2898_v39  ;;  %v1447_v44 = vadd.f32 %v3978_v23, %v1446_v42  ;;  %v3245_v45 = vpop.f32.mrb[93].mxu1 }
 0x19e   : > { %v1153_v43 = vpop.f32.mrb[94].mxu0  ;;  %v1449_v49 = vpop.f32.mrb[94].mxu1 }
 0x19f   : > { %v1594_v46 = vmax.f32 %v1151_v40, 0.0  ;;  %v1154_v47 = vadd.f32 %v3978_v23, %v1153_v43  ;;  %v3098_v48 = vpop.f32.mrb[95].mxu0  ;;  %v1668_v50 = vmax.f32 %v1447_v44, 0.0  ;;  %v1450_v51 = vadd.f32 %v3978_v23, %v1449_v49  ;;  %v3246_v52 = vpop.f32.mrb[95].mxu1 }
 0x1a1   : > { %v2825_v53 = vpack.c.bf16 %v1594_v46, %v1594_v46  ;;  %v1595_v54 = vmax.f32 %v1154_v47, 0.0  ;;  %v2899_v55 = vpack.c.bf16 %v1668_v50, %v1668_v50  ;;  %v1669_v56 = vmax.f32 %v1450_v51, 0.0 }
 0x1a3   : > { %2321 = vst.msk [vmem:[%s3680_s27 + $0xb8] sm:$0xf] %vm2274_vm4, %v2825_v53  ;;  %v2826_v57 = vpack.c.bf16 %v1595_v54, %v1595_v54  ;;  %2395 = vst.msk [vmem:[%s3680_s27 + $0x1e0] sm:$0xf] %vm2274_vm4, %v2899_v55  ;;  %v2900_v59 = vpack.c.bf16 %v1669_v56, %v1669_v56 }
 0x1a4   : > { %v1158_v58 = vpop.f32.mrb[96].mxu0  ;;  %v1454_v63 = vpop.f32.mrb[96].mxu1 }
 0x1a5   : > { %2322 = vst.msk [vmem:[%s3680_s27 + $0xbc] sm:$0xf] %vm2274_vm4, %v2826_v57  ;;  %v1159_v60 = vadd.f32 %v3978_v23, %v1158_v58  ;;  %v3101_v62 = vpop.f32.mrb[97].mxu0  ;;  %2396 = vst.msk [vmem:[%s3680_s27 + $0x1e4] sm:$0xf] %vm2274_vm4, %v2900_v59  ;;  %v1455_v2 = vadd.f32 %v3978_v23, %v1454_v63  ;;  %v3249_v3 = vpop.f32.mrb[97].mxu1 }
 0x1a6   : > { %v1161_v0 = vpop.f32.mrb[98].mxu0  ;;  %v1457_v7 = vpop.f32.mrb[98].mxu1 }
 0x1a7   : > { %v1596_v4 = vmax.f32 %v1159_v60, 0.0  ;;  %v1162_v5 = vadd.f32 %v3978_v23, %v1161_v0  ;;  %v3102_v6 = vpop.f32.mrb[99].mxu0  ;;  %v1670_v8 = vmax.f32 %v1455_v2, 0.0  ;;  %v1458_v9 = vadd.f32 %v3978_v23, %v1457_v7  ;;  %v3250_v10 = vpop.f32.mrb[99].mxu1 }
 0x1a9   : > { %v2827_v11 = vpack.c.bf16 %v1596_v4, %v1596_v4  ;;  %v1597_v12 = vmax.f32 %v1162_v5, 0.0  ;;  %v2901_v13 = vpack.c.bf16 %v1670_v8, %v1670_v8  ;;  %v1671_v14 = vmax.f32 %v1458_v9, 0.0 }
 0x1ab   : > { %2323 = vst.msk [vmem:[%s3680_s27 + $0xc0] sm:$0xf] %vm2274_vm4, %v2827_v11  ;;  %v2828_v15 = vpack.c.bf16 %v1597_v12, %v1597_v12  ;;  %2397 = vst.msk [vmem:[%s3680_s27 + $0x1e8] sm:$0xf] %vm2274_vm4, %v2901_v13  ;;  %v2902_v16 = vpack.c.bf16 %v1671_v14, %v1671_v14 }
 0x1ac   : > { %v1166_v1 = vpop.f32.mrb[100].mxu0  ;;  %v1462_v19 = vpop.f32.mrb[100].mxu1 }
 0x1ad   : > { %2324 = vst.msk [vmem:[%s3680_s27 + $0xc4] sm:$0xf] %vm2274_vm4, %v2828_v15  ;;  %v1167_v17 = vadd.f32 %v3978_v23, %v1166_v1  ;;  %v3105_v18 = vpop.f32.mrb[101].mxu0  ;;  %2398 = vst.msk [vmem:[%s3680_s27 + $0x1ec] sm:$0xf] %vm2274_vm4, %v2902_v16  ;;  %v1463_v21 = vadd.f32 %v3978_v23, %v1462_v19  ;;  %v3253_v22 = vpop.f32.mrb[101].mxu1 }
 0x1ae   : > { %v1169_v20 = vpop.f32.mrb[102].mxu0  ;;  %v1465_v26 = vpop.f32.mrb[102].mxu1 }
 0x1af   : > { %v1598_v61 = vmax.f32 %v1167_v17, 0.0  ;;  %v1170_v24 = vadd.f32 %v3978_v23, %v1169_v20  ;;  %v3106_v25 = vpop.f32.mrb[103].mxu0  ;;  %v1672_v27 = vmax.f32 %v1463_v21, 0.0  ;;  %v1466_v28 = vadd.f32 %v3978_v23, %v1465_v26  ;;  %v3254_v29 = vpop.f32.mrb[103].mxu1 }
 0x1b1   : > { %v2829_v30 = vpack.c.bf16 %v1598_v61, %v1598_v61  ;;  %v1599_v31 = vmax.f32 %v1170_v24, 0.0  ;;  %v2903_v32 = vpack.c.bf16 %v1672_v27, %v1672_v27  ;;  %v1673_v33 = vmax.f32 %v1466_v28, 0.0 }
 0x1b3   : > { %2325 = vst.msk [vmem:[%s3680_s27 + $0xc8] sm:$0xf] %vm2274_vm4, %v2829_v30  ;;  %v2830_v34 = vpack.c.bf16 %v1599_v31, %v1599_v31  ;;  %2399 = vst.msk [vmem:[%s3680_s27 + $0x1f0] sm:$0xf] %vm2274_vm4, %v2903_v32  ;;  %v2904_v36 = vpack.c.bf16 %v1673_v33, %v1673_v33 }
 0x1b4   : > { %v1174_v35 = vpop.f32.mrb[104].mxu0  ;;  %v1470_v39 = vpop.f32.mrb[104].mxu1 }
 0x1b5   : > { %2326 = vst.msk [vmem:[%s3680_s27 + $0xcc] sm:$0xf] %vm2274_vm4, %v2830_v34  ;;  %v1175_v37 = vadd.f32 %v3978_v23, %v1174_v35  ;;  %v3109_v38 = vpop.f32.mrb[105].mxu0  ;;  %2400 = vst.msk [vmem:[%s3680_s27 + $0x1f4] sm:$0xf] %vm2274_vm4, %v2904_v36  ;;  %v1471_v41 = vadd.f32 %v3978_v23, %v1470_v39  ;;  %v3257_v42 = vpop.f32.mrb[105].mxu1 }
 0x1b6   : > { %v1177_v40 = vpop.f32.mrb[106].mxu0  ;;  %v1473_v46 = vpop.f32.mrb[106].mxu1 }
 0x1b7   : > { %v1600_v43 = vmax.f32 %v1175_v37, 0.0  ;;  %v1178_v44 = vadd.f32 %v3978_v23, %v1177_v40  ;;  %v3110_v45 = vpop.f32.mrb[107].mxu0  ;;  %v1674_v47 = vmax.f32 %v1471_v41, 0.0  ;;  %v1474_v48 = vadd.f32 %v3978_v23, %v1473_v46  ;;  %v3258_v49 = vpop.f32.mrb[107].mxu1 }
 0x1b9   : > { %v2831_v50 = vpack.c.bf16 %v1600_v43, %v1600_v43  ;;  %v1601_v51 = vmax.f32 %v1178_v44, 0.0  ;;  %v2905_v52 = vpack.c.bf16 %v1674_v47, %v1674_v47  ;;  %v1675_v53 = vmax.f32 %v1474_v48, 0.0 }
 0x1bb   : > { %2327 = vst.msk [vmem:[%s3680_s27 + $0xd0] sm:$0xf] %vm2274_vm4, %v2831_v50  ;;  %v2832_v54 = vpack.c.bf16 %v1601_v51, %v1601_v51  ;;  %2401 = vst.msk [vmem:[%s3680_s27 + $0x1f8] sm:$0xf] %vm2274_vm4, %v2905_v52  ;;  %v2906_v56 = vpack.c.bf16 %v1675_v53, %v1675_v53 }
 0x1bc   : > { %v1182_v55 = vpop.f32.mrb[108].mxu0  ;;  %v1478_v59 = vpop.f32.mrb[108].mxu1 }
 0x1bd   : > { %2328 = vst.msk [vmem:[%s3680_s27 + $0xd4] sm:$0xf] %vm2274_vm4, %v2832_v54  ;;  %v1183_v57 = vadd.f32 %v3978_v23, %v1182_v55  ;;  %v3113_v58 = vpop.f32.mrb[109].mxu0  ;;  %2402 = vst.msk [vmem:[%s3680_s27 + $0x1fc] sm:$0xf] %vm2274_vm4, %v2906_v56  ;;  %v1479_v62 = vadd.f32 %v3978_v23, %v1478_v59  ;;  %v3261_v63 = vpop.f32.mrb[109].mxu1 }
 0x1be   : > { %v1185_v60 = vpop.f32.mrb[110].mxu0  ;;  %v1481_v4 = vpop.f32.mrb[110].mxu1 }
 0x1bf   : > { %v1602_v0 = vmax.f32 %v1183_v57, 0.0  ;;  %v1186_v2 = vadd.f32 %v3978_v23, %v1185_v60  ;;  %v3114_v3 = vpop.f32.mrb[111].mxu0  ;;  %v1676_v5 = vmax.f32 %v1479_v62, 0.0  ;;  %v1482_v6 = vadd.f32 %v3978_v23, %v1481_v4  ;;  %v3262_v7 = vpop.f32.mrb[111].mxu1 }
 0x1c1   : > { %v2833_v8 = vpack.c.bf16 %v1602_v0, %v1602_v0  ;;  %v1603_v9 = vmax.f32 %v1186_v2, 0.0  ;;  %v2907_v10 = vpack.c.bf16 %v1676_v5, %v1676_v5  ;;  %v1677_v11 = vmax.f32 %v1482_v6, 0.0 }
 0x1c3   : > { %2329 = vst.msk [vmem:[%s3680_s27 + $0xd8] sm:$0xf] %vm2274_vm4, %v2833_v8  ;;  %v2834_v12 = vpack.c.bf16 %v1603_v9, %v1603_v9  ;;  %2403 = vst.msk [vmem:[%s3680_s27 + $0x200] sm:$0xf] %vm2274_vm4, %v2907_v10  ;;  %v2908_v14 = vpack.c.bf16 %v1677_v11, %v1677_v11 }
 0x1c4   : > { %v1190_v13 = vpop.f32.mrb[112].mxu0  ;;  %v1486_v16 = vpop.f32.mrb[112].mxu1 }
 0x1c5   : > { %2330 = vst.msk [vmem:[%s3680_s27 + $0xdc] sm:$0xf] %vm2274_vm4, %v2834_v12  ;;  %v1191_v15 = vadd.f32 %v3978_v23, %v1190_v13  ;;  %v3117_v1 = vpop.f32.mrb[113].mxu0  ;;  %2404 = vst.msk [vmem:[%s3680_s27 + $0x204] sm:$0xf] %vm2274_vm4, %v2908_v14  ;;  %v1487_v18 = vadd.f32 %v3978_v23, %v1486_v16  ;;  %v3265_v19 = vpop.f32.mrb[113].mxu1 }
 0x1c6   : > { %v1193_v17 = vpop.f32.mrb[114].mxu0  ;;  %v1489_v61 = vpop.f32.mrb[114].mxu1 }
 0x1c7   : > { %v1604_v20 = vmax.f32 %v1191_v15, 0.0  ;;  %v1194_v21 = vadd.f32 %v3978_v23, %v1193_v17  ;;  %v3118_v22 = vpop.f32.mrb[115].mxu0  ;;  %v1678_v24 = vmax.f32 %v1487_v18, 0.0  ;;  %v1490_v25 = vadd.f32 %v3978_v23, %v1489_v61  ;;  %v3266_v26 = vpop.f32.mrb[115].mxu1 }
 0x1c9   : > { %v2835_v27 = vpack.c.bf16 %v1604_v20, %v1604_v20  ;;  %v1605_v28 = vmax.f32 %v1194_v21, 0.0  ;;  %v2909_v29 = vpack.c.bf16 %v1678_v24, %v1678_v24  ;;  %v1679_v30 = vmax.f32 %v1490_v25, 0.0 }
 0x1cb   : > { %2331 = vst.msk [vmem:[%s3680_s27 + $0xe0] sm:$0xf] %vm2274_vm4, %v2835_v27  ;;  %v2836_v31 = vpack.c.bf16 %v1605_v28, %v1605_v28  ;;  %2405 = vst.msk [vmem:[%s3680_s27 + $0x208] sm:$0xf] %vm2274_vm4, %v2909_v29  ;;  %v2910_v33 = vpack.c.bf16 %v1679_v30, %v1679_v30 }
 0x1cc   : > { %v1198_v32 = vpop.f32.mrb[116].mxu0  ;;  %v1494_v36 = vpop.f32.mrb[116].mxu1 }
 0x1cd   : > { %2332 = vst.msk [vmem:[%s3680_s27 + $0xe4] sm:$0xf] %vm2274_vm4, %v2836_v31  ;;  %v1199_v34 = vadd.f32 %v3978_v23, %v1198_v32  ;;  %v3121_v35 = vpop.f32.mrb[117].mxu0  ;;  %2406 = vst.msk [vmem:[%s3680_s27 + $0x20c] sm:$0xf] %vm2274_vm4, %v2910_v33  ;;  %v1495_v38 = vadd.f32 %v3978_v23, %v1494_v36  ;;  %v3269_v39 = vpop.f32.mrb[117].mxu1 }
 0x1ce   : > { %v1201_v37 = vpop.f32.mrb[118].mxu0  ;;  %v1497_v43 = vpop.f32.mrb[118].mxu1 }
 0x1cf   : > { %v1606_v40 = vmax.f32 %v1199_v34, 0.0  ;;  %v1202_v41 = vadd.f32 %v3978_v23, %v1201_v37  ;;  %v3122_v42 = vpop.f32.mrb[119].mxu0  ;;  %v1680_v44 = vmax.f32 %v1495_v38, 0.0  ;;  %v1498_v45 = vadd.f32 %v3978_v23, %v1497_v43  ;;  %v3270_v46 = vpop.f32.mrb[119].mxu1 }
 0x1d1   : > { %v2837_v47 = vpack.c.bf16 %v1606_v40, %v1606_v40  ;;  %v1607_v48 = vmax.f32 %v1202_v41, 0.0  ;;  %v2911_v49 = vpack.c.bf16 %v1680_v44, %v1680_v44  ;;  %v1681_v50 = vmax.f32 %v1498_v45, 0.0 }
 0x1d3   : > { %2333 = vst.msk [vmem:[%s3680_s27 + $0xe8] sm:$0xf] %vm2274_vm4, %v2837_v47  ;;  %v2838_v51 = vpack.c.bf16 %v1607_v48, %v1607_v48  ;;  %2407 = vst.msk [vmem:[%s3680_s27 + $0x210] sm:$0xf] %vm2274_vm4, %v2911_v49  ;;  %v2912_v53 = vpack.c.bf16 %v1681_v50, %v1681_v50 }
 0x1d4   : > { %v1206_v52 = vpop.f32.mrb[120].mxu0  ;;  %v1502_v56 = vpop.f32.mrb[120].mxu1 }
 0x1d5   : > { %2334 = vst.msk [vmem:[%s3680_s27 + $0xec] sm:$0xf] %vm2274_vm4, %v2838_v51  ;;  %v1207_v54 = vadd.f32 %v3978_v23, %v1206_v52  ;;  %v3125_v55 = vpop.f32.mrb[121].mxu0  ;;  %2408 = vst.msk [vmem:[%s3680_s27 + $0x214] sm:$0xf] %vm2274_vm4, %v2912_v53  ;;  %v1503_v58 = vadd.f32 %v3978_v23, %v1502_v56  ;;  %v3273_v59 = vpop.f32.mrb[121].mxu1 }
 0x1d6   : > { %v1209_v57 = vpop.f32.mrb[122].mxu0  ;;  %v1505_v0 = vpop.f32.mrb[122].mxu1 }
 0x1d7   : > { %v1608_v60 = vmax.f32 %v1207_v54, 0.0  ;;  %v1210_v62 = vadd.f32 %v3978_v23, %v1209_v57  ;;  %v3126_v63 = vpop.f32.mrb[123].mxu0  ;;  %v1682_v2 = vmax.f32 %v1503_v58, 0.0  ;;  %v1506_v3 = vadd.f32 %v3978_v23, %v1505_v0  ;;  %v3274_v4 = vpop.f32.mrb[123].mxu1 }
 0x1d9   : > { %v2839_v5 = vpack.c.bf16 %v1608_v60, %v1608_v60  ;;  %v1609_v6 = vmax.f32 %v1210_v62, 0.0  ;;  %v2913_v7 = vpack.c.bf16 %v1682_v2, %v1682_v2  ;;  %v1683_v8 = vmax.f32 %v1506_v3, 0.0 }
 0x1db   : > { %2335 = vst.msk [vmem:[%s3680_s27 + $0xf0] sm:$0xf] %vm2274_vm4, %v2839_v5  ;;  %v2840_v9 = vpack.c.bf16 %v1609_v6, %v1609_v6  ;;  %2409 = vst.msk [vmem:[%s3680_s27 + $0x218] sm:$0xf] %vm2274_vm4, %v2913_v7  ;;  %v2914_v11 = vpack.c.bf16 %v1683_v8, %v1683_v8 }
 0x1dc   : > { %v1214_v10 = vpop.f32.mrb[124].mxu0  ;;  %v1510_v14 = vpop.f32.mrb[124].mxu1 }
 0x1dd   : > { %2336 = vst.msk [vmem:[%s3680_s27 + $0xf4] sm:$0xf] %vm2274_vm4, %v2840_v9  ;;  %v1215_v12 = vadd.f32 %v3978_v23, %v1214_v10  ;;  %v3129_v13 = vpop.f32.mrb[125].mxu0  ;;  %2410 = vst.msk [vmem:[%s3680_s27 + $0x21c] sm:$0xf] %vm2274_vm4, %v2914_v11  ;;  %v1511_v1 = vadd.f32 %v3978_v23, %v1510_v14  ;;  %v3277_v16 = vpop.f32.mrb[125].mxu1 }
 0x1de   : > { %v1217_v15 = vpop.f32.mrb[126].mxu0  ;;  %v1513_v20 = vpop.f32.mrb[126].mxu1 }
 0x1df   : > { %v1610_v17 = vmax.f32 %v1215_v12, 0.0  ;;  %v1218_v18 = vadd.f32 %v3978_v23, %v1217_v15  ;;  %v3130_v19 = vpop.f32.mrb[127].mxu0  ;;  %v1684_v21 = vmax.f32 %v1511_v1, 0.0  ;;  %v1514_v22 = vadd.f32 %v3978_v23, %v1513_v20  ;;  %v3278_v61 = vpop.f32.mrb[127].mxu1 }
 0x1e1   : > { %v2841_v24 = vpack.c.bf16 %v1610_v17, %v1610_v17  ;;  %v1611_v25 = vmax.f32 %v1218_v18, 0.0  ;;  %v2915_v26 = vpack.c.bf16 %v1684_v21, %v1684_v21  ;;  %v1685_v27 = vmax.f32 %v1514_v22, 0.0 }
 0x1e3   : > { %2337 = vst.msk [vmem:[%s3680_s27 + $0xf8] sm:$0xf] %vm2274_vm4, %v2841_v24  ;;  %v2842_v28 = vpack.c.bf16 %v1611_v25, %v1611_v25  ;;  %2411 = vst.msk [vmem:[%s3680_s27 + $0x220] sm:$0xf] %vm2274_vm4, %v2915_v26  ;;  %v2916_v30 = vpack.c.bf16 %v1685_v27, %v1685_v27 }
 0x1e4   : > { %v1222_v29 = vpop.f32.mrb[128].mxu0  ;;  %v1518_v33 = vpop.f32.mrb[128].mxu1 }
 0x1e5   : > { %2338 = vst.msk [vmem:[%s3680_s27 + $0xfc] sm:$0xf] %vm2274_vm4, %v2842_v28  ;;  %v1223_v31 = vadd.f32 %v3978_v23, %v1222_v29  ;;  %v3133_v32 = vpop.f32.mrb[129].mxu0  ;;  %2412 = vst.msk [vmem:[%s3680_s27 + $0x224] sm:$0xf] %vm2274_vm4, %v2916_v30  ;;  %v1519_v35 = vadd.f32 %v3978_v23, %v1518_v33  ;;  %v3281_v36 = vpop.f32.mrb[129].mxu1 }
 0x1e6   : > { %v1225_v34 = vpop.f32.mrb[130].mxu0  ;;  %v1521_v40 = vpop.f32.mrb[130].mxu1 }
 0x1e7   : > { %v1612_v37 = vmax.f32 %v1223_v31, 0.0  ;;  %v1226_v38 = vadd.f32 %v3978_v23, %v1225_v34  ;;  %v3134_v39 = vpop.f32.mrb[131].mxu0  ;;  %v1686_v41 = vmax.f32 %v1519_v35, 0.0  ;;  %v1522_v42 = vadd.f32 %v3978_v23, %v1521_v40  ;;  %v3282_v43 = vpop.f32.mrb[131].mxu1 }
 0x1e9   : > { %v2843_v44 = vpack.c.bf16 %v1612_v37, %v1612_v37  ;;  %v1613_v45 = vmax.f32 %v1226_v38, 0.0  ;;  %v2917_v46 = vpack.c.bf16 %v1686_v41, %v1686_v41  ;;  %v1687_v47 = vmax.f32 %v1522_v42, 0.0 }
 0x1eb   : > { %2339 = vst.msk [vmem:[%s3680_s27 + $0x100] sm:$0xf] %vm2274_vm4, %v2843_v44  ;;  %v2844_v48 = vpack.c.bf16 %v1613_v45, %v1613_v45  ;;  %2413 = vst.msk [vmem:[%s3680_s27 + $0x228] sm:$0xf] %vm2274_vm4, %v2917_v46  ;;  %v2918_v50 = vpack.c.bf16 %v1687_v47, %v1687_v47 }
 0x1ec   : > { %v1230_v49 = vpop.f32.mrb[132].mxu0  ;;  %v1526_v53 = vpop.f32.mrb[132].mxu1 }
 0x1ed   : > { %2340 = vst.msk [vmem:[%s3680_s27 + $0x104] sm:$0xf] %vm2274_vm4, %v2844_v48  ;;  %v1231_v51 = vadd.f32 %v3978_v23, %v1230_v49  ;;  %v3137_v52 = vpop.f32.mrb[133].mxu0  ;;  %2414 = vst.msk [vmem:[%s3680_s27 + $0x22c] sm:$0xf] %vm2274_vm4, %v2918_v50  ;;  %v1527_v55 = vadd.f32 %v3978_v23, %v1526_v53  ;;  %v3285_v56 = vpop.f32.mrb[133].mxu1 }
 0x1ee   : > { %v1233_v54 = vpop.f32.mrb[134].mxu0  ;;  %v1529_v60 = vpop.f32.mrb[134].mxu1 }
 0x1ef   : > { %v1614_v57 = vmax.f32 %v1231_v51, 0.0  ;;  %v1234_v58 = vadd.f32 %v3978_v23, %v1233_v54  ;;  %v3138_v59 = vpop.f32.mrb[135].mxu0  ;;  %v1688_v62 = vmax.f32 %v1527_v55, 0.0  ;;  %v1530_v63 = vadd.f32 %v3978_v23, %v1529_v60  ;;  %v3286_v0 = vpop.f32.mrb[135].mxu1 }
 0x1f1   : > { %v2845_v2 = vpack.c.bf16 %v1614_v57, %v1614_v57  ;;  %v1615_v3 = vmax.f32 %v1234_v58, 0.0  ;;  %v2919_v4 = vpack.c.bf16 %v1688_v62, %v1688_v62  ;;  %v1689_v5 = vmax.f32 %v1530_v63, 0.0 }
 0x1f3   : > { %2341 = vst.msk [vmem:[%s3680_s27 + $0x108] sm:$0xf] %vm2274_vm4, %v2845_v2  ;;  %v2846_v6 = vpack.c.bf16 %v1615_v3, %v1615_v3  ;;  %2415 = vst.msk [vmem:[%s3680_s27 + $0x230] sm:$0xf] %vm2274_vm4, %v2919_v4  ;;  %v2920_v8 = vpack.c.bf16 %v1689_v5, %v1689_v5 }
 0x1f4   : > { %v1238_v7 = vpop.f32.mrb[136].mxu0  ;;  %v1534_v11 = vpop.f32.mrb[136].mxu1 }
 0x1f5   : > { %2342 = vst.msk [vmem:[%s3680_s27 + $0x10c] sm:$0xf] %vm2274_vm4, %v2846_v6  ;;  %v1239_v9 = vadd.f32 %v3978_v23, %v1238_v7  ;;  %v3141_v10 = vpop.f32.mrb[137].mxu0  ;;  %2416 = vst.msk [vmem:[%s3680_s27 + $0x234] sm:$0xf] %vm2274_vm4, %v2920_v8  ;;  %v1535_v13 = vadd.f32 %v3978_v23, %v1534_v11  ;;  %v3289_v14 = vpop.f32.mrb[137].mxu1 }
 0x1f6   : > { %v1241_v12 = vpop.f32.mrb[138].mxu0  ;;  %v1537_v17 = vpop.f32.mrb[138].mxu1 }
 0x1f7   : > { %v1616_v15 = vmax.f32 %v1239_v9, 0.0  ;;  %v1242_v1 = vadd.f32 %v3978_v23, %v1241_v12  ;;  %v3142_v16 = vpop.f32.mrb[139].mxu0  ;;  %v1690_v18 = vmax.f32 %v1535_v13, 0.0  ;;  %v1538_v19 = vadd.f32 %v3978_v23, %v1537_v17  ;;  %v3290_v20 = vpop.f32.mrb[139].mxu1 }
 0x1f9   : > { %v2847_v21 = vpack.c.bf16 %v1616_v15, %v1616_v15  ;;  %v1617_v22 = vmax.f32 %v1242_v1, 0.0  ;;  %v2921_v61 = vpack.c.bf16 %v1690_v18, %v1690_v18  ;;  %v1691_v24 = vmax.f32 %v1538_v19, 0.0 }
 0x1fb   : > { %2343 = vst.msk [vmem:[%s3680_s27 + $0x110] sm:$0xf] %vm2274_vm4, %v2847_v21  ;;  %v2848_v25 = vpack.c.bf16 %v1617_v22, %v1617_v22  ;;  %2417 = vst.msk [vmem:[%s3680_s27 + $0x238] sm:$0xf] %vm2274_vm4, %v2921_v61  ;;  %v2922_v27 = vpack.c.bf16 %v1691_v24, %v1691_v24 }
 0x1fc   : > { %v1246_v26 = vpop.f32.mrb[140].mxu0  ;;  %v1542_v30 = vpop.f32.mrb[140].mxu1 }
 0x1fd   : > { %2344 = vst.msk [vmem:[%s3680_s27 + $0x114] sm:$0xf] %vm2274_vm4, %v2848_v25  ;;  %v1247_v28 = vadd.f32 %v3978_v23, %v1246_v26  ;;  %v3145_v29 = vpop.f32.mrb[141].mxu0  ;;  %2418 = vst.msk [vmem:[%s3680_s27 + $0x23c] sm:$0xf] %vm2274_vm4, %v2922_v27  ;;  %v1543_v32 = vadd.f32 %v3978_v23, %v1542_v30  ;;  %v3293_v33 = vpop.f32.mrb[141].mxu1 }
 0x1fe   : > { %v1249_v31 = vpop.f32.mrb[142].mxu0  ;;  %v1545_v37 = vpop.f32.mrb[142].mxu1 }
 0x1ff   : > { %v1618_v34 = vmax.f32 %v1247_v28, 0.0  ;;  %v1250_v35 = vadd.f32 %v3978_v23, %v1249_v31  ;;  %v3146_v36 = vpop.f32.mrb[143].mxu0  ;;  %v1692_v38 = vmax.f32 %v1543_v32, 0.0  ;;  %v3294_v39 = vpop.f32.mrb[143].mxu1 }
 0x201   : > { %v2849_v40 = vpack.c.bf16 %v1618_v34, %v1618_v34  ;;  %v1619_v41 = vmax.f32 %v1250_v35, 0.0  ;;  %v2923_v42 = vpack.c.bf16 %v1692_v38, %v1692_v38 }
 0x203   : > { %2345 = vst.msk [vmem:[%s3680_s27 + $0x118] sm:$0xf] %vm2274_vm4, %v2849_v40  ;;  %v2850_v43 = vpack.c.bf16 %v1619_v41, %v1619_v41  ;;  %2419 = vst.msk [vmem:[%s3680_s27 + $0x240] sm:$0xf] %vm2274_vm4, %v2923_v42 }
 0x204   : > { %v1254_v44 = vpop.f32.mrb[144].mxu0 }
 0x205   : > { %2346 = vst.msk [vmem:[%s3680_s27 + $0x11c] sm:$0xf] %vm2274_vm4, %v2850_v43  ;;  %v1255_v45 = vadd.f32 %v3978_v23, %v1254_v44  ;;  %v3149_v46 = vpop.f32.mrb[145].mxu0 }
 0x206   : > { %v1257_v47 = vpop.f32.mrb[146].mxu0 }
 0x207   : > { %v1620_v48 = vmax.f32 %v1255_v45, 0.0  ;;  %v1258_v49 = vadd.f32 %v3978_v23, %v1257_v47  ;;  %v3150_v50 = vpop.f32.mrb[147].mxu0 }
 0x209   : > { %v2851_v51 = vpack.c.bf16 %v1620_v48, %v1620_v48  ;;  %v1621_v52 = vmax.f32 %v1258_v49, 0.0 }
 0x20b   : > { %2347 = vst.msk [vmem:[%s3680_s27 + $0x120] sm:$0xf] %vm2274_vm4, %v2851_v51  ;;  %v2852_v53 = vpack.c.bf16 %v1621_v52, %v1621_v52 }
 0x20d   : > { %2348 = vst.msk [vmem:[%s3680_s27 + $0x124] sm:$0xf] %vm2274_vm4, %v2852_v53 }
 0x20e PF: > { %s13_s12 = sadd.s32 1, %s3392_s12  }
 0x20f   : > { %p10_p4 = scmp.ge.s32.totalorder %s13_s12, 4  }
 0x211   :  { %12 = sbr.rel (!%p10_p4) target bundleno = 1 (0x1), region = 62 }

// kernel: encoder1_forward.5
= control target key start
LH: loop header
LB: loop body
LE: loop exit
PB: predicated region body
PF: predicated region fallthrough
CT: control target
= control target key end

     0   :  { %vm427_vm0 = vcmask 883712   ;;  %vm578_vm1 = vcmask 1045504   ;;  %vm1515_vm2 = vcmask 60416   ;;  %s2918_s1 = inlined_call_operand.vmem [shape: bf16[108,8], index: 1, kind: input, shape index: {}]   ;;  %s2919_s0 = inlined_call_operand.vmem [shape: bf16[800,108], index: 0, kind: input, shape index: {}]   ;;  %s2920_s2 = inlined_call_operand.vmem [shape: f32[1,8], index: 2, kind: input, shape index: {}]   ;;  %s2921_s3 = inlined_call_operand.vmem [shape: bf16[800,8], index: 3, kind: output, shape index: {}]  }
   0x1   :  { %v2115_v0 = vld [vmem:[%s2918_s1] sm:$0xff]   ;;  %v2116_v1 = vld [vmem:[%s2918_s1 + $0x8] sm:$0xff]   ;;  %v2117_v2 = vld [vmem:[%s2918_s1 + $0x10] sm:$0xff]  }
   0x2   :  { %1985 = vmatprep.subr.bf16.mxu0 %v2115_v0  ;;  %2099 = vmatprep.subr.bf16.mxu1 %v2115_v0  ;;  %v2122_v3 = vld [vmem:[%s2919_s0] sm:$0xff]   ;;  %v2118_v4 = vld [vmem:[%s2918_s1 + $0x18] sm:$0xff]   ;;  %v2124_v5 = vld [vmem:[%s2919_s0 + $0xd0] sm:$0xff]  }
   0x3   :  { %1986 = vmatpush3.bf16.msra.mxu0 %v2115_v0  ;;  %2106 = vmatpush3.bf16.msra.mxu1 %v2115_v0  ;;  %v2119_v6 = vld [vmem:[%s2918_s1 + $0x20] sm:$0xff]   ;;  %v2120_v7 = vld [vmem:[%s2918_s1 + $0x28] sm:$0xff]   ;;  %v2121_v8 = vld [vmem:[%s2918_s1 + $0x30] sm:$0x3f]  }
   0x4   :  { %1987 = vmatprep.subr.bf16.mxu0 %v2116_v1  ;;  %2100 = vmatprep.subr.bf16.mxu1 %v2116_v1  ;;  %v580_v9 = vsel %vm578_vm1, %v2121_v8, 0  ;;  %v2123_v10 = vld [vmem:[%s2919_s0 + $0x8] sm:$0xff]   ;;  %v2125_v11 = vld [vmem:[%s2919_s0 + $0xd8] sm:$0xff]   ;;  %v2126_v12 = vld [vmem:[%s2919_s0 + $0x10] sm:$0xff]  }
   0x5   :  { %1999 = vmatprep.mubr.msk.bf16.mxu0 %vm427_vm0, %v2122_v3  ;;  %2051 = vmatprep.mubr.msk.bf16.mxu1 %vm427_vm0, %v2124_v5  ;;  %v2128_v13 = vld [vmem:[%s2919_s0 + $0xe0] sm:$0xff]   ;;  %v2127_v14 = vld [vmem:[%s2919_s0 + $0x18] sm:$0xff]   ;;  %v2129_v15 = vld [vmem:[%s2919_s0 + $0xe8] sm:$0xff]  }
   0x6   :  { %v2130_v16 = vld [vmem:[%s2919_s0 + $0x20] sm:$0xff]   ;;  %v2132_v17 = vld [vmem:[%s2919_s0 + $0xf0] sm:$0xff]   ;;  %v2131_v18 = vld [vmem:[%s2919_s0 + $0x28] sm:$0xff]  }
   0x7   :  { %1988 = vmatpush3.bf16.msra.mxu0 %v2116_v1  ;;  %2107 = vmatpush3.bf16.msra.mxu1 %v2116_v1  ;;  %v2133_v19 = vld [vmem:[%s2919_s0 + $0xf8] sm:$0xff]   ;;  %v2134_v20 = vld [vmem:[%s2919_s0 + $0x30] sm:$0xff]   ;;  %v2136_v21 = vld [vmem:[%s2919_s0 + $0x100] sm:$0xff]  }
   0x8   :  { %1989 = vmatprep.subr.bf16.mxu0 %v2117_v2  ;;  %2101 = vmatprep.subr.bf16.mxu1 %v2117_v2  ;;  %v2135_v22 = vld [vmem:[%s2919_s0 + $0x38] sm:$0xff]   ;;  %v2137_v23 = vld [vmem:[%s2919_s0 + $0x108] sm:$0xff]   ;;  %v2138_v24 = vld [vmem:[%s2919_s0 + $0x40] sm:$0xff]  }
   0x9   :  { %v2140_v25 = vld [vmem:[%s2919_s0 + $0x110] sm:$0xff]   ;;  %v2139_v26 = vld [vmem:[%s2919_s0 + $0x48] sm:$0xff]   ;;  %v2141_v27 = vld [vmem:[%s2919_s0 + $0x118] sm:$0xff]  }
   0xa   :  { %v2142_v28 = vld [vmem:[%s2919_s0 + $0x50] sm:$0xff]   ;;  %v2144_v29 = vld [vmem:[%s2919_s0 + $0x120] sm:$0xff]   ;;  %v2143_v30 = vld [vmem:[%s2919_s0 + $0x58] sm:$0xff]  }
   0xb   :  { %1990 = vmatpush3.bf16.msra.mxu0 %v2117_v2  ;;  %2108 = vmatpush3.bf16.msra.mxu1 %v2117_v2  ;;  %v2145_v31 = vld [vmem:[%s2919_s0 + $0x128] sm:$0xff]   ;;  %v2146_v32 = vld [vmem:[%s2919_s0 + $0x60] sm:$0xff]   ;;  %v2148_v33 = vld [vmem:[%s2919_s0 + $0x130] sm:$0xff]  }
   0xc   :  { %1991 = vmatprep.subr.bf16.mxu0 %v2118_v4  ;;  %2102 = vmatprep.subr.bf16.mxu1 %v2118_v4  ;;  %v2147_v34 = vld [vmem:[%s2919_s0 + $0x68] sm:$0xff]   ;;  %v2149_v35 = vld [vmem:[%s2919_s0 + $0x138] sm:$0xff]   ;;  %v2150_v36 = vld [vmem:[%s2919_s0 + $0x70] sm:$0xff]  }
   0xd   :  { %v2152_v37 = vld [vmem:[%s2919_s0 + $0x140] sm:$0xff]   ;;  %v2151_v38 = vld [vmem:[%s2919_s0 + $0x78] sm:$0xff]   ;;  %v2153_v39 = vld [vmem:[%s2919_s0 + $0x148] sm:$0xff]  }
   0xe   :  { %v2154_v40 = vld [vmem:[%s2919_s0 + $0x80] sm:$0xff]   ;;  %v2156_v41 = vld [vmem:[%s2919_s0 + $0x150] sm:$0xff]   ;;  %v2155_v42 = vld [vmem:[%s2919_s0 + $0x88] sm:$0xff]  }
   0xf   :  { %1992 = vmatpush3.bf16.msra.mxu0 %v2118_v4  ;;  %2109 = vmatpush3.bf16.msra.mxu1 %v2118_v4  ;;  %v2157_v43 = vld [vmem:[%s2919_s0 + $0x158] sm:$0xff]   ;;  %v2158_v44 = vld [vmem:[%s2919_s0 + $0x90] sm:$0xff]   ;;  %v2160_v45 = vld [vmem:[%s2919_s0 + $0x160] sm:$0xff]  }
  0x10   :  { %1993 = vmatprep.subr.bf16.mxu0 %v2119_v6  ;;  %2103 = vmatprep.subr.bf16.mxu1 %v2119_v6  ;;  %v2159_v46 = vld [vmem:[%s2919_s0 + $0x98] sm:$0xff]   ;;  %v2161_v47 = vld [vmem:[%s2919_s0 + $0x168] sm:$0xff]   ;;  %v2162_v48 = vld [vmem:[%s2919_s0 + $0xa0] sm:$0xff]  }
  0x11   :  { %v2164_v49 = vld [vmem:[%s2919_s0 + $0x170] sm:$0xff]   ;;  %v2163_v50 = vld [vmem:[%s2919_s0 + $0xa8] sm:$0xff]   ;;  %v2165_v51 = vld [vmem:[%s2919_s0 + $0x178] sm:$0xff]  }
  0x12   :  { %v2166_v52 = vld [vmem:[%s2919_s0 + $0xb0] sm:$0xff]   ;;  %v2168_v53 = vld [vmem:[%s2919_s0 + $0x180] sm:$0xff]   ;;  %v2167_v54 = vld [vmem:[%s2919_s0 + $0xb8] sm:$0xff]  }
  0x13   :  { %1994 = vmatpush3.bf16.msra.mxu0 %v2119_v6  ;;  %2110 = vmatpush3.bf16.msra.mxu1 %v2119_v6  ;;  %v2169_v55 = vld [vmem:[%s2919_s0 + $0x188] sm:$0xff]   ;;  %v2170_v56 = vld [vmem:[%s2919_s0 + $0xc0] sm:$0xff]  }
  0x14   :  { %1995 = vmatprep.subr.bf16.mxu0 %v2120_v7  ;;  %2104 = vmatprep.subr.bf16.mxu1 %v2120_v7  ;;  %v2171_v57 = vld [vmem:[%s2919_s0 + $0xc8] sm:$0xff]   ;;  %v2416_v58 = vld [vmem:[%s2920_s2] ss:$0 sm:$0xff] }
  0x17   :  { %1996 = vmatpush3.bf16.msra.mxu0 %v2120_v7  ;;  %2111 = vmatpush3.bf16.msra.mxu1 %v2120_v7 }
  0x18   :  { %2113 = vmatprep.subr.msk.bf16.mxu0 %vm578_vm1, %v2121_v8  ;;  %2114 = vmatprep.subr.msk.bf16.mxu1 %vm578_vm1, %v2121_v8 }
  0x1b   :  { %1998 = vmatpush3.bf16.msra.mxu0 %v580_v9  ;;  %2112 = vmatpush3.bf16.msra.mxu1 %v580_v9 }
  0x1e   :  { %2000 = vmatmul.mubr.msk.bf16.vlgmr.msra.gmra.mrb[0].mxu0 %vm427_vm0, %v2123_v10  ;;  %2052 = vmatmul.mubr.msk.bf16.vlgmr.msra.gmra.mrb[0].mxu1 %vm427_vm0, %v2125_v11 }
  0x1f   :  { %2003 = vmatprep.mubr.msk.bf16.mxu0 %vm427_vm0, %v2126_v12  ;;  %2055 = vmatprep.mubr.msk.bf16.mxu1 %vm427_vm0, %v2128_v13 }
  0x26   :  { %2004 = vmatmul.mubr.msk.bf16.gmra.mrb[4].mxu0 %vm427_vm0, %v2127_v14  ;;  %2056 = vmatmul.mubr.msk.bf16.gmra.mrb[4].mxu1 %vm427_vm0, %v2129_v15 }
  0x27   :  { %2007 = vmatprep.mubr.msk.bf16.mxu0 %vm427_vm0, %v2130_v16  ;;  %2059 = vmatprep.mubr.msk.bf16.mxu1 %vm427_vm0, %v2132_v17 }
  0x2e   :  { %2008 = vmatmul.mubr.msk.bf16.gmra.mrb[8].mxu0 %vm427_vm0, %v2131_v18  ;;  %2060 = vmatmul.mubr.msk.bf16.gmra.mrb[8].mxu1 %vm427_vm0, %v2133_v19 }
  0x2f   :  { %2011 = vmatprep.mubr.msk.bf16.mxu0 %vm427_vm0, %v2134_v20  ;;  %2063 = vmatprep.mubr.msk.bf16.mxu1 %vm427_vm0, %v2136_v21 }
  0x36   :  { %2012 = vmatmul.mubr.msk.bf16.gmra.mrb[12].mxu0 %vm427_vm0, %v2135_v22  ;;  %2064 = vmatmul.mubr.msk.bf16.gmra.mrb[12].mxu1 %vm427_vm0, %v2137_v23 }
  0x37   :  { %2015 = vmatprep.mubr.msk.bf16.mxu0 %vm427_vm0, %v2138_v24  ;;  %2067 = vmatprep.mubr.msk.bf16.mxu1 %vm427_vm0, %v2140_v25 }
  0x3e   :  { %2016 = vmatmul.mubr.msk.bf16.gmra.mrb[16].mxu0 %vm427_vm0, %v2139_v26  ;;  %2068 = vmatmul.mubr.msk.bf16.gmra.mrb[16].mxu1 %vm427_vm0, %v2141_v27 }
  0x3f   :  { %2019 = vmatprep.mubr.msk.bf16.mxu0 %vm427_vm0, %v2142_v28  ;;  %2071 = vmatprep.mubr.msk.bf16.mxu1 %vm427_vm0, %v2144_v29 }
  0x46   :  { %2020 = vmatmul.mubr.msk.bf16.gmra.mrb[20].mxu0 %vm427_vm0, %v2143_v30  ;;  %2072 = vmatmul.mubr.msk.bf16.gmra.mrb[20].mxu1 %vm427_vm0, %v2145_v31 }
  0x47   :  { %2023 = vmatprep.mubr.msk.bf16.mxu0 %vm427_vm0, %v2146_v32  ;;  %2075 = vmatprep.mubr.msk.bf16.mxu1 %vm427_vm0, %v2148_v33 }
  0x4e   :  { %2024 = vmatmul.mubr.msk.bf16.gmra.mrb[24].mxu0 %vm427_vm0, %v2147_v34  ;;  %2076 = vmatmul.mubr.msk.bf16.gmra.mrb[24].mxu1 %vm427_vm0, %v2149_v35 }
  0x4f   :  { %2027 = vmatprep.mubr.msk.bf16.mxu0 %vm427_vm0, %v2150_v36  ;;  %2079 = vmatprep.mubr.msk.bf16.mxu1 %vm427_vm0, %v2152_v37 }
  0x56   :  { %2028 = vmatmul.mubr.msk.bf16.gmra.mrb[28].mxu0 %vm427_vm0, %v2151_v38  ;;  %2080 = vmatmul.mubr.msk.bf16.gmra.mrb[28].mxu1 %vm427_vm0, %v2153_v39 }
  0x57   :  { %2031 = vmatprep.mubr.msk.bf16.mxu0 %vm427_vm0, %v2154_v40  ;;  %2083 = vmatprep.mubr.msk.bf16.mxu1 %vm427_vm0, %v2156_v41 }
  0x5e   :  { %2032 = vmatmul.mubr.msk.bf16.gmra.mrb[32].mxu0 %vm427_vm0, %v2155_v42  ;;  %2084 = vmatmul.mubr.msk.bf16.gmra.mrb[32].mxu1 %vm427_vm0, %v2157_v43 }
  0x5f   :  { %2035 = vmatprep.mubr.msk.bf16.mxu0 %vm427_vm0, %v2158_v44  ;;  %2087 = vmatprep.mubr.msk.bf16.mxu1 %vm427_vm0, %v2160_v45 }
  0x66   :  { %2036 = vmatmul.mubr.msk.bf16.gmra.mrb[36].mxu0 %vm427_vm0, %v2159_v46  ;;  %2088 = vmatmul.mubr.msk.bf16.gmra.mrb[36].mxu1 %vm427_vm0, %v2161_v47 }
  0x67   :  { %2039 = vmatprep.mubr.msk.bf16.mxu0 %vm427_vm0, %v2162_v48  ;;  %2091 = vmatprep.mubr.msk.bf16.mxu1 %vm427_vm0, %v2164_v49 }
  0x6e   :  { %2040 = vmatmul.mubr.msk.bf16.gmra.mrb[40].mxu0 %vm427_vm0, %v2163_v50  ;;  %2092 = vmatmul.mubr.msk.bf16.gmra.mrb[40].mxu1 %vm427_vm0, %v2165_v51 }
  0x6f   :  { %2043 = vmatprep.mubr.msk.bf16.mxu0 %vm427_vm0, %v2166_v52  ;;  %2095 = vmatprep.mubr.msk.bf16.mxu1 %vm427_vm0, %v2168_v53 }
  0x76   :  { %2044 = vmatmul.mubr.msk.bf16.gmra.mrb[44].mxu0 %vm427_vm0, %v2167_v54  ;;  %2096 = vmatmul.mubr.msk.bf16.gmra.mrb[44].mxu1 %vm427_vm0, %v2169_v55 }
  0x77   :  { %2047 = vmatprep.mubr.msk.bf16.mxu0 %vm427_vm0, %v2170_v56 }
  0x7e   :  { %2048 = vmatmul.mubr.msk.bf16.gmra.mrb[48].mxu0 %vm427_vm0, %v2171_v57 }
  0xf1   :  { %v2001_v59 = vpop.f32.mrb[0].mxu0  ;;  %v2053_v60 = vpop.f32.mrb[0].mxu1 }
  0xf2   :  { %v625_v61 = vadd.f32 %v2001_v59, %v2416_v58  ;;  %v616_v62 = vpop.f32.mrb[1].mxu0  ;;  %v833_v63 = vadd.f32 %v2053_v60, %v2416_v58  ;;  %v824_v0 = vpop.f32.mrb[1].mxu1 }
  0xf3   :  { %v617_v1 = vadd.f32 %v2416_v58, %v616_v62  ;;  %v2002_v2 = vpop.f32.mrb[2].mxu0  ;;  %v825_v3 = vadd.f32 %v2416_v58, %v824_v0  ;;  %v2054_v4 = vpop.f32.mrb[2].mxu1 }
  0xf4   :  { %v1017_v5 = vmax.f32 %v625_v61, 0.0  ;;  %v628_v6 = vadd.f32 %v2002_v2, %v2416_v58  ;;  %v619_v7 = vpop.f32.mrb[3].mxu0  ;;  %v1069_v8 = vmax.f32 %v833_v63, 0.0  ;;  %v836_v9 = vadd.f32 %v2054_v4, %v2416_v58  ;;  %v827_v10 = vpop.f32.mrb[3].mxu1 }
  0xf5   :  { %v1015_v11 = vmax.f32 %v617_v1, 0.0  ;;  %v620_v12 = vadd.f32 %v2416_v58, %v619_v7  ;;  %v1067_v13 = vmax.f32 %v825_v3, 0.0  ;;  %v828_v14 = vadd.f32 %v2416_v58, %v827_v10 }
  0xf6   :  { %v1830_v15 = vpack.c.bf16 %v1017_v5, %v1017_v5  ;;  %v1018_v16 = vmax.f32 %v628_v6, 0.0  ;;  %v1882_v17 = vpack.c.bf16 %v1069_v8, %v1069_v8  ;;  %v1070_v18 = vmax.f32 %v836_v9, 0.0 }
  0xf7   :  { %v1828_v19 = vpack.c.bf16 %v1015_v11, %v1015_v11  ;;  %v1016_v20 = vmax.f32 %v620_v12, 0.0  ;;  %v1880_v21 = vpack.c.bf16 %v1067_v13, %v1067_v13  ;;  %v1068_v22 = vmax.f32 %v828_v14, 0.0 }
  0xf8   :  { %1518 = vst.msk [vmem:[%s2921_s3 + $0x8] sm:$0xf] %vm1515_vm2, %v1830_v15  ;;  %v1831_v23 = vpack.c.bf16 %v1018_v16, %v1018_v16  ;;  %1570 = vst.msk [vmem:[%s2921_s3 + $0xd8] sm:$0xf] %vm1515_vm2, %v1882_v17  ;;  %v1883_v24 = vpack.c.bf16 %v1070_v18, %v1070_v18 }
  0xf9   :  { %1516 = vst.msk [vmem:[%s2921_s3] sm:$0xf] %vm1515_vm2, %v1828_v19  ;;  %v1829_v25 = vpack.c.bf16 %v1016_v20, %v1016_v20  ;;  %1568 = vst.msk [vmem:[%s2921_s3 + $0xd0] sm:$0xf] %vm1515_vm2, %v1880_v21  ;;  %v2005_v26 = vpop.f32.mrb[4].mxu0  ;;  %v1881_v27 = vpack.c.bf16 %v1068_v22, %v1068_v22  ;;  %v2057_v28 = vpop.f32.mrb[4].mxu1 }
  0xfa   :  { %1519 = vst.msk [vmem:[%s2921_s3 + $0xc] sm:$0xf] %vm1515_vm2, %v1831_v23  ;;  %1571 = vst.msk [vmem:[%s2921_s3 + $0xdc] sm:$0xf] %vm1515_vm2, %v1883_v24  ;;  %v641_v29 = vadd.f32 %v2005_v26, %v2416_v58  ;;  %v632_v30 = vpop.f32.mrb[5].mxu0  ;;  %v849_v31 = vadd.f32 %v2057_v28, %v2416_v58  ;;  %v840_v32 = vpop.f32.mrb[5].mxu1 }
  0xfb   :  { %1517 = vst.msk [vmem:[%s2921_s3 + $0x4] sm:$0xf] %vm1515_vm2, %v1829_v25  ;;  %1569 = vst.msk [vmem:[%s2921_s3 + $0xd4] sm:$0xf] %vm1515_vm2, %v1881_v27  ;;  %v633_v33 = vadd.f32 %v2416_v58, %v632_v30  ;;  %v2006_v34 = vpop.f32.mrb[6].mxu0  ;;  %v841_v35 = vadd.f32 %v2416_v58, %v840_v32  ;;  %v2058_v36 = vpop.f32.mrb[6].mxu1 }
  0xfc   :  { %v1021_v37 = vmax.f32 %v641_v29, 0.0  ;;  %v644_v38 = vadd.f32 %v2006_v34, %v2416_v58  ;;  %v635_v39 = vpop.f32.mrb[7].mxu0  ;;  %v1073_v40 = vmax.f32 %v849_v31, 0.0  ;;  %v852_v41 = vadd.f32 %v2058_v36, %v2416_v58  ;;  %v843_v42 = vpop.f32.mrb[7].mxu1 }
  0xfd   :  { %v1019_v43 = vmax.f32 %v633_v33, 0.0  ;;  %v636_v44 = vadd.f32 %v2416_v58, %v635_v39  ;;  %v1071_v45 = vmax.f32 %v841_v35, 0.0  ;;  %v844_v46 = vadd.f32 %v2416_v58, %v843_v42 }
  0xfe   :  { %v1834_v47 = vpack.c.bf16 %v1021_v37, %v1021_v37  ;;  %v1022_v48 = vmax.f32 %v644_v38, 0.0  ;;  %v1886_v49 = vpack.c.bf16 %v1073_v40, %v1073_v40  ;;  %v1074_v50 = vmax.f32 %v852_v41, 0.0 }
  0xff   :  { %v1832_v51 = vpack.c.bf16 %v1019_v43, %v1019_v43  ;;  %v1020_v52 = vmax.f32 %v636_v44, 0.0  ;;  %v1884_v53 = vpack.c.bf16 %v1071_v45, %v1071_v45  ;;  %v1072_v54 = vmax.f32 %v844_v46, 0.0 }
 0x100   :  { %1522 = vst.msk [vmem:[%s2921_s3 + $0x18] sm:$0xf] %vm1515_vm2, %v1834_v47  ;;  %v1835_v55 = vpack.c.bf16 %v1022_v48, %v1022_v48  ;;  %1574 = vst.msk [vmem:[%s2921_s3 + $0xe8] sm:$0xf] %vm1515_vm2, %v1886_v49  ;;  %v1887_v56 = vpack.c.bf16 %v1074_v50, %v1074_v50 }
 0x101   :  { %1520 = vst.msk [vmem:[%s2921_s3 + $0x10] sm:$0xf] %vm1515_vm2, %v1832_v51  ;;  %v1833_v57 = vpack.c.bf16 %v1020_v52, %v1020_v52  ;;  %1572 = vst.msk [vmem:[%s2921_s3 + $0xe0] sm:$0xf] %vm1515_vm2, %v1884_v53  ;;  %v2009_v59 = vpop.f32.mrb[8].mxu0  ;;  %v1885_v60 = vpack.c.bf16 %v1072_v54, %v1072_v54  ;;  %v2061_v61 = vpop.f32.mrb[8].mxu1 }
 0x102   :  { %1523 = vst.msk [vmem:[%s2921_s3 + $0x1c] sm:$0xf] %vm1515_vm2, %v1835_v55  ;;  %1575 = vst.msk [vmem:[%s2921_s3 + $0xec] sm:$0xf] %vm1515_vm2, %v1887_v56  ;;  %v657_v62 = vadd.f32 %v2009_v59, %v2416_v58  ;;  %v648_v63 = vpop.f32.mrb[9].mxu0  ;;  %v865_v0 = vadd.f32 %v2061_v61, %v2416_v58  ;;  %v856_v1 = vpop.f32.mrb[9].mxu1 }
 0x103   :  { %1521 = vst.msk [vmem:[%s2921_s3 + $0x14] sm:$0xf] %vm1515_vm2, %v1833_v57  ;;  %1573 = vst.msk [vmem:[%s2921_s3 + $0xe4] sm:$0xf] %vm1515_vm2, %v1885_v60  ;;  %v649_v2 = vadd.f32 %v2416_v58, %v648_v63  ;;  %v2010_v3 = vpop.f32.mrb[10].mxu0  ;;  %v857_v4 = vadd.f32 %v2416_v58, %v856_v1  ;;  %v2062_v5 = vpop.f32.mrb[10].mxu1 }
 0x104   :  { %v1025_v6 = vmax.f32 %v657_v62, 0.0  ;;  %v660_v7 = vadd.f32 %v2010_v3, %v2416_v58  ;;  %v651_v8 = vpop.f32.mrb[11].mxu0  ;;  %v1077_v9 = vmax.f32 %v865_v0, 0.0  ;;  %v868_v10 = vadd.f32 %v2062_v5, %v2416_v58  ;;  %v859_v11 = vpop.f32.mrb[11].mxu1 }
 0x105   :  { %v1023_v12 = vmax.f32 %v649_v2, 0.0  ;;  %v652_v13 = vadd.f32 %v2416_v58, %v651_v8  ;;  %v1075_v14 = vmax.f32 %v857_v4, 0.0  ;;  %v860_v15 = vadd.f32 %v2416_v58, %v859_v11 }
 0x106   :  { %v1838_v16 = vpack.c.bf16 %v1025_v6, %v1025_v6  ;;  %v1026_v17 = vmax.f32 %v660_v7, 0.0  ;;  %v1890_v18 = vpack.c.bf16 %v1077_v9, %v1077_v9  ;;  %v1078_v19 = vmax.f32 %v868_v10, 0.0 }
 0x107   :  { %v1836_v20 = vpack.c.bf16 %v1023_v12, %v1023_v12  ;;  %v1024_v21 = vmax.f32 %v652_v13, 0.0  ;;  %v1888_v22 = vpack.c.bf16 %v1075_v14, %v1075_v14  ;;  %v1076_v23 = vmax.f32 %v860_v15, 0.0 }
 0x108   :  { %1526 = vst.msk [vmem:[%s2921_s3 + $0x28] sm:$0xf] %vm1515_vm2, %v1838_v16  ;;  %v1839_v24 = vpack.c.bf16 %v1026_v17, %v1026_v17  ;;  %1578 = vst.msk [vmem:[%s2921_s3 + $0xf8] sm:$0xf] %vm1515_vm2, %v1890_v18  ;;  %v1891_v25 = vpack.c.bf16 %v1078_v19, %v1078_v19 }
 0x109   :  { %1524 = vst.msk [vmem:[%s2921_s3 + $0x20] sm:$0xf] %vm1515_vm2, %v1836_v20  ;;  %v1837_v26 = vpack.c.bf16 %v1024_v21, %v1024_v21  ;;  %1576 = vst.msk [vmem:[%s2921_s3 + $0xf0] sm:$0xf] %vm1515_vm2, %v1888_v22  ;;  %v2013_v27 = vpop.f32.mrb[12].mxu0  ;;  %v1889_v28 = vpack.c.bf16 %v1076_v23, %v1076_v23  ;;  %v2065_v29 = vpop.f32.mrb[12].mxu1 }
 0x10a   :  { %1527 = vst.msk [vmem:[%s2921_s3 + $0x2c] sm:$0xf] %vm1515_vm2, %v1839_v24  ;;  %1579 = vst.msk [vmem:[%s2921_s3 + $0xfc] sm:$0xf] %vm1515_vm2, %v1891_v25  ;;  %v673_v30 = vadd.f32 %v2013_v27, %v2416_v58  ;;  %v664_v31 = vpop.f32.mrb[13].mxu0  ;;  %v881_v32 = vadd.f32 %v2065_v29, %v2416_v58  ;;  %v872_v33 = vpop.f32.mrb[13].mxu1 }
 0x10b   :  { %1525 = vst.msk [vmem:[%s2921_s3 + $0x24] sm:$0xf] %vm1515_vm2, %v1837_v26  ;;  %1577 = vst.msk [vmem:[%s2921_s3 + $0xf4] sm:$0xf] %vm1515_vm2, %v1889_v28  ;;  %v665_v34 = vadd.f32 %v2416_v58, %v664_v31  ;;  %v2014_v35 = vpop.f32.mrb[14].mxu0  ;;  %v873_v36 = vadd.f32 %v2416_v58, %v872_v33  ;;  %v2066_v37 = vpop.f32.mrb[14].mxu1 }
 0x10c   :  { %v1029_v38 = vmax.f32 %v673_v30, 0.0  ;;  %v676_v39 = vadd.f32 %v2014_v35, %v2416_v58  ;;  %v667_v40 = vpop.f32.mrb[15].mxu0  ;;  %v1081_v41 = vmax.f32 %v881_v32, 0.0  ;;  %v884_v42 = vadd.f32 %v2066_v37, %v2416_v58  ;;  %v875_v43 = vpop.f32.mrb[15].mxu1 }
 0x10d   :  { %v1027_v44 = vmax.f32 %v665_v34, 0.0  ;;  %v668_v45 = vadd.f32 %v2416_v58, %v667_v40  ;;  %v1079_v46 = vmax.f32 %v873_v36, 0.0  ;;  %v876_v47 = vadd.f32 %v2416_v58, %v875_v43 }
 0x10e   :  { %v1842_v48 = vpack.c.bf16 %v1029_v38, %v1029_v38  ;;  %v1030_v49 = vmax.f32 %v676_v39, 0.0  ;;  %v1894_v50 = vpack.c.bf16 %v1081_v41, %v1081_v41  ;;  %v1082_v51 = vmax.f32 %v884_v42, 0.0 }
 0x10f   :  { %v1840_v52 = vpack.c.bf16 %v1027_v44, %v1027_v44  ;;  %v1028_v53 = vmax.f32 %v668_v45, 0.0  ;;  %v1892_v54 = vpack.c.bf16 %v1079_v46, %v1079_v46  ;;  %v1080_v55 = vmax.f32 %v876_v47, 0.0 }
 0x110   :  { %1530 = vst.msk [vmem:[%s2921_s3 + $0x38] sm:$0xf] %vm1515_vm2, %v1842_v48  ;;  %v1843_v56 = vpack.c.bf16 %v1030_v49, %v1030_v49  ;;  %1582 = vst.msk [vmem:[%s2921_s3 + $0x108] sm:$0xf] %vm1515_vm2, %v1894_v50  ;;  %v1895_v57 = vpack.c.bf16 %v1082_v51, %v1082_v51 }
 0x111   :  { %1528 = vst.msk [vmem:[%s2921_s3 + $0x30] sm:$0xf] %vm1515_vm2, %v1840_v52  ;;  %v1841_v59 = vpack.c.bf16 %v1028_v53, %v1028_v53  ;;  %1580 = vst.msk [vmem:[%s2921_s3 + $0x100] sm:$0xf] %vm1515_vm2, %v1892_v54  ;;  %v2017_v60 = vpop.f32.mrb[16].mxu0  ;;  %v1893_v61 = vpack.c.bf16 %v1080_v55, %v1080_v55  ;;  %v2069_v62 = vpop.f32.mrb[16].mxu1 }
 0x112   :  { %1531 = vst.msk [vmem:[%s2921_s3 + $0x3c] sm:$0xf] %vm1515_vm2, %v1843_v56  ;;  %1583 = vst.msk [vmem:[%s2921_s3 + $0x10c] sm:$0xf] %vm1515_vm2, %v1895_v57  ;;  %v689_v63 = vadd.f32 %v2017_v60, %v2416_v58  ;;  %v680_v0 = vpop.f32.mrb[17].mxu0  ;;  %v897_v1 = vadd.f32 %v2069_v62, %v2416_v58  ;;  %v888_v2 = vpop.f32.mrb[17].mxu1 }
 0x113   :  { %1529 = vst.msk [vmem:[%s2921_s3 + $0x34] sm:$0xf] %vm1515_vm2, %v1841_v59  ;;  %1581 = vst.msk [vmem:[%s2921_s3 + $0x104] sm:$0xf] %vm1515_vm2, %v1893_v61  ;;  %v681_v3 = vadd.f32 %v2416_v58, %v680_v0  ;;  %v2018_v4 = vpop.f32.mrb[18].mxu0  ;;  %v889_v5 = vadd.f32 %v2416_v58, %v888_v2  ;;  %v2070_v6 = vpop.f32.mrb[18].mxu1 }
 0x114   :  { %v1033_v7 = vmax.f32 %v689_v63, 0.0  ;;  %v692_v8 = vadd.f32 %v2018_v4, %v2416_v58  ;;  %v683_v9 = vpop.f32.mrb[19].mxu0  ;;  %v1085_v10 = vmax.f32 %v897_v1, 0.0  ;;  %v900_v11 = vadd.f32 %v2070_v6, %v2416_v58  ;;  %v891_v12 = vpop.f32.mrb[19].mxu1 }
 0x115   :  { %v1031_v13 = vmax.f32 %v681_v3, 0.0  ;;  %v684_v14 = vadd.f32 %v2416_v58, %v683_v9  ;;  %v1083_v15 = vmax.f32 %v889_v5, 0.0  ;;  %v892_v16 = vadd.f32 %v2416_v58, %v891_v12 }
 0x116   :  { %v1846_v17 = vpack.c.bf16 %v1033_v7, %v1033_v7  ;;  %v1034_v18 = vmax.f32 %v692_v8, 0.0  ;;  %v1898_v19 = vpack.c.bf16 %v1085_v10, %v1085_v10  ;;  %v1086_v20 = vmax.f32 %v900_v11, 0.0 }
 0x117   :  { %v1844_v21 = vpack.c.bf16 %v1031_v13, %v1031_v13  ;;  %v1032_v22 = vmax.f32 %v684_v14, 0.0  ;;  %v1896_v23 = vpack.c.bf16 %v1083_v15, %v1083_v15  ;;  %v1084_v24 = vmax.f32 %v892_v16, 0.0 }
 0x118   :  { %1534 = vst.msk [vmem:[%s2921_s3 + $0x48] sm:$0xf] %vm1515_vm2, %v1846_v17  ;;  %v1847_v25 = vpack.c.bf16 %v1034_v18, %v1034_v18  ;;  %1586 = vst.msk [vmem:[%s2921_s3 + $0x118] sm:$0xf] %vm1515_vm2, %v1898_v19  ;;  %v1899_v26 = vpack.c.bf16 %v1086_v20, %v1086_v20 }
 0x119   :  { %1532 = vst.msk [vmem:[%s2921_s3 + $0x40] sm:$0xf] %vm1515_vm2, %v1844_v21  ;;  %v1845_v27 = vpack.c.bf16 %v1032_v22, %v1032_v22  ;;  %1584 = vst.msk [vmem:[%s2921_s3 + $0x110] sm:$0xf] %vm1515_vm2, %v1896_v23  ;;  %v2021_v28 = vpop.f32.mrb[20].mxu0  ;;  %v1897_v29 = vpack.c.bf16 %v1084_v24, %v1084_v24  ;;  %v2073_v30 = vpop.f32.mrb[20].mxu1 }
 0x11a   :  { %1535 = vst.msk [vmem:[%s2921_s3 + $0x4c] sm:$0xf] %vm1515_vm2, %v1847_v25  ;;  %1587 = vst.msk [vmem:[%s2921_s3 + $0x11c] sm:$0xf] %vm1515_vm2, %v1899_v26  ;;  %v705_v31 = vadd.f32 %v2021_v28, %v2416_v58  ;;  %v696_v32 = vpop.f32.mrb[21].mxu0  ;;  %v913_v33 = vadd.f32 %v2073_v30, %v2416_v58  ;;  %v904_v34 = vpop.f32.mrb[21].mxu1 }
 0x11b   :  { %1533 = vst.msk [vmem:[%s2921_s3 + $0x44] sm:$0xf] %vm1515_vm2, %v1845_v27  ;;  %1585 = vst.msk [vmem:[%s2921_s3 + $0x114] sm:$0xf] %vm1515_vm2, %v1897_v29  ;;  %v697_v35 = vadd.f32 %v2416_v58, %v696_v32  ;;  %v2022_v36 = vpop.f32.mrb[22].mxu0  ;;  %v905_v37 = vadd.f32 %v2416_v58, %v904_v34  ;;  %v2074_v38 = vpop.f32.mrb[22].mxu1 }
 0x11c   :  { %v1037_v39 = vmax.f32 %v705_v31, 0.0  ;;  %v708_v40 = vadd.f32 %v2022_v36, %v2416_v58  ;;  %v699_v41 = vpop.f32.mrb[23].mxu0  ;;  %v1089_v42 = vmax.f32 %v913_v33, 0.0  ;;  %v916_v43 = vadd.f32 %v2074_v38, %v2416_v58  ;;  %v907_v44 = vpop.f32.mrb[23].mxu1 }
 0x11d   :  { %v1035_v45 = vmax.f32 %v697_v35, 0.0  ;;  %v700_v46 = vadd.f32 %v2416_v58, %v699_v41  ;;  %v1087_v47 = vmax.f32 %v905_v37, 0.0  ;;  %v908_v48 = vadd.f32 %v2416_v58, %v907_v44 }
 0x11e   :  { %v1850_v49 = vpack.c.bf16 %v1037_v39, %v1037_v39  ;;  %v1038_v50 = vmax.f32 %v708_v40, 0.0  ;;  %v1902_v51 = vpack.c.bf16 %v1089_v42, %v1089_v42  ;;  %v1090_v52 = vmax.f32 %v916_v43, 0.0 }
 0x11f   :  { %v1848_v53 = vpack.c.bf16 %v1035_v45, %v1035_v45  ;;  %v1036_v54 = vmax.f32 %v700_v46, 0.0  ;;  %v1900_v55 = vpack.c.bf16 %v1087_v47, %v1087_v47  ;;  %v1088_v56 = vmax.f32 %v908_v48, 0.0 }
 0x120   :  { %1538 = vst.msk [vmem:[%s2921_s3 + $0x58] sm:$0xf] %vm1515_vm2, %v1850_v49  ;;  %v1851_v57 = vpack.c.bf16 %v1038_v50, %v1038_v50  ;;  %1590 = vst.msk [vmem:[%s2921_s3 + $0x128] sm:$0xf] %vm1515_vm2, %v1902_v51  ;;  %v1903_v59 = vpack.c.bf16 %v1090_v52, %v1090_v52 }
 0x121   :  { %1536 = vst.msk [vmem:[%s2921_s3 + $0x50] sm:$0xf] %vm1515_vm2, %v1848_v53  ;;  %v1849_v60 = vpack.c.bf16 %v1036_v54, %v1036_v54  ;;  %1588 = vst.msk [vmem:[%s2921_s3 + $0x120] sm:$0xf] %vm1515_vm2, %v1900_v55  ;;  %v2025_v61 = vpop.f32.mrb[24].mxu0  ;;  %v1901_v62 = vpack.c.bf16 %v1088_v56, %v1088_v56  ;;  %v2077_v63 = vpop.f32.mrb[24].mxu1 }
 0x122   :  { %1539 = vst.msk [vmem:[%s2921_s3 + $0x5c] sm:$0xf] %vm1515_vm2, %v1851_v57  ;;  %1591 = vst.msk [vmem:[%s2921_s3 + $0x12c] sm:$0xf] %vm1515_vm2, %v1903_v59  ;;  %v721_v0 = vadd.f32 %v2025_v61, %v2416_v58  ;;  %v712_v1 = vpop.f32.mrb[25].mxu0  ;;  %v929_v2 = vadd.f32 %v2077_v63, %v2416_v58  ;;  %v920_v3 = vpop.f32.mrb[25].mxu1 }
 0x123   :  { %1537 = vst.msk [vmem:[%s2921_s3 + $0x54] sm:$0xf] %vm1515_vm2, %v1849_v60  ;;  %1589 = vst.msk [vmem:[%s2921_s3 + $0x124] sm:$0xf] %vm1515_vm2, %v1901_v62  ;;  %v713_v4 = vadd.f32 %v2416_v58, %v712_v1  ;;  %v2026_v5 = vpop.f32.mrb[26].mxu0  ;;  %v921_v6 = vadd.f32 %v2416_v58, %v920_v3  ;;  %v2078_v7 = vpop.f32.mrb[26].mxu1 }
 0x124   :  { %v1041_v8 = vmax.f32 %v721_v0, 0.0  ;;  %v724_v9 = vadd.f32 %v2026_v5, %v2416_v58  ;;  %v715_v10 = vpop.f32.mrb[27].mxu0  ;;  %v1093_v11 = vmax.f32 %v929_v2, 0.0  ;;  %v932_v12 = vadd.f32 %v2078_v7, %v2416_v58  ;;  %v923_v13 = vpop.f32.mrb[27].mxu1 }
 0x125   :  { %v1039_v14 = vmax.f32 %v713_v4, 0.0  ;;  %v716_v15 = vadd.f32 %v2416_v58, %v715_v10  ;;  %v1091_v16 = vmax.f32 %v921_v6, 0.0  ;;  %v924_v17 = vadd.f32 %v2416_v58, %v923_v13 }
 0x126   :  { %v1854_v18 = vpack.c.bf16 %v1041_v8, %v1041_v8  ;;  %v1042_v19 = vmax.f32 %v724_v9, 0.0  ;;  %v1906_v20 = vpack.c.bf16 %v1093_v11, %v1093_v11  ;;  %v1094_v21 = vmax.f32 %v932_v12, 0.0 }
 0x127   :  { %v1852_v22 = vpack.c.bf16 %v1039_v14, %v1039_v14  ;;  %v1040_v23 = vmax.f32 %v716_v15, 0.0  ;;  %v1904_v24 = vpack.c.bf16 %v1091_v16, %v1091_v16  ;;  %v1092_v25 = vmax.f32 %v924_v17, 0.0 }
 0x128   :  { %1542 = vst.msk [vmem:[%s2921_s3 + $0x68] sm:$0xf] %vm1515_vm2, %v1854_v18  ;;  %v1855_v26 = vpack.c.bf16 %v1042_v19, %v1042_v19  ;;  %1594 = vst.msk [vmem:[%s2921_s3 + $0x138] sm:$0xf] %vm1515_vm2, %v1906_v20  ;;  %v1907_v27 = vpack.c.bf16 %v1094_v21, %v1094_v21 }
 0x129   :  { %1540 = vst.msk [vmem:[%s2921_s3 + $0x60] sm:$0xf] %vm1515_vm2, %v1852_v22  ;;  %v1853_v28 = vpack.c.bf16 %v1040_v23, %v1040_v23  ;;  %1592 = vst.msk [vmem:[%s2921_s3 + $0x130] sm:$0xf] %vm1515_vm2, %v1904_v24  ;;  %v2029_v29 = vpop.f32.mrb[28].mxu0  ;;  %v1905_v30 = vpack.c.bf16 %v1092_v25, %v1092_v25  ;;  %v2081_v31 = vpop.f32.mrb[28].mxu1 }
 0x12a   :  { %1543 = vst.msk [vmem:[%s2921_s3 + $0x6c] sm:$0xf] %vm1515_vm2, %v1855_v26  ;;  %1595 = vst.msk [vmem:[%s2921_s3 + $0x13c] sm:$0xf] %vm1515_vm2, %v1907_v27  ;;  %v737_v32 = vadd.f32 %v2029_v29, %v2416_v58  ;;  %v728_v33 = vpop.f32.mrb[29].mxu0  ;;  %v945_v34 = vadd.f32 %v2081_v31, %v2416_v58  ;;  %v936_v35 = vpop.f32.mrb[29].mxu1 }
 0x12b   :  { %1541 = vst.msk [vmem:[%s2921_s3 + $0x64] sm:$0xf] %vm1515_vm2, %v1853_v28  ;;  %1593 = vst.msk [vmem:[%s2921_s3 + $0x134] sm:$0xf] %vm1515_vm2, %v1905_v30  ;;  %v729_v36 = vadd.f32 %v2416_v58, %v728_v33  ;;  %v2030_v37 = vpop.f32.mrb[30].mxu0  ;;  %v937_v38 = vadd.f32 %v2416_v58, %v936_v35  ;;  %v2082_v39 = vpop.f32.mrb[30].mxu1 }
 0x12c   :  { %v1045_v40 = vmax.f32 %v737_v32, 0.0  ;;  %v740_v41 = vadd.f32 %v2030_v37, %v2416_v58  ;;  %v731_v42 = vpop.f32.mrb[31].mxu0  ;;  %v1097_v43 = vmax.f32 %v945_v34, 0.0  ;;  %v948_v44 = vadd.f32 %v2082_v39, %v2416_v58  ;;  %v939_v45 = vpop.f32.mrb[31].mxu1 }
 0x12d   :  { %v1043_v46 = vmax.f32 %v729_v36, 0.0  ;;  %v732_v47 = vadd.f32 %v2416_v58, %v731_v42  ;;  %v1095_v48 = vmax.f32 %v937_v38, 0.0  ;;  %v940_v49 = vadd.f32 %v2416_v58, %v939_v45 }
 0x12e   :  { %v1858_v50 = vpack.c.bf16 %v1045_v40, %v1045_v40  ;;  %v1046_v51 = vmax.f32 %v740_v41, 0.0  ;;  %v1910_v52 = vpack.c.bf16 %v1097_v43, %v1097_v43  ;;  %v1098_v53 = vmax.f32 %v948_v44, 0.0 }
 0x12f   :  { %v1856_v54 = vpack.c.bf16 %v1043_v46, %v1043_v46  ;;  %v1044_v55 = vmax.f32 %v732_v47, 0.0  ;;  %v1908_v56 = vpack.c.bf16 %v1095_v48, %v1095_v48  ;;  %v1096_v57 = vmax.f32 %v940_v49, 0.0 }
 0x130   :  { %1546 = vst.msk [vmem:[%s2921_s3 + $0x78] sm:$0xf] %vm1515_vm2, %v1858_v50  ;;  %v1859_v59 = vpack.c.bf16 %v1046_v51, %v1046_v51  ;;  %1598 = vst.msk [vmem:[%s2921_s3 + $0x148] sm:$0xf] %vm1515_vm2, %v1910_v52  ;;  %v1911_v60 = vpack.c.bf16 %v1098_v53, %v1098_v53 }
 0x131   :  { %1544 = vst.msk [vmem:[%s2921_s3 + $0x70] sm:$0xf] %vm1515_vm2, %v1856_v54  ;;  %v1857_v61 = vpack.c.bf16 %v1044_v55, %v1044_v55  ;;  %1596 = vst.msk [vmem:[%s2921_s3 + $0x140] sm:$0xf] %vm1515_vm2, %v1908_v56  ;;  %v2033_v62 = vpop.f32.mrb[32].mxu0  ;;  %v1909_v63 = vpack.c.bf16 %v1096_v57, %v1096_v57  ;;  %v2085_v0 = vpop.f32.mrb[32].mxu1 }
 0x132   :  { %1547 = vst.msk [vmem:[%s2921_s3 + $0x7c] sm:$0xf] %vm1515_vm2, %v1859_v59  ;;  %1599 = vst.msk [vmem:[%s2921_s3 + $0x14c] sm:$0xf] %vm1515_vm2, %v1911_v60  ;;  %v753_v1 = vadd.f32 %v2033_v62, %v2416_v58  ;;  %v744_v2 = vpop.f32.mrb[33].mxu0  ;;  %v961_v3 = vadd.f32 %v2085_v0, %v2416_v58  ;;  %v952_v4 = vpop.f32.mrb[33].mxu1 }
 0x133   :  { %1545 = vst.msk [vmem:[%s2921_s3 + $0x74] sm:$0xf] %vm1515_vm2, %v1857_v61  ;;  %1597 = vst.msk [vmem:[%s2921_s3 + $0x144] sm:$0xf] %vm1515_vm2, %v1909_v63  ;;  %v745_v5 = vadd.f32 %v2416_v58, %v744_v2  ;;  %v2034_v6 = vpop.f32.mrb[34].mxu0  ;;  %v953_v7 = vadd.f32 %v2416_v58, %v952_v4  ;;  %v2086_v8 = vpop.f32.mrb[34].mxu1 }
 0x134   :  { %v1049_v9 = vmax.f32 %v753_v1, 0.0  ;;  %v756_v10 = vadd.f32 %v2034_v6, %v2416_v58  ;;  %v747_v11 = vpop.f32.mrb[35].mxu0  ;;  %v1101_v12 = vmax.f32 %v961_v3, 0.0  ;;  %v964_v13 = vadd.f32 %v2086_v8, %v2416_v58  ;;  %v955_v14 = vpop.f32.mrb[35].mxu1 }
 0x135   :  { %v1047_v15 = vmax.f32 %v745_v5, 0.0  ;;  %v748_v16 = vadd.f32 %v2416_v58, %v747_v11  ;;  %v1099_v17 = vmax.f32 %v953_v7, 0.0  ;;  %v956_v18 = vadd.f32 %v2416_v58, %v955_v14 }
 0x136   :  { %v1862_v19 = vpack.c.bf16 %v1049_v9, %v1049_v9  ;;  %v1050_v20 = vmax.f32 %v756_v10, 0.0  ;;  %v1914_v21 = vpack.c.bf16 %v1101_v12, %v1101_v12  ;;  %v1102_v22 = vmax.f32 %v964_v13, 0.0 }
 0x137   :  { %v1860_v23 = vpack.c.bf16 %v1047_v15, %v1047_v15  ;;  %v1048_v24 = vmax.f32 %v748_v16, 0.0  ;;  %v1912_v25 = vpack.c.bf16 %v1099_v17, %v1099_v17  ;;  %v1100_v26 = vmax.f32 %v956_v18, 0.0 }
 0x138   :  { %1550 = vst.msk [vmem:[%s2921_s3 + $0x88] sm:$0xf] %vm1515_vm2, %v1862_v19  ;;  %v1863_v27 = vpack.c.bf16 %v1050_v20, %v1050_v20  ;;  %1602 = vst.msk [vmem:[%s2921_s3 + $0x158] sm:$0xf] %vm1515_vm2, %v1914_v21  ;;  %v1915_v28 = vpack.c.bf16 %v1102_v22, %v1102_v22 }
 0x139   :  { %1548 = vst.msk [vmem:[%s2921_s3 + $0x80] sm:$0xf] %vm1515_vm2, %v1860_v23  ;;  %v1861_v29 = vpack.c.bf16 %v1048_v24, %v1048_v24  ;;  %1600 = vst.msk [vmem:[%s2921_s3 + $0x150] sm:$0xf] %vm1515_vm2, %v1912_v25  ;;  %v2037_v30 = vpop.f32.mrb[36].mxu0  ;;  %v1913_v31 = vpack.c.bf16 %v1100_v26, %v1100_v26  ;;  %v2089_v32 = vpop.f32.mrb[36].mxu1 }
 0x13a   :  { %1551 = vst.msk [vmem:[%s2921_s3 + $0x8c] sm:$0xf] %vm1515_vm2, %v1863_v27  ;;  %1603 = vst.msk [vmem:[%s2921_s3 + $0x15c] sm:$0xf] %vm1515_vm2, %v1915_v28  ;;  %v769_v33 = vadd.f32 %v2037_v30, %v2416_v58  ;;  %v760_v34 = vpop.f32.mrb[37].mxu0  ;;  %v977_v35 = vadd.f32 %v2089_v32, %v2416_v58  ;;  %v968_v36 = vpop.f32.mrb[37].mxu1 }
 0x13b   :  { %1549 = vst.msk [vmem:[%s2921_s3 + $0x84] sm:$0xf] %vm1515_vm2, %v1861_v29  ;;  %1601 = vst.msk [vmem:[%s2921_s3 + $0x154] sm:$0xf] %vm1515_vm2, %v1913_v31  ;;  %v761_v37 = vadd.f32 %v2416_v58, %v760_v34  ;;  %v2038_v38 = vpop.f32.mrb[38].mxu0  ;;  %v969_v39 = vadd.f32 %v2416_v58, %v968_v36  ;;  %v2090_v40 = vpop.f32.mrb[38].mxu1 }
 0x13c   :  { %v1053_v41 = vmax.f32 %v769_v33, 0.0  ;;  %v772_v42 = vadd.f32 %v2038_v38, %v2416_v58  ;;  %v763_v43 = vpop.f32.mrb[39].mxu0  ;;  %v1105_v44 = vmax.f32 %v977_v35, 0.0  ;;  %v980_v45 = vadd.f32 %v2090_v40, %v2416_v58  ;;  %v971_v46 = vpop.f32.mrb[39].mxu1 }
 0x13d   :  { %v1051_v47 = vmax.f32 %v761_v37, 0.0  ;;  %v764_v48 = vadd.f32 %v2416_v58, %v763_v43  ;;  %v1103_v49 = vmax.f32 %v969_v39, 0.0  ;;  %v972_v50 = vadd.f32 %v2416_v58, %v971_v46 }
 0x13e   :  { %v1866_v51 = vpack.c.bf16 %v1053_v41, %v1053_v41  ;;  %v1054_v52 = vmax.f32 %v772_v42, 0.0  ;;  %v1918_v53 = vpack.c.bf16 %v1105_v44, %v1105_v44  ;;  %v1106_v54 = vmax.f32 %v980_v45, 0.0 }
 0x13f   :  { %v1864_v55 = vpack.c.bf16 %v1051_v47, %v1051_v47  ;;  %v1052_v56 = vmax.f32 %v764_v48, 0.0  ;;  %v1916_v57 = vpack.c.bf16 %v1103_v49, %v1103_v49  ;;  %v1104_v59 = vmax.f32 %v972_v50, 0.0 }
 0x140   :  { %1554 = vst.msk [vmem:[%s2921_s3 + $0x98] sm:$0xf] %vm1515_vm2, %v1866_v51  ;;  %v1867_v60 = vpack.c.bf16 %v1054_v52, %v1054_v52  ;;  %1606 = vst.msk [vmem:[%s2921_s3 + $0x168] sm:$0xf] %vm1515_vm2, %v1918_v53  ;;  %v1919_v61 = vpack.c.bf16 %v1106_v54, %v1106_v54 }
 0x141   :  { %1552 = vst.msk [vmem:[%s2921_s3 + $0x90] sm:$0xf] %vm1515_vm2, %v1864_v55  ;;  %v1865_v62 = vpack.c.bf16 %v1052_v56, %v1052_v56  ;;  %1604 = vst.msk [vmem:[%s2921_s3 + $0x160] sm:$0xf] %vm1515_vm2, %v1916_v57  ;;  %v2041_v63 = vpop.f32.mrb[40].mxu0  ;;  %v1917_v0 = vpack.c.bf16 %v1104_v59, %v1104_v59  ;;  %v2093_v1 = vpop.f32.mrb[40].mxu1 }
 0x142   :  { %1555 = vst.msk [vmem:[%s2921_s3 + $0x9c] sm:$0xf] %vm1515_vm2, %v1867_v60  ;;  %1607 = vst.msk [vmem:[%s2921_s3 + $0x16c] sm:$0xf] %vm1515_vm2, %v1919_v61  ;;  %v785_v2 = vadd.f32 %v2041_v63, %v2416_v58  ;;  %v776_v3 = vpop.f32.mrb[41].mxu0  ;;  %v993_v4 = vadd.f32 %v2093_v1, %v2416_v58  ;;  %v984_v5 = vpop.f32.mrb[41].mxu1 }
 0x143   :  { %1553 = vst.msk [vmem:[%s2921_s3 + $0x94] sm:$0xf] %vm1515_vm2, %v1865_v62  ;;  %1605 = vst.msk [vmem:[%s2921_s3 + $0x164] sm:$0xf] %vm1515_vm2, %v1917_v0  ;;  %v777_v6 = vadd.f32 %v2416_v58, %v776_v3  ;;  %v2042_v7 = vpop.f32.mrb[42].mxu0  ;;  %v985_v8 = vadd.f32 %v2416_v58, %v984_v5  ;;  %v2094_v9 = vpop.f32.mrb[42].mxu1 }
 0x144   :  { %v1057_v10 = vmax.f32 %v785_v2, 0.0  ;;  %v788_v11 = vadd.f32 %v2042_v7, %v2416_v58  ;;  %v779_v12 = vpop.f32.mrb[43].mxu0  ;;  %v1109_v13 = vmax.f32 %v993_v4, 0.0  ;;  %v996_v14 = vadd.f32 %v2094_v9, %v2416_v58  ;;  %v987_v15 = vpop.f32.mrb[43].mxu1 }
 0x145   :  { %v1055_v16 = vmax.f32 %v777_v6, 0.0  ;;  %v780_v17 = vadd.f32 %v2416_v58, %v779_v12  ;;  %v1107_v18 = vmax.f32 %v985_v8, 0.0  ;;  %v988_v19 = vadd.f32 %v2416_v58, %v987_v15 }
 0x146   :  { %v1870_v20 = vpack.c.bf16 %v1057_v10, %v1057_v10  ;;  %v1058_v21 = vmax.f32 %v788_v11, 0.0  ;;  %v1922_v22 = vpack.c.bf16 %v1109_v13, %v1109_v13  ;;  %v1110_v23 = vmax.f32 %v996_v14, 0.0 }
 0x147   :  { %v1868_v24 = vpack.c.bf16 %v1055_v16, %v1055_v16  ;;  %v1056_v25 = vmax.f32 %v780_v17, 0.0  ;;  %v1920_v26 = vpack.c.bf16 %v1107_v18, %v1107_v18  ;;  %v1108_v27 = vmax.f32 %v988_v19, 0.0 }
 0x148   :  { %1558 = vst.msk [vmem:[%s2921_s3 + $0xa8] sm:$0xf] %vm1515_vm2, %v1870_v20  ;;  %v1871_v28 = vpack.c.bf16 %v1058_v21, %v1058_v21  ;;  %1610 = vst.msk [vmem:[%s2921_s3 + $0x178] sm:$0xf] %vm1515_vm2, %v1922_v22  ;;  %v1923_v29 = vpack.c.bf16 %v1110_v23, %v1110_v23 }
 0x149   :  { %1556 = vst.msk [vmem:[%s2921_s3 + $0xa0] sm:$0xf] %vm1515_vm2, %v1868_v24  ;;  %v1869_v30 = vpack.c.bf16 %v1056_v25, %v1056_v25  ;;  %1608 = vst.msk [vmem:[%s2921_s3 + $0x170] sm:$0xf] %vm1515_vm2, %v1920_v26  ;;  %v2045_v31 = vpop.f32.mrb[44].mxu0  ;;  %v1921_v32 = vpack.c.bf16 %v1108_v27, %v1108_v27  ;;  %v2097_v33 = vpop.f32.mrb[44].mxu1 }
 0x14a   :  { %1559 = vst.msk [vmem:[%s2921_s3 + $0xac] sm:$0xf] %vm1515_vm2, %v1871_v28  ;;  %1611 = vst.msk [vmem:[%s2921_s3 + $0x17c] sm:$0xf] %vm1515_vm2, %v1923_v29  ;;  %v801_v34 = vadd.f32 %v2045_v31, %v2416_v58  ;;  %v792_v35 = vpop.f32.mrb[45].mxu0  ;;  %v1009_v36 = vadd.f32 %v2097_v33, %v2416_v58  ;;  %v1000_v37 = vpop.f32.mrb[45].mxu1 }
 0x14b   :  { %1557 = vst.msk [vmem:[%s2921_s3 + $0xa4] sm:$0xf] %vm1515_vm2, %v1869_v30  ;;  %1609 = vst.msk [vmem:[%s2921_s3 + $0x174] sm:$0xf] %vm1515_vm2, %v1921_v32  ;;  %v793_v38 = vadd.f32 %v2416_v58, %v792_v35  ;;  %v2046_v39 = vpop.f32.mrb[46].mxu0  ;;  %v1001_v40 = vadd.f32 %v2416_v58, %v1000_v37  ;;  %v2098_v41 = vpop.f32.mrb[46].mxu1 }
 0x14c   :  { %v1061_v42 = vmax.f32 %v801_v34, 0.0  ;;  %v804_v43 = vadd.f32 %v2046_v39, %v2416_v58  ;;  %v795_v44 = vpop.f32.mrb[47].mxu0  ;;  %v1113_v45 = vmax.f32 %v1009_v36, 0.0  ;;  %v1012_v46 = vadd.f32 %v2098_v41, %v2416_v58  ;;  %v1003_v47 = vpop.f32.mrb[47].mxu1 }
 0x14d   :  { %v1059_v48 = vmax.f32 %v793_v38, 0.0  ;;  %v796_v49 = vadd.f32 %v2416_v58, %v795_v44  ;;  %v1111_v50 = vmax.f32 %v1001_v40, 0.0  ;;  %v1004_v51 = vadd.f32 %v2416_v58, %v1003_v47 }
 0x14e   :  { %v1874_v52 = vpack.c.bf16 %v1061_v42, %v1061_v42  ;;  %v1062_v53 = vmax.f32 %v804_v43, 0.0  ;;  %v1926_v54 = vpack.c.bf16 %v1113_v45, %v1113_v45  ;;  %v1114_v55 = vmax.f32 %v1012_v46, 0.0 }
 0x14f   :  { %v1872_v56 = vpack.c.bf16 %v1059_v48, %v1059_v48  ;;  %v1060_v57 = vmax.f32 %v796_v49, 0.0  ;;  %v1924_v59 = vpack.c.bf16 %v1111_v50, %v1111_v50  ;;  %v1112_v60 = vmax.f32 %v1004_v51, 0.0 }
 0x150   :  { %1562 = vst.msk [vmem:[%s2921_s3 + $0xb8] sm:$0xf] %vm1515_vm2, %v1874_v52  ;;  %v1875_v61 = vpack.c.bf16 %v1062_v53, %v1062_v53  ;;  %1614 = vst.msk [vmem:[%s2921_s3 + $0x188] sm:$0xf] %vm1515_vm2, %v1926_v54  ;;  %v1927_v62 = vpack.c.bf16 %v1114_v55, %v1114_v55 }
 0x151   :  { %1560 = vst.msk [vmem:[%s2921_s3 + $0xb0] sm:$0xf] %vm1515_vm2, %v1872_v56  ;;  %v1873_v63 = vpack.c.bf16 %v1060_v57, %v1060_v57  ;;  %1612 = vst.msk [vmem:[%s2921_s3 + $0x180] sm:$0xf] %vm1515_vm2, %v1924_v59  ;;  %v2049_v0 = vpop.f32.mrb[48].mxu0  ;;  %v1925_v1 = vpack.c.bf16 %v1112_v60, %v1112_v60 }
 0x152   :  { %1563 = vst.msk [vmem:[%s2921_s3 + $0xbc] sm:$0xf] %vm1515_vm2, %v1875_v61  ;;  %1615 = vst.msk [vmem:[%s2921_s3 + $0x18c] sm:$0xf] %vm1515_vm2, %v1927_v62  ;;  %v817_v2 = vadd.f32 %v2049_v0, %v2416_v58  ;;  %v808_v3 = vpop.f32.mrb[49].mxu0 }
 0x153   :  { %1561 = vst.msk [vmem:[%s2921_s3 + $0xb4] sm:$0xf] %vm1515_vm2, %v1873_v63  ;;  %1613 = vst.msk [vmem:[%s2921_s3 + $0x184] sm:$0xf] %vm1515_vm2, %v1925_v1  ;;  %v809_v4 = vadd.f32 %v2416_v58, %v808_v3  ;;  %v2050_v5 = vpop.f32.mrb[50].mxu0 }
 0x154   :  { %v1065_v6 = vmax.f32 %v817_v2, 0.0  ;;  %v820_v7 = vadd.f32 %v2050_v5, %v2416_v58  ;;  %v811_v8 = vpop.f32.mrb[51].mxu0 }
 0x155   :  { %v1063_v9 = vmax.f32 %v809_v4, 0.0  ;;  %v812_v10 = vadd.f32 %v2416_v58, %v811_v8 }
 0x156   :  { %v1878_v11 = vpack.c.bf16 %v1065_v6, %v1065_v6  ;;  %v1066_v12 = vmax.f32 %v820_v7, 0.0 }
 0x157   :  { %v1876_v13 = vpack.c.bf16 %v1063_v9, %v1063_v9  ;;  %v1064_v14 = vmax.f32 %v812_v10, 0.0 }
 0x158   :  { %1566 = vst.msk [vmem:[%s2921_s3 + $0xc8] sm:$0xf] %vm1515_vm2, %v1878_v11  ;;  %v1879_v15 = vpack.c.bf16 %v1066_v12, %v1066_v12 }
 0x159   :  { %1564 = vst.msk [vmem:[%s2921_s3 + $0xc0] sm:$0xf] %vm1515_vm2, %v1876_v13  ;;  %v1877_v16 = vpack.c.bf16 %v1064_v14, %v1064_v14 }
 0x15a   :  { %1567 = vst.msk [vmem:[%s2921_s3 + $0xcc] sm:$0xf] %vm1515_vm2, %v1879_v15 }
 0x15b   :  { %1565 = vst.msk [vmem:[%s2921_s3 + $0xc4] sm:$0xf] %vm1515_vm2, %v1877_v16 }

// kernel: encoder1_forward.6
= control target key start
LH: loop header
LB: loop body
LE: loop exit
PB: predicated region body
PF: predicated region fallthrough
CT: control target
= control target key end

     0   :  { %v790_v0 = vmov 0   ;;  %vm269_vm0 = vcmask 719872   ;;  %vm309_vm1 = vcmask 1043456   ;;  %vm575_vm2 = vcmask 60416   ;;  %s1099_s1 = inlined_call_operand.vmem [shape: bf16[216,8], index: 1, kind: input, shape index: {}]   ;;  %s1100_s0 = inlined_call_operand.vmem [shape: bf16[200,216], index: 0, kind: input, shape index: {}]   ;;  %s1101_s2 = inlined_call_operand.vmem [shape: f32[1,8], index: 2, kind: input, shape index: {}]   ;;  %s1102_s3 = inlined_call_operand.vmem [shape: bf16[200,8], index: 3, kind: output, shape index: {}]  }
   0x1   :  { %313 = vmatprep.subr.bf16.mxu0 %v790_v0  ;;  %v738_v1 = vld [vmem:[%s1099_s1] sm:$0xff]   ;;  %709 = vmatprep.subr.bf16.mxu1 %v790_v0  ;;  %v739_v2 = vld [vmem:[%s1099_s1 + $0x8] sm:$0xff]   ;;  %v740_v3 = vld [vmem:[%s1099_s1 + $0x10] sm:$0xff]  }
   0x2   :  { %314 = vmatpush1.bf16.msra.mxu0 %v738_v1  ;;  %723 = vmatpush1.bf16.msra.mxu1 %v738_v1  ;;  %v741_v4 = vld [vmem:[%s1099_s1 + $0x18] sm:$0xff]   ;;  %v742_v5 = vld [vmem:[%s1099_s1 + $0x20] sm:$0xff]   ;;  %v743_v8 = vld [vmem:[%s1099_s1 + $0x28] sm:$0xff]  }
   0x3   :  { %315 = vmatprep.subr.bf16.mxu0 %v790_v0  ;;  %710 = vmatprep.subr.bf16.mxu1 %v790_v0  ;;  %v754_v6 = vld [vmem:[%s1100_s0 + $0x4] ss:$8 sps:$4 sm:$0xff]   ;;  %v757_v7 = vld [vmem:[%s1100_s0 + $0x74] ss:$8 sps:$4 sm:$0xff]   ;;  %v751_v16 = vld [vmem:[%s1099_s1 + $0x68] ss:$0 sps:$4 sm:$0xff]  }
   0x4   :  { %646 = vmatprep.mubr.msk.bf16.mxu0 %vm269_vm0, %v754_v6  ;;  %653 = vmatprep.mubr.msk.bf16.mxu1 %vm269_vm0, %v757_v7  ;;  %v744_v9 = vld [vmem:[%s1099_s1 + $0x30] sm:$0xff]   ;;  %v745_v10 = vld [vmem:[%s1099_s1 + $0x38] sm:$0xff]   ;;  %v746_v11 = vld [vmem:[%s1099_s1 + $0x40] sm:$0xff]   ;;  %v311_v17 = vsel %vm309_vm1, %v751_v16, 0 }
   0x5   :  { %v747_v12 = vld [vmem:[%s1099_s1 + $0x48] sm:$0xff]   ;;  %v748_v13 = vld [vmem:[%s1099_s1 + $0x50] sm:$0xff]   ;;  %v749_v14 = vld [vmem:[%s1099_s1 + $0x58] sm:$0xff]  }
   0x6   :  { %316 = vmatpush1.bf16.msra.mxu0 %v739_v2  ;;  %724 = vmatpush1.bf16.msra.mxu1 %v739_v2  ;;  %v750_v15 = vld [vmem:[%s1099_s1 + $0x60] sm:$0xff]   ;;  %v755_v19 = vld [vmem:[%s1100_s0 + $0x70] ss:$8 sps:$4 sm:$0xff]   ;;  %v758_v20 = vld [vmem:[%s1100_s0 + $0x14] ss:$8 sps:$4 sm:$0xff]  }
   0x7   :  { %317 = vmatprep.subr.bf16.mxu0 %v790_v0  ;;  %711 = vmatprep.subr.bf16.mxu1 %v790_v0  ;;  %v752_v18 = vld [vmem:[%s1100_s0] ss:$8 sps:$4 sm:$0xff]   ;;  %v761_v21 = vld [vmem:[%s1100_s0 + $0x84] ss:$8 sps:$4 sm:$0xff]   ;;  %v760_v22 = vld [vmem:[%s1100_s0 + $0x10] ss:$8 sps:$4 sm:$0xff]  }
   0x8   :  { %v765_v23 = vld [vmem:[%s1100_s0 + $0x80] ss:$8 sps:$4 sm:$0xff]   ;;  %v763_v24 = vld [vmem:[%s1100_s0 + $0x24] ss:$8 sps:$4 sm:$0xff]   ;;  %v767_v25 = vld [vmem:[%s1100_s0 + $0x94] ss:$8 sps:$4 sm:$0xff]  }
   0x9   :  { %v766_v26 = vld [vmem:[%s1100_s0 + $0x20] ss:$8 sps:$4 sm:$0xff]   ;;  %v771_v27 = vld [vmem:[%s1100_s0 + $0x90] ss:$8 sps:$4 sm:$0xff]   ;;  %v769_v28 = vld [vmem:[%s1100_s0 + $0x34] ss:$8 sps:$4 sm:$0xff]  }
   0xa   :  { %318 = vmatpush1.bf16.msra.mxu0 %v740_v3  ;;  %725 = vmatpush1.bf16.msra.mxu1 %v740_v3  ;;  %v773_v29 = vld [vmem:[%s1100_s0 + $0xa4] ss:$8 sps:$4 sm:$0xff]   ;;  %v772_v30 = vld [vmem:[%s1100_s0 + $0x30] ss:$8 sps:$4 sm:$0xff]   ;;  %v777_v31 = vld [vmem:[%s1100_s0 + $0xa0] ss:$8 sps:$4 sm:$0xff]  }
   0xb   :  { %319 = vmatprep.subr.bf16.mxu0 %v790_v0  ;;  %712 = vmatprep.subr.bf16.mxu1 %v790_v0  ;;  %v775_v32 = vld [vmem:[%s1100_s0 + $0x44] ss:$8 sps:$4 sm:$0xff]   ;;  %v779_v33 = vld [vmem:[%s1100_s0 + $0xb4] ss:$8 sps:$4 sm:$0xff]   ;;  %v778_v35 = vld [vmem:[%s1100_s0 + $0x40] ss:$8 sps:$4 sm:$0xff]  }
   0xc   :  { %v39_v34 = vld [vmem:[%s1100_s0 + $0xc0] sm:$0xff]  ;;  %v783_v36 = vld [vmem:[%s1100_s0 + $0xb0] ss:$8 sps:$4 sm:$0xff]   ;;  %v781_v37 = vld [vmem:[%s1100_s0 + $0x54] ss:$8 sps:$4 sm:$0xff]  }
   0xd   :  { %v631_v38 = vcombine.high %v39_v34, %v39_v34  ;;  %v784_v39 = vld [vmem:[%s1100_s0 + $0x50] ss:$8 sps:$4 sm:$0xff]   ;;  %v630_v40 = vcombine.low %v39_v34, %v39_v34  ;;  %v786_v41 = vld [vmem:[%s1100_s0 + $0x64] ss:$8 sps:$4 sm:$0xff]   ;;  %v789_v42 = vld [vmem:[%s1100_s0 + $0x60] ss:$8 sps:$4 sm:$0xff]  }
   0xe   :  { %320 = vmatpush1.bf16.msra.mxu0 %v741_v4  ;;  %726 = vmatpush1.bf16.msra.mxu1 %v741_v4  ;;  %v972_v43 = vld [vmem:[%s1101_s2] ss:$0 sm:$0xff] }
   0xf   :  { %321 = vmatprep.subr.bf16.mxu0 %v790_v0  ;;  %713 = vmatprep.subr.bf16.mxu1 %v790_v0 }
  0x12   :  { %322 = vmatpush1.bf16.msra.mxu0 %v742_v5  ;;  %727 = vmatpush1.bf16.msra.mxu1 %v742_v5 }
  0x13   :  { %323 = vmatprep.subr.bf16.mxu0 %v790_v0  ;;  %714 = vmatprep.subr.bf16.mxu1 %v790_v0 }
  0x16   :  { %324 = vmatpush1.bf16.msra.mxu0 %v743_v8  ;;  %728 = vmatpush1.bf16.msra.mxu1 %v743_v8 }
  0x17   :  { %325 = vmatprep.subr.bf16.mxu0 %v790_v0  ;;  %715 = vmatprep.subr.bf16.mxu1 %v790_v0 }
  0x1a   :  { %326 = vmatpush1.bf16.msra.mxu0 %v744_v9  ;;  %729 = vmatpush1.bf16.msra.mxu1 %v744_v9 }
  0x1b   :  { %327 = vmatprep.subr.bf16.mxu0 %v790_v0  ;;  %716 = vmatprep.subr.bf16.mxu1 %v790_v0 }
  0x1e   :  { %328 = vmatpush1.bf16.msra.mxu0 %v745_v10  ;;  %730 = vmatpush1.bf16.msra.mxu1 %v745_v10 }
  0x1f   :  { %329 = vmatprep.subr.bf16.mxu0 %v790_v0  ;;  %717 = vmatprep.subr.bf16.mxu1 %v790_v0 }
  0x22   :  { %330 = vmatpush1.bf16.msra.mxu0 %v746_v11  ;;  %731 = vmatpush1.bf16.msra.mxu1 %v746_v11 }
  0x23   :  { %331 = vmatprep.subr.bf16.mxu0 %v790_v0  ;;  %718 = vmatprep.subr.bf16.mxu1 %v790_v0 }
  0x26   :  { %332 = vmatpush1.bf16.msra.mxu0 %v747_v12  ;;  %732 = vmatpush1.bf16.msra.mxu1 %v747_v12 }
  0x27   :  { %333 = vmatprep.subr.bf16.mxu0 %v790_v0  ;;  %719 = vmatprep.subr.bf16.mxu1 %v790_v0 }
  0x2a   :  { %334 = vmatpush1.bf16.msra.mxu0 %v748_v13  ;;  %733 = vmatpush1.bf16.msra.mxu1 %v748_v13 }
  0x2b   :  { %335 = vmatprep.subr.bf16.mxu0 %v790_v0  ;;  %720 = vmatprep.subr.bf16.mxu1 %v790_v0 }
  0x2e   :  { %336 = vmatpush1.bf16.msra.mxu0 %v749_v14  ;;  %734 = vmatpush1.bf16.msra.mxu1 %v749_v14 }
  0x2f   :  { %337 = vmatprep.subr.bf16.mxu0 %v790_v0  ;;  %721 = vmatprep.subr.bf16.mxu1 %v790_v0 }
  0x32   :  { %338 = vmatpush1.bf16.msra.mxu0 %v750_v15  ;;  %735 = vmatpush1.bf16.msra.mxu1 %v750_v15 }
  0x33   :  { %339 = vmatprep.subr.bf16.mxu0 %v790_v0  ;;  %722 = vmatprep.subr.bf16.mxu1 %v790_v0 }
  0x36   :  { %340 = vmatpush1.bf16.msra.mxu0 %v311_v17  ;;  %736 = vmatpush1.bf16.msra.mxu1 %v311_v17 }
  0x39   :  { %346 = vmatmul.mubr.bf16.vlgmr.msra.gmra.mrb[0].mxu0 %v752_v18  ;;  %402 = vmatmul.mubr.bf16.vlgmr.msra.gmra.mrb[0].mxu1 %v755_v19 }
  0x3a   :  { %647 = vmatprep.mubr.msk.bf16.mxu0 %vm269_vm0, %v758_v20  ;;  %654 = vmatprep.mubr.msk.bf16.mxu1 %vm269_vm0, %v761_v21 }
  0x41   :  { %354 = vmatmul.mubr.bf16.gmra.mrb[4].mxu0 %v760_v22  ;;  %410 = vmatmul.mubr.bf16.gmra.mrb[4].mxu1 %v765_v23 }
  0x42   :  { %648 = vmatprep.mubr.msk.bf16.mxu0 %vm269_vm0, %v763_v24  ;;  %655 = vmatprep.mubr.msk.bf16.mxu1 %vm269_vm0, %v767_v25 }
  0x49   :  { %362 = vmatmul.mubr.bf16.gmra.mrb[8].mxu0 %v766_v26  ;;  %418 = vmatmul.mubr.bf16.gmra.mrb[8].mxu1 %v771_v27 }
  0x4a   :  { %649 = vmatprep.mubr.msk.bf16.mxu0 %vm269_vm0, %v769_v28  ;;  %656 = vmatprep.mubr.msk.bf16.mxu1 %vm269_vm0, %v773_v29 }
  0x51   :  { %370 = vmatmul.mubr.bf16.gmra.mrb[12].mxu0 %v772_v30  ;;  %426 = vmatmul.mubr.bf16.gmra.mrb[12].mxu1 %v777_v31 }
  0x52   :  { %650 = vmatprep.mubr.msk.bf16.mxu0 %vm269_vm0, %v775_v32  ;;  %657 = vmatprep.mubr.msk.bf16.mxu1 %vm269_vm0, %v779_v33 }
  0x59   :  { %378 = vmatmul.mubr.bf16.gmra.mrb[16].mxu0 %v778_v35  ;;  %434 = vmatmul.mubr.bf16.gmra.mrb[16].mxu1 %v783_v36 }
  0x5a   :  { %651 = vmatprep.mubr.msk.bf16.mxu0 %vm269_vm0, %v781_v37  ;;  %658 = vmatprep.mubr.msk.bf16.mxu1 %vm269_vm0, %v631_v38 }
  0x61   :  { %386 = vmatmul.mubr.bf16.gmra.mrb[20].mxu0 %v784_v39  ;;  %442 = vmatmul.mubr.bf16.gmra.mrb[20].mxu1 %v630_v40 }
  0x62   :  { %652 = vmatprep.mubr.msk.bf16.mxu0 %vm269_vm0, %v786_v41 }
  0x69   :  { %394 = vmatmul.mubr.bf16.gmra.mrb[24].mxu0 %v789_v42 }
 0x10c   :  { %v347_v44 = vpop.f32.mrb[0].mxu0  ;;  %v403_v45 = vpop.f32.mrb[0].mxu1 }
 0x10d   :  { %v348_v46 = vadd.f32 %v972_v43, %v347_v44  ;;  %v349_v47 = vpop.f32.mrb[1].mxu0  ;;  %v404_v48 = vadd.f32 %v972_v43, %v403_v45  ;;  %v405_v49 = vpop.f32.mrb[1].mxu1 }
 0x10e   :  { %v350_v50 = vpop.f32.mrb[2].mxu0  ;;  %v406_v51 = vpop.f32.mrb[2].mxu1 }
 0x10f   :  { %v449_v52 = vmax.f32 %v348_v46, 0.0  ;;  %v351_v53 = vadd.f32 %v972_v43, %v350_v50  ;;  %v352_v54 = vpop.f32.mrb[3].mxu0  ;;  %v463_v55 = vmax.f32 %v404_v48, 0.0  ;;  %v407_v56 = vadd.f32 %v972_v43, %v406_v51  ;;  %v408_v57 = vpop.f32.mrb[3].mxu1 }
 0x111   :  { %v684_v58 = vpack.c.bf16 %v449_v52, %v449_v52  ;;  %v450_v59 = vmax.f32 %v351_v53, 0.0  ;;  %v698_v60 = vpack.c.bf16 %v463_v55, %v463_v55  ;;  %v464_v61 = vmax.f32 %v407_v56, 0.0 }
 0x113   :  { %576 = vst.msk [vmem:[%s1102_s3] sm:$0xf] %vm575_vm2, %v684_v58  ;;  %v685_v62 = vpack.c.bf16 %v450_v59, %v450_v59  ;;  %590 = vst.msk [vmem:[%s1102_s3 + $0x38] sm:$0xf] %vm575_vm2, %v698_v60  ;;  %v699_v63 = vpack.c.bf16 %v464_v61, %v464_v61 }
 0x114   :  { %v355_v0 = vpop.f32.mrb[4].mxu0  ;;  %v411_v1 = vpop.f32.mrb[4].mxu1 }
 0x115   :  { %577 = vst.msk [vmem:[%s1102_s3 + $0x4] sm:$0xf] %vm575_vm2, %v685_v62  ;;  %v356_v2 = vadd.f32 %v972_v43, %v355_v0  ;;  %v357_v3 = vpop.f32.mrb[5].mxu0  ;;  %591 = vst.msk [vmem:[%s1102_s3 + $0x3c] sm:$0xf] %vm575_vm2, %v699_v63  ;;  %v412_v4 = vadd.f32 %v972_v43, %v411_v1  ;;  %v413_v5 = vpop.f32.mrb[5].mxu1 }
 0x116   :  { %v358_v6 = vpop.f32.mrb[6].mxu0  ;;  %v414_v7 = vpop.f32.mrb[6].mxu1 }
 0x117   :  { %v451_v8 = vmax.f32 %v356_v2, 0.0  ;;  %v359_v9 = vadd.f32 %v972_v43, %v358_v6  ;;  %v360_v10 = vpop.f32.mrb[7].mxu0  ;;  %v465_v11 = vmax.f32 %v412_v4, 0.0  ;;  %v415_v12 = vadd.f32 %v972_v43, %v414_v7  ;;  %v416_v13 = vpop.f32.mrb[7].mxu1 }
 0x119   :  { %v686_v14 = vpack.c.bf16 %v451_v8, %v451_v8  ;;  %v452_v15 = vmax.f32 %v359_v9, 0.0  ;;  %v700_v16 = vpack.c.bf16 %v465_v11, %v465_v11  ;;  %v466_v17 = vmax.f32 %v415_v12, 0.0 }
 0x11b   :  { %578 = vst.msk [vmem:[%s1102_s3 + $0x8] sm:$0xf] %vm575_vm2, %v686_v14  ;;  %v687_v18 = vpack.c.bf16 %v452_v15, %v452_v15  ;;  %592 = vst.msk [vmem:[%s1102_s3 + $0x40] sm:$0xf] %vm575_vm2, %v700_v16  ;;  %v701_v19 = vpack.c.bf16 %v466_v17, %v466_v17 }
 0x11c   :  { %v363_v20 = vpop.f32.mrb[8].mxu0  ;;  %v419_v21 = vpop.f32.mrb[8].mxu1 }
 0x11d   :  { %579 = vst.msk [vmem:[%s1102_s3 + $0xc] sm:$0xf] %vm575_vm2, %v687_v18  ;;  %v364_v22 = vadd.f32 %v972_v43, %v363_v20  ;;  %v365_v23 = vpop.f32.mrb[9].mxu0  ;;  %593 = vst.msk [vmem:[%s1102_s3 + $0x44] sm:$0xf] %vm575_vm2, %v701_v19  ;;  %v420_v24 = vadd.f32 %v972_v43, %v419_v21  ;;  %v421_v25 = vpop.f32.mrb[9].mxu1 }
 0x11e   :  { %v366_v26 = vpop.f32.mrb[10].mxu0  ;;  %v422_v27 = vpop.f32.mrb[10].mxu1 }
 0x11f   :  { %v453_v28 = vmax.f32 %v364_v22, 0.0  ;;  %v367_v29 = vadd.f32 %v972_v43, %v366_v26  ;;  %v368_v30 = vpop.f32.mrb[11].mxu0  ;;  %v467_v31 = vmax.f32 %v420_v24, 0.0  ;;  %v423_v32 = vadd.f32 %v972_v43, %v422_v27  ;;  %v424_v33 = vpop.f32.mrb[11].mxu1 }
 0x121   :  { %v688_v34 = vpack.c.bf16 %v453_v28, %v453_v28  ;;  %v454_v35 = vmax.f32 %v367_v29, 0.0  ;;  %v702_v36 = vpack.c.bf16 %v467_v31, %v467_v31  ;;  %v468_v37 = vmax.f32 %v423_v32, 0.0 }
 0x123   :  { %580 = vst.msk [vmem:[%s1102_s3 + $0x10] sm:$0xf] %vm575_vm2, %v688_v34  ;;  %v689_v38 = vpack.c.bf16 %v454_v35, %v454_v35  ;;  %594 = vst.msk [vmem:[%s1102_s3 + $0x48] sm:$0xf] %vm575_vm2, %v702_v36  ;;  %v703_v39 = vpack.c.bf16 %v468_v37, %v468_v37 }
 0x124   :  { %v371_v40 = vpop.f32.mrb[12].mxu0  ;;  %v427_v41 = vpop.f32.mrb[12].mxu1 }
 0x125   :  { %581 = vst.msk [vmem:[%s1102_s3 + $0x14] sm:$0xf] %vm575_vm2, %v689_v38  ;;  %v372_v42 = vadd.f32 %v972_v43, %v371_v40  ;;  %v373_v44 = vpop.f32.mrb[13].mxu0  ;;  %595 = vst.msk [vmem:[%s1102_s3 + $0x4c] sm:$0xf] %vm575_vm2, %v703_v39  ;;  %v428_v45 = vadd.f32 %v972_v43, %v427_v41  ;;  %v429_v46 = vpop.f32.mrb[13].mxu1 }
 0x126   :  { %v374_v47 = vpop.f32.mrb[14].mxu0  ;;  %v430_v48 = vpop.f32.mrb[14].mxu1 }
 0x127   :  { %v455_v49 = vmax.f32 %v372_v42, 0.0  ;;  %v375_v50 = vadd.f32 %v972_v43, %v374_v47  ;;  %v376_v51 = vpop.f32.mrb[15].mxu0  ;;  %v469_v52 = vmax.f32 %v428_v45, 0.0  ;;  %v431_v53 = vadd.f32 %v972_v43, %v430_v48  ;;  %v432_v54 = vpop.f32.mrb[15].mxu1 }
 0x129   :  { %v690_v55 = vpack.c.bf16 %v455_v49, %v455_v49  ;;  %v456_v56 = vmax.f32 %v375_v50, 0.0  ;;  %v704_v57 = vpack.c.bf16 %v469_v52, %v469_v52  ;;  %v470_v58 = vmax.f32 %v431_v53, 0.0 }
 0x12b   :  { %582 = vst.msk [vmem:[%s1102_s3 + $0x18] sm:$0xf] %vm575_vm2, %v690_v55  ;;  %v691_v59 = vpack.c.bf16 %v456_v56, %v456_v56  ;;  %596 = vst.msk [vmem:[%s1102_s3 + $0x50] sm:$0xf] %vm575_vm2, %v704_v57  ;;  %v705_v60 = vpack.c.bf16 %v470_v58, %v470_v58 }
 0x12c   :  { %v379_v61 = vpop.f32.mrb[16].mxu0  ;;  %v435_v62 = vpop.f32.mrb[16].mxu1 }
 0x12d   :  { %583 = vst.msk [vmem:[%s1102_s3 + $0x1c] sm:$0xf] %vm575_vm2, %v691_v59  ;;  %v380_v63 = vadd.f32 %v972_v43, %v379_v61  ;;  %v381_v0 = vpop.f32.mrb[17].mxu0  ;;  %597 = vst.msk [vmem:[%s1102_s3 + $0x54] sm:$0xf] %vm575_vm2, %v705_v60  ;;  %v436_v1 = vadd.f32 %v972_v43, %v435_v62  ;;  %v437_v2 = vpop.f32.mrb[17].mxu1 }
 0x12e   :  { %v382_v3 = vpop.f32.mrb[18].mxu0  ;;  %v438_v4 = vpop.f32.mrb[18].mxu1 }
 0x12f   :  { %v457_v5 = vmax.f32 %v380_v63, 0.0  ;;  %v383_v6 = vadd.f32 %v972_v43, %v382_v3  ;;  %v384_v7 = vpop.f32.mrb[19].mxu0  ;;  %v471_v8 = vmax.f32 %v436_v1, 0.0  ;;  %v439_v9 = vadd.f32 %v972_v43, %v438_v4  ;;  %v440_v10 = vpop.f32.mrb[19].mxu1 }
 0x131   :  { %v692_v11 = vpack.c.bf16 %v457_v5, %v457_v5  ;;  %v458_v12 = vmax.f32 %v383_v6, 0.0  ;;  %v706_v13 = vpack.c.bf16 %v471_v8, %v471_v8  ;;  %v472_v14 = vmax.f32 %v439_v9, 0.0 }
 0x133   :  { %584 = vst.msk [vmem:[%s1102_s3 + $0x20] sm:$0xf] %vm575_vm2, %v692_v11  ;;  %v693_v15 = vpack.c.bf16 %v458_v12, %v458_v12  ;;  %598 = vst.msk [vmem:[%s1102_s3 + $0x58] sm:$0xf] %vm575_vm2, %v706_v13  ;;  %v707_v16 = vpack.c.bf16 %v472_v14, %v472_v14 }
 0x134   :  { %v387_v17 = vpop.f32.mrb[20].mxu0  ;;  %v443_v18 = vpop.f32.mrb[20].mxu1 }
 0x135   :  { %585 = vst.msk [vmem:[%s1102_s3 + $0x24] sm:$0xf] %vm575_vm2, %v693_v15  ;;  %v388_v19 = vadd.f32 %v972_v43, %v387_v17  ;;  %v389_v20 = vpop.f32.mrb[21].mxu0  ;;  %599 = vst.msk [vmem:[%s1102_s3 + $0x5c] sm:$0xf] %vm575_vm2, %v707_v16  ;;  %v444_v21 = vadd.f32 %v972_v43, %v443_v18  ;;  %v445_v22 = vpop.f32.mrb[21].mxu1 }
 0x136   :  { %v390_v23 = vpop.f32.mrb[22].mxu0  ;;  %v446_v24 = vpop.f32.mrb[22].mxu1 }
 0x137   :  { %v459_v25 = vmax.f32 %v388_v19, 0.0  ;;  %v391_v26 = vadd.f32 %v972_v43, %v390_v23  ;;  %v392_v27 = vpop.f32.mrb[23].mxu0  ;;  %v473_v28 = vmax.f32 %v444_v21, 0.0  ;;  %v447_v29 = vpop.f32.mrb[23].mxu1 }
 0x139   :  { %v694_v30 = vpack.c.bf16 %v459_v25, %v459_v25  ;;  %v460_v31 = vmax.f32 %v391_v26, 0.0  ;;  %v708_v32 = vpack.c.bf16 %v473_v28, %v473_v28 }
 0x13b   :  { %586 = vst.msk [vmem:[%s1102_s3 + $0x28] sm:$0xf] %vm575_vm2, %v694_v30  ;;  %v695_v33 = vpack.c.bf16 %v460_v31, %v460_v31  ;;  %600 = vst.msk [vmem:[%s1102_s3 + $0x60] sm:$0xf] %vm575_vm2, %v708_v32 }
 0x13c   :  { %v395_v34 = vpop.f32.mrb[24].mxu0 }
 0x13d   :  { %587 = vst.msk [vmem:[%s1102_s3 + $0x2c] sm:$0xf] %vm575_vm2, %v695_v33  ;;  %v396_v35 = vadd.f32 %v972_v43, %v395_v34  ;;  %v397_v36 = vpop.f32.mrb[25].mxu0 }
 0x13e   :  { %v398_v37 = vpop.f32.mrb[26].mxu0 }
 0x13f   :  { %v461_v38 = vmax.f32 %v396_v35, 0.0  ;;  %v399_v39 = vadd.f32 %v972_v43, %v398_v37  ;;  %v400_v40 = vpop.f32.mrb[27].mxu0 }
 0x141   :  { %v696_v41 = vpack.c.bf16 %v461_v38, %v461_v38  ;;  %v462_v42 = vmax.f32 %v399_v39, 0.0 }
 0x143   :  { %588 = vst.msk [vmem:[%s1102_s3 + $0x30] sm:$0xf] %vm575_vm2, %v696_v41  ;;  %v697_v44 = vpack.c.bf16 %v462_v42, %v462_v42 }
 0x145   :  { %589 = vst.msk [vmem:[%s1102_s3 + $0x34] sm:$0xf] %vm575_vm2, %v697_v44 }

// kernel: encoder1_forward.7
= control target key start
LH: loop header
LB: loop body
LE: loop exit
PB: predicated region body
PF: predicated region fallthrough
CT: control target
= control target key end

     0   :  { %vm85_vm0 = vcmask 261120   ;;  %v2608_v44 = vmov 0   ;;  %s2592_s1 = inlined_call_operand.vmem [shape: bf16[32,32], index: 1, kind: input, shape index: {}]   ;;  %s2593_s0 = inlined_call_operand.vmem [shape: bf16[32,32], index: 0, kind: input, shape index: {}]   ;;  %s2594_s3 = inlined_call_operand.vmem [shape: bf16[32,32], index: 3, kind: input, shape index: {}]   ;;  %s2595_s2 = inlined_call_operand.vmem [shape: f32[1,32], index: 2, kind: input, shape index: {}]   ;;  %s2596_s5 = inlined_call_operand.vmem [shape: f32[32,32], index: 5, kind: input, shape index: {}]   ;;  %s2597_s7 = inlined_call_operand.vmem [shape: bf16[32,512], index: 7, kind: input, shape index: {}]   ;;  %s2598_s4 = inlined_call_operand.vmem [shape: f32[1,32], index: 4, kind: input, shape index: {}]   ;;  %s2599_s6 = inlined_call_operand.vmem [shape: bf16[32,512], index: 6, kind: input, shape index: {}]   ;;  %s2600_s8 = inlined_call_operand.vmem [shape: bf16[32,512], index: 8, kind: input, shape index: {}]   ;;  %s2601_s10 = inlined_call_operand.vmem [shape: bf16[128,512], index: 10, kind: input, shape index: {}]   ;;  %s2602_s11 = inlined_call_operand.vmem [shape: f32[8,128], index: 11, kind: input, shape index: {}]   ;;  %s2603_s9 = inlined_call_operand.vmem [shape: f32[1,512], index: 9, kind: input, shape index: {}]   ;;  %s2604_s12 = inlined_call_operand.vmem [shape: f32[8,128], index: 12, kind: input, shape index: {}]   ;;  %s2605_s13 = inlined_call_operand.vmem [shape: f32[4,8,128], index: 13, kind: output, shape index: {0}]   ;;  %s2606_s15 = inlined_call_operand.vmem [shape: f32[8,128], index: 15, kind: output, shape index: {2}]   ;;  %s2607_s14 = inlined_call_operand.vmem [shape: f32[8,128], index: 14, kind: output, shape index: {1}]  }
   0x1   :  { %v1834_v0 = vld [vmem:[%s2592_s1] sm:$0xff]   ;;  %v1835_v1 = vld [vmem:[%s2592_s1 + $0x8] sm:$0xff]   ;;  %v231_v40 = vld [vmem:[%s2596_s5 + $0x10] sm:$0xff] }
   0x2   :  { %1741 = vmatprep.subr.bf16.mxu0 %v1834_v0  ;;  %v1836_v2 = vld [vmem:[%s2593_s0] sm:$0xff]   ;;  %v1837_v3 = vld [vmem:[%s2593_s0 + $0x8] sm:$0xff]   ;;  %v232_v41 = vld [vmem:[%s2596_s5 + $0x18] sm:$0xff] }
   0x3   :  { %1742 = vmatpush3.bf16.msra.mxu0 %v1834_v0  ;;  %1745 = vmatprep.mubr.msk.bf16.mxu0 %vm85_vm0, %v1836_v2  ;;  %v1838_v4 = vld [vmem:[%s2594_s3] sm:$0xff]   ;;  %v1839_v5 = vld [vmem:[%s2594_s3 + $0x8] sm:$0xff]  }
   0x4   :  { %1743 = vmatprep.subr.bf16.mxu0 %v1835_v1  ;;  %1749 = vmatprep.subr.bf16.mxu1 %v1838_v4  ;;  %v1614_v6 = vld [vmem:[%s2595_s2] ss:$0 sm:$0xff]  ;;  %v1842_v37 = vld [vmem:[%s2597_s7 + $0x4] ss:$16 sps:$4 sm:$0xff]   ;;  %v230_v38 = vld [vmem:[%s2596_s5 + $0x8] sm:$0xff] }
   0x5   :  { %1750 = vmatpush3.bf16.msra.mxu1 %v1838_v4  ;;  %v229_v21 = vld [vmem:[%s2596_s5] sm:$0xff]  ;;  %v1848_v54 = vld [vmem:[%s2597_s7 + $0xc] ss:$16 sps:$4 sm:$0xff]   ;;  %v1846_v57 = vld [vmem:[%s2597_s7 + $0x8] ss:$16 sps:$4 sm:$0xff]  }
   0x6   :  { %1751 = vmatprep.subr.bf16.mxu1 %v1839_v5  ;;  %v1621_v22 = vld [vmem:[%s2598_s4] ss:$0 sm:$0xff]  ;;  %v1845_v42 = vld [vmem:[%s2597_s7 + $0x24] ss:$16 sps:$4 sm:$0xff]   ;;  %v1854_v58 = vld [vmem:[%s2597_s7 + $0x2c] ss:$16 sps:$4 sm:$0xff]  }
   0x7   :  { %1744 = vmatpush3.bf16.msra.mxu0 %v1835_v1  ;;  %v1840_v39 = vld [vmem:[%s2597_s7] ss:$16 sps:$4 sm:$0xff]   ;;  %v1851_v45 = vld [vmem:[%s2599_s6 + $0x4] ss:$16 sps:$4 sm:$0xff]   ;;  %v1852_v59 = vld [vmem:[%s2597_s7 + $0x28] ss:$16 sps:$4 sm:$0xff]  }
   0x8   :  { %v1843_v43 = vld [vmem:[%s2597_s7 + $0x20] ss:$16 sps:$4 sm:$0xff]   ;;  %v1857_v50 = vld [vmem:[%s2599_s6 + $0x24] ss:$16 sps:$4 sm:$0xff]   ;;  %v1860_v60 = vld [vmem:[%s2599_s6 + $0xc] ss:$16 sps:$4 sm:$0xff]  }
   0x9   :  { %1752 = vmatpush3.bf16.msra.mxu1 %v1839_v5  ;;  %v1849_v49 = vld [vmem:[%s2599_s6] ss:$16 sps:$4 sm:$0xff]   ;;  %v1866_v56 = vld [vmem:[%s2600_s8 + $0x4] ss:$16 sps:$4 sm:$0xff]   ;;  %v1858_v61 = vld [vmem:[%s2599_s6 + $0x8] ss:$16 sps:$4 sm:$0xff]  }
   0xa   :  { %1746 = vmatmul.mubr.msk.bf16.vlgmr.msra.gmra.mrb[0].mxu0 %vm85_vm0, %v1837_v3  ;;  %v1855_v55 = vld [vmem:[%s2599_s6 + $0x20] ss:$16 sps:$4 sm:$0xff]   ;;  %v1863_v63 = vld [vmem:[%s2599_s6 + $0x2c] ss:$16 sps:$4 sm:$0xff]   ;;  %v1872_v0 = vld [vmem:[%s2600_s8 + $0x24] ss:$16 sps:$4 sm:$0xff]  }
   0xb   :  { %1765 = vmatprep.mubr.msk.f32.mxu0 %vm85_vm0, %v229_v21  ;;  %v1864_v62 = vld [vmem:[%s2600_s8] ss:$16 sps:$4 sm:$0xff]   ;;  %v1861_v1 = vld [vmem:[%s2599_s6 + $0x28] ss:$16 sps:$4 sm:$0xff]   ;;  %v1869_v3 = vld [vmem:[%s2600_s8 + $0xc] ss:$16 sps:$4 sm:$0xff]  }
   0xc   :  { %v1870_v2 = vld [vmem:[%s2600_s8 + $0x20] ss:$16 sps:$4 sm:$0xff]   ;;  %v1867_v4 = vld [vmem:[%s2600_s8 + $0x8] ss:$16 sps:$4 sm:$0xff]   ;;  %v1875_v5 = vld [vmem:[%s2600_s8 + $0x2c] ss:$16 sps:$4 sm:$0xff]  }
  0xdd   :  { %v1747_v7 = vpop.f32.mrb[0].mxu0 }
  0xde   :  { %v135_v8 = vadd.f32 %v1747_v7, %v1614_v6  ;;  %v126_v9 = vpop.f32.mrb[1].mxu0  ;;  %v2222_v7 = vld [vmem:[%s2601_s10 + $0x4] ss:$16 sps:$4 sm:$0xff]  }
  0xdf   :  { %v127_v10 = vadd.f32 %v1614_v6, %v126_v9  ;;  %v1748_v11 = vpop.f32.mrb[2].mxu0 }
  0xe0   :  { %v138_v12 = vadd.f32 %v1748_v11, %v1614_v6  ;;  %v129_v13 = vpop.f32.mrb[3].mxu0  ;;  %v143_v15 = vmax.f32 %v135_v8, 0.0  ;;  %v2227_v8 = vld [vmem:[%s2601_s10 + $0xc] ss:$16 sps:$4 sm:$0xff]   ;;  %v2234_v11 = vld [vmem:[%s2601_s10] ss:$16 sps:$4 sm:$0xff]  }
  0xe1   :  { %v130_v14 = vadd.f32 %v1614_v6, %v129_v13  ;;  %v141_v17 = vmax.f32 %v127_v10, 0.0  ;;  %v1873_v6 = vld [vmem:[%s2600_s8 + $0x28] ss:$16 sps:$4 sm:$0xff]  }
  0xe2   :  { %v144_v16 = vmax.f32 %v138_v12, 0.0  ;;  %v2239_v12 = vld [vmem:[%s2601_s10 + $0x8] ss:$16 sps:$4 sm:$0xff]  }
  0xe3   :  { %v142_v18 = vmax.f32 %v130_v14, 0.0  ;;  %v2244_v14 = vld [vmem:[%s2601_s10 + $0x24] ss:$16 sps:$4 sm:$0xff]  }
  0xe4   :  { %v151_v19 = vpack.c.bf16 %v144_v16, %v143_v15  ;;  %v2249_v15 = vld [vmem:[%s2601_s10 + $0x2c] ss:$16 sps:$4 sm:$0xff]  }
  0xe5   :  { %v150_v20 = vpack.c.bf16 %v142_v18, %v141_v17  ;;  %v2258_v17 = vld [vmem:[%s2601_s10 + $0x20] ss:$16 sps:$4 sm:$0xff]   ;;  %v2263_v18 = vld [vmem:[%s2601_s10 + $0x28] ss:$16 sps:$4 sm:$0xff]  }
  0xe7   :  { %1753 = vmatprep.mubr.msk.bf16.mxu1 %vm85_vm0, %v150_v20 }
  0xe8   :  { %1754 = vmatmul.mubr.msk.bf16.vlgmr.msra.gmra.mrb[0].mxu1 %vm85_vm0, %v151_v19 }
  0xe9   :  { %1779 = vmatprep.mubr.msk.f32.mxu1 %vm85_vm0, %v229_v21  ;;  %v2270_v21 = vld [vmem:[%s2601_s10 + $0x44] ss:$16 sps:$4 sm:$0xff]  }
 0x1bb   :  { %v1755_v23 = vpop.f32.mrb[0].mxu1 }
 0x1bc   :  { %v219_v24 = vadd.f32 %v1755_v23, %v1621_v22  ;;  %v210_v25 = vpop.f32.mrb[1].mxu1  ;;  %v2284_v23 = vld [vmem:[%s2601_s10 + $0x40] ss:$16 sps:$4 sm:$0xff]  }
 0x1bd   :  { %v211_v26 = vadd.f32 %v1621_v22, %v210_v25  ;;  %v1756_v27 = vpop.f32.mrb[2].mxu1  ;;  %v2296_v25 = vld [vmem:[%s2601_s10 + $0x64] ss:$16 sps:$4 sm:$0xff]  }
 0x1be   :  { %v222_v28 = vadd.f32 %v1756_v27, %v1621_v22  ;;  %v213_v29 = vpop.f32.mrb[3].mxu1  ;;  %v227_v31 = vmax.f32 %v219_v24, 0.0  ;;  %v2289_v24 = vld [vmem:[%s2601_s10 + $0x48] ss:$16 sps:$4 sm:$0xff]   ;;  %v2310_v27 = vld [vmem:[%s2601_s10 + $0x60] ss:$16 sps:$4 sm:$0xff]  }
 0x1bf   :  { %v214_v30 = vadd.f32 %v1621_v22, %v213_v29  ;;  %v225_v33 = vmax.f32 %v211_v26, 0.0  ;;  %v2275_v22 = vld [vmem:[%s2601_s10 + $0x4c] ss:$16 sps:$4 sm:$0xff]   ;;  %v2322_v29 = vld [vmem:[%s2601_s10 + $0x84] ss:$16 sps:$4 sm:$0xff]  }
 0x1c0   :  { %v228_v32 = vmax.f32 %v222_v28, 0.0  ;;  %v2301_v26 = vld [vmem:[%s2601_s10 + $0x6c] ss:$16 sps:$4 sm:$0xff]   ;;  %v2315_v28 = vld [vmem:[%s2601_s10 + $0x68] ss:$16 sps:$4 sm:$0xff]  }
 0x1c1   :  { %v226_v34 = vmax.f32 %v214_v30, 0.0  ;;  %v2327_v30 = vld [vmem:[%s2601_s10 + $0x8c] ss:$16 sps:$4 sm:$0xff]  }
 0x1c2   :  { %v2102_v35 = vpack.c.bf16 %v228_v32, %v227_v31  ;;  %v2336_v31 = vld [vmem:[%s2601_s10 + $0x80] ss:$16 sps:$4 sm:$0xff]   ;;  %v2341_v32 = vld [vmem:[%s2601_s10 + $0x88] ss:$16 sps:$4 sm:$0xff]  }
 0x1c3   :  { %v2104_v36 = vpack.c.bf16 %v226_v34, %v225_v33  ;;  %v2348_v33 = vld [vmem:[%s2601_s10 + $0xa4] ss:$16 sps:$4 sm:$0xff]   ;;  %v2353_v34 = vld [vmem:[%s2601_s10 + $0xac] ss:$16 sps:$4 sm:$0xff]  }
 0x1c5   :  { %1786 = vmatprep.subr.bf16.mxu0 %v2104_v36 }
 0x1c6   :  { %1788 = vmatpush3.bf16.msra.mxu0 %v2104_v36 }
 0x1c7   :  { %1790 = vmatprep.subr.bf16.mxu0 %v2102_v35 }
 0x1ca   :  { %1792 = vmatpush3.bf16.msra.mxu0 %v2102_v35 }
 0x1cb   :  { %481 = vmatprep.subr.bf16.mxu0 %v1842_v37  ;;  %v2372_v37 = vld [vmem:[%s2601_s10 + $0xc4] ss:$16 sps:$4 sm:$0xff]  }
 0x1cd   :  { %1766 = vmatmul.mubr.msk.f32.vlgmr.msra.gmra.mrb[4].mxu0 %vm85_vm0, %v230_v38 }
 0x1ce   :  { %1768 = vmatprep.mubr.msk.f32.mxu0 %vm85_vm0, %v231_v40  ;;  %482 = vmatpush1.bf16.msra.mxu0 %v1840_v39  ;;  %v2384_v39 = vld [vmem:[%s2601_s10 + $0xc0] ss:$16 sps:$4 sm:$0xff]  }
 0x1cf   :  { %483 = vmatprep.subr.bf16.mxu0 %v1845_v42  ;;  %v2401_v42 = vld [vmem:[%s2601_s10 + $0xec] ss:$16 sps:$4 sm:$0xff]  }
 0x1d1   :  { %1769 = vmatmul.mubr.msk.f32.gmra.mrb[6].mxu0 %vm85_vm0, %v232_v41 }
 0x1d2   :  { %484 = vmatpush1.bf16.msra.mxu0 %v1843_v43  ;;  %513 = vmatprep.mubr.bf16.mxu0 %v2608_v44  ;;  %v2408_v43 = vld [vmem:[%s2601_s10 + $0xe0] ss:$16 sps:$4 sm:$0xff]  }
 0x1d3   :  { %633 = vmatprep.subr.bf16.mxu0 %v1851_v45  ;;  %v2413_v45 = vld [vmem:[%s2601_s10 + $0xe8] ss:$16 sps:$4 sm:$0xff]  }
 0x2a0   :  { %v1767_v46 = vpop.f32.mrb[4].mxu0 }
 0x2a1   :  { %v311_v47 = vpop.f32.mrb[5].mxu0 }
 0x2a2   :  { %v1793_v48 = vpack.c.bf16 %v1767_v46, %v311_v47  ;;  %v987_v46 = vld [vmem:[%s2602_s11] sm:$0xff] }
 0x2a3   :  { %v989_v47 = vpack.c.bf16 %v987_v46, %v987_v46 }
 0x2a4   :  { %v1770_v51 = vpop.f32.mrb[6].mxu0  ;;  %1794 = vmatprep.subr.bf16.mxu1 %v1793_v48  ;;  %1642 = vmatmul.mubr.msk.bf16.vlgmr.msra.gmra.mrb[8].mxu0 %vm85_vm0, %v1793_v48 }
 0x2a5   :  { %v321_v52 = vpop.f32.mrb[7].mxu0  ;;  %1796 = vmatpush3.bf16.msra.mxu1 %v1793_v48  ;;  %523 = vmatprep.mubr.bf16.mxu0 %v2608_v44 }
 0x2a6   :  { %v1797_v53 = vpack.c.bf16 %v1770_v51, %v321_v52  ;;  %634 = vmatpush1.bf16.msra.mxu0 %v1849_v49  ;;  %v917_v52 = vld [vmem:[%s2603_s9] sm:$0xf] }
 0x2a7   :  { %635 = vmatprep.subr.bf16.mxu0 %v1857_v50 }
 0x2a8   :  { %1798 = vmatprep.subr.bf16.mxu1 %v1797_v53 }
 0x2a9   :  { %1800 = vmatpush3.bf16.msra.mxu1 %v1797_v53 }
 0x2aa   :  { %534 = vmatprep.subr.bf16.mxu1 %v1848_v54  ;;  %636 = vmatpush1.bf16.msra.mxu0 %v1855_v55 }
 0x2ab   :  { %795 = vmatprep.subr.bf16.mxu0 %v1866_v56 }
 0x2ac   :  { %1780 = vmatmul.mubr.msk.f32.vlgmr.msra.gmra.mrb[4].mxu1 %vm85_vm0, %v230_v38  ;;  %1643 = vmatmul.mubr.msk.bf16.gmra.mrb[12].mxu0 %vm85_vm0, %v1797_v53  ;;  %v2377_v38 = vld [vmem:[%s2601_s10 + $0xcc] ss:$16 sps:$4 sm:$0xff]  }
 0x2ad   :  { %535 = vmatpush1.bf16.msra.mxu1 %v1846_v57  ;;  %1782 = vmatprep.mubr.msk.f32.mxu1 %vm85_vm0, %v231_v40  ;;  %v2389_v40 = vld [vmem:[%s2601_s10 + $0xc8] ss:$16 sps:$4 sm:$0xff]  }
 0x2ae   :  { %536 = vmatprep.subr.bf16.mxu1 %v1854_v58  ;;  %665 = vmatprep.mubr.bf16.mxu0 %v2608_v44 }
 0x2b0   :  { %1783 = vmatmul.mubr.msk.f32.gmra.mrb[6].mxu1 %vm85_vm0, %v232_v41  ;;  %v2396_v41 = vld [vmem:[%s2601_s10 + $0xe4] ss:$16 sps:$4 sm:$0xff]  }
 0x2b1   :  { %537 = vmatpush1.bf16.msra.mxu1 %v1852_v59  ;;  %566 = vmatprep.mubr.bf16.mxu1 %v2608_v44 }
 0x2b2   :  { %686 = vmatprep.subr.bf16.mxu1 %v1860_v60 }
 0x2b4   :  { %1644 = vmatmul.mubr.msk.bf16.vlgmr.msra.gmra.mrb[8].mxu1 %vm85_vm0, %v1793_v48  ;;  %1654 = vmatmul.mubr.msk.bf16.vlgmr.msra.gmra.mrb[8].mxu0 %vm85_vm0, %v2104_v36  ;;  %v919_v48 = vlaneseq }
 0x2b5   :  { %576 = vmatprep.mubr.bf16.mxu1 %v2608_v44  ;;  %675 = vmatprep.mubr.bf16.mxu0 %v2608_v44 }
 0x2b6   :  { %687 = vmatpush1.bf16.msra.mxu1 %v1858_v61  ;;  %796 = vmatpush1.bf16.msra.mxu0 %v1864_v62  ;;  %v920_v49 = vshrl.u32 %v919_v48, 7 }
 0x2b7   :  { %688 = vmatprep.subr.bf16.mxu1 %v1863_v63  ;;  %797 = vmatprep.subr.bf16.mxu0 %v1872_v0 }
 0x2b8   :  { %v921_v50 = vsub.s32 0, %v920_v49  ;;  %v929_v51 = vsub.s32 2, %v920_v49  ;;  %v933_v54 = vsub.s32 3, %v920_v49 }
 0x2ba   :  { %689 = vmatpush1.bf16.msra.mxu1 %v1861_v1  ;;  %798 = vmatpush1.bf16.msra.mxu0 %v1870_v2  ;;  %v922_v57 = vrot.slane %v917_v52, %v921_v50  ;;  %v930_v58 = vrot.slane %v917_v52, %v929_v51  ;;  %v934_v62 = vrot.slane %v917_v52, %v933_v54 }
 0x2bb   :  { %848 = vmatprep.subr.bf16.mxu1 %v1869_v3  ;;  %1150 = vmatprep.subr.bf16.mxu0 %v2222_v7 }
 0x2bc   :  { %1645 = vmatmul.mubr.msk.bf16.gmra.mrb[12].mxu1 %vm85_vm0, %v1797_v53  ;;  %1655 = vmatmul.mubr.msk.bf16.gmra.mrb[12].mxu0 %vm85_vm0, %v2102_v35  ;;  %v925_v53 = vsub.s32 1, %v920_v49 }
 0x2bd   :  { %718 = vmatprep.mubr.bf16.mxu1 %v2608_v44  ;;  %827 = vmatprep.mubr.bf16.mxu0 %v2608_v44 }
 0x2be   :  { %v926_v61 = vrot.slane %v917_v52, %v925_v53 }
 0x2c4   :  { %1656 = vmatmul.mubr.msk.bf16.vlgmr.msra.gmra.mrb[8].mxu1 %vm85_vm0, %v2104_v36  ;;  %v2365_v36 = vld [vmem:[%s2601_s10 + $0xa8] ss:$16 sps:$4 sm:$0xff]  }
 0x2c5   :  { %728 = vmatprep.mubr.bf16.mxu1 %v2608_v44  ;;  %849 = vmatpush1.bf16.msra.mxu1 %v1867_v4 }
 0x2c6   :  { %850 = vmatprep.subr.bf16.mxu1 %v1875_v5 }
 0x2c9   :  { %851 = vmatpush1.bf16.msra.mxu1 %v1873_v6 }
 0x2ca   :  { %1191 = vmatprep.subr.bf16.mxu1 %v2227_v8 }
 0x2cc   :  { %1657 = vmatmul.mubr.msk.bf16.gmra.mrb[12].mxu1 %vm85_vm0, %v2102_v35  ;;  %v2360_v35 = vld [vmem:[%s2601_s10 + $0xa0] ss:$16 sps:$4 sm:$0xff]  }
 0x2cd   :  { %880 = vmatprep.mubr.bf16.mxu1 %v2608_v44 }
 0x37f   :  { %v1781_v9 = vpop.f32.mrb[4].mxu1 }
 0x380   :  { %v396_v10 = vpop.f32.mrb[5].mxu1 }
 0x381   :  { %v739_v13 = vpack.c.bf16 %v1781_v9, %v396_v10 }
 0x383   :  { %1666 = vmatmul.mubr.msk.bf16.vlgmr.msra.gmra.mrb[8].mxu0 %vm85_vm0, %v739_v13  ;;  %1668 = vmatmul.mubr.msk.bf16.vlgmr.msra.gmra.mrb[8].mxu1 %vm85_vm0, %v739_v13  ;;  %v1784_v16 = vpop.f32.mrb[6].mxu1 }
 0x384   :  { %1151 = vmatpush1.bf16.msra.mxu0 %v2234_v11  ;;  %1192 = vmatpush1.bf16.msra.mxu1 %v2239_v12  ;;  %v406_v19 = vpop.f32.mrb[7].mxu1 }
 0x385   :  { %1152 = vmatprep.subr.bf16.mxu0 %v2244_v14  ;;  %1193 = vmatprep.subr.bf16.mxu1 %v2249_v15  ;;  %v740_v20 = vpack.c.bf16 %v1784_v16, %v406_v19 }
 0x386   :  { %837 = vmatprep.mubr.bf16.mxu0 %v2608_v44  ;;  %890 = vmatprep.mubr.bf16.mxu1 %v2608_v44 }
 0x388   :  { %1153 = vmatpush1.bf16.msra.mxu0 %v2258_v17  ;;  %1194 = vmatpush1.bf16.msra.mxu1 %v2263_v18 }
 0x389   :  { %1154 = vmatprep.subr.bf16.mxu0 %v2270_v21  ;;  %1195 = vmatprep.subr.bf16.mxu1 %v2275_v22 }
 0x38b   :  { %1667 = vmatmul.mubr.msk.bf16.gmra.mrb[12].mxu0 %vm85_vm0, %v740_v20  ;;  %1669 = vmatmul.mubr.msk.bf16.gmra.mrb[12].mxu1 %vm85_vm0, %v740_v20 }
 0x38c   :  { %1155 = vmatpush1.bf16.msra.mxu0 %v2284_v23  ;;  %1196 = vmatpush1.bf16.msra.mxu1 %v2289_v24 }
 0x38d   :  { %1156 = vmatprep.subr.bf16.mxu0 %v2296_v25  ;;  %1197 = vmatprep.subr.bf16.mxu1 %v2301_v26 }
 0x38e   :  { %1182 = vmatprep.mubr.bf16.mxu0 %v2608_v44  ;;  %1223 = vmatprep.mubr.bf16.mxu1 %v2608_v44 }
 0x390   :  { %1157 = vmatpush1.bf16.msra.mxu0 %v2310_v27  ;;  %1198 = vmatpush1.bf16.msra.mxu1 %v2315_v28 }
 0x391   :  { %1158 = vmatprep.subr.bf16.mxu0 %v2322_v29  ;;  %1199 = vmatprep.subr.bf16.mxu1 %v2327_v30 }
 0x394   :  { %1159 = vmatpush1.bf16.msra.mxu0 %v2336_v31  ;;  %1200 = vmatpush1.bf16.msra.mxu1 %v2341_v32 }
 0x395   :  { %1160 = vmatprep.subr.bf16.mxu0 %v2348_v33  ;;  %1201 = vmatprep.subr.bf16.mxu1 %v2353_v34 }
 0x398   :  { %1161 = vmatpush1.bf16.msra.mxu0 %v2360_v35  ;;  %1202 = vmatpush1.bf16.msra.mxu1 %v2365_v36 }
 0x399   :  { %1162 = vmatprep.subr.bf16.mxu0 %v2372_v37  ;;  %1203 = vmatprep.subr.bf16.mxu1 %v2377_v38 }
 0x39c   :  { %1163 = vmatpush1.bf16.msra.mxu0 %v2384_v39  ;;  %1204 = vmatpush1.bf16.msra.mxu1 %v2389_v40 }
 0x39d   :  { %1164 = vmatprep.subr.bf16.mxu0 %v2396_v41  ;;  %1205 = vmatprep.subr.bf16.mxu1 %v2401_v42 }
 0x3a0   :  { %1165 = vmatpush1.bf16.msra.mxu0 %v2408_v43  ;;  %1206 = vmatpush1.bf16.msra.mxu1 %v2413_v45 }
 0x3a1   :  { %1262 = vmatprep.subr.bf16.mxu0 %v2222_v7  ;;  %1303 = vmatprep.subr.bf16.mxu1 %v2227_v8 }
 0x3a3   :  { %1183 = vmatmul.mubr.bf16.vlgmr.msra.gmra.mrb[16].mxu0 %v989_v47  ;;  %1224 = vmatmul.mubr.bf16.vlgmr.msra.gmra.mrb[16].mxu1 %v989_v47 }
 0x3a4   :  { %1263 = vmatpush1.bf16.msra.mxu0 %v2234_v11  ;;  %1304 = vmatpush1.bf16.msra.mxu1 %v2239_v12 }
 0x3a5   :  { %1264 = vmatprep.subr.bf16.mxu0 %v2244_v14  ;;  %1305 = vmatprep.subr.bf16.mxu1 %v2249_v15 }
 0x3a6   :  { %1294 = vmatprep.mubr.bf16.mxu0 %v2608_v44  ;;  %1335 = vmatprep.mubr.bf16.mxu1 %v2608_v44 }
 0x3a8   :  { %1265 = vmatpush1.bf16.msra.mxu0 %v2258_v17  ;;  %1306 = vmatpush1.bf16.msra.mxu1 %v2263_v18 }
 0x3a9   :  { %1266 = vmatprep.subr.bf16.mxu0 %v2270_v21  ;;  %1307 = vmatprep.subr.bf16.mxu1 %v2275_v22 }
 0x3ac   :  { %1267 = vmatpush1.bf16.msra.mxu0 %v2284_v23  ;;  %1308 = vmatpush1.bf16.msra.mxu1 %v2289_v24 }
 0x3ad   :  { %1268 = vmatprep.subr.bf16.mxu0 %v2296_v25  ;;  %1309 = vmatprep.subr.bf16.mxu1 %v2301_v26 }
 0x3b0   :  { %1269 = vmatpush1.bf16.msra.mxu0 %v2310_v27  ;;  %1310 = vmatpush1.bf16.msra.mxu1 %v2315_v28 }
 0x3b1   :  { %1270 = vmatprep.subr.bf16.mxu0 %v2322_v29  ;;  %1311 = vmatprep.subr.bf16.mxu1 %v2327_v30 }
 0x3b4   :  { %1271 = vmatpush1.bf16.msra.mxu0 %v2336_v31  ;;  %1312 = vmatpush1.bf16.msra.mxu1 %v2341_v32 }
 0x3b5   :  { %1272 = vmatprep.subr.bf16.mxu0 %v2348_v33  ;;  %1313 = vmatprep.subr.bf16.mxu1 %v2353_v34 }
 0x3b8   :  { %1273 = vmatpush1.bf16.msra.mxu0 %v2360_v35  ;;  %1314 = vmatpush1.bf16.msra.mxu1 %v2365_v36 }
 0x3b9   :  { %1274 = vmatprep.subr.bf16.mxu0 %v2372_v37  ;;  %1315 = vmatprep.subr.bf16.mxu1 %v2377_v38 }
 0x3bc   :  { %1275 = vmatpush1.bf16.msra.mxu0 %v2384_v39  ;;  %1316 = vmatpush1.bf16.msra.mxu1 %v2389_v40 }
 0x3bd   :  { %1276 = vmatprep.subr.bf16.mxu0 %v2396_v41  ;;  %1317 = vmatprep.subr.bf16.mxu1 %v2401_v42 }
 0x3c0   :  { %1277 = vmatpush1.bf16.msra.mxu0 %v2408_v43  ;;  %1318 = vmatpush1.bf16.msra.mxu1 %v2413_v45 }
 0x3c1   :  { %1375 = vmatprep.subr.bf16.mxu0 %v2222_v7  ;;  %1416 = vmatprep.subr.bf16.mxu1 %v2227_v8 }
 0x456   :  { %v829_v55 = vpop.f32.mrb[8].mxu0  ;;  %v882_v56 = vpop.f32.mrb[8].mxu1 }
 0x457   :  { %v831_v59 = vpop.f32.mrb[9].mxu0  ;;  %v884_v60 = vpop.f32.mrb[9].mxu1 }
 0x458   :  { %v833_v63 = vpop.f32.mrb[10].mxu0  ;;  %v886_v0 = vpop.f32.mrb[10].mxu1 }
 0x459   :  { %v2461_v1 = vadd.f32 %v922_v57, %v833_v63  ;;  %v2463_v2 = vadd.f32 %v930_v58, %v886_v0  ;;  %v835_v3 = vpop.f32.mrb[11].mxu0  ;;  %v888_v4 = vpop.f32.mrb[11].mxu1  ;;  %v939_v0 = vadd.f32 %v922_v57, %v829_v55 }
 0x45a   :  { %v2465_v5 = vadd.f32 %v926_v61, %v835_v3  ;;  %v2467_v6 = vadd.f32 %v934_v62, %v888_v4  ;;  %v941_v3 = vadd.f32 %v930_v58, %v882_v56  ;;  %v940_v4 = vadd.f32 %v926_v61, %v831_v59 }
 0x45e   :  { %v839_v9 = vpop.f32.mrb[12].mxu0  ;;  %v892_v10 = vpop.f32.mrb[12].mxu1 }
 0x45f   :  { %v2469_v13 = vadd.f32 %v922_v57, %v839_v9  ;;  %v2471_v16 = vadd.f32 %v930_v58, %v892_v10  ;;  %v841_v19 = vpop.f32.mrb[13].mxu0  ;;  %v894_v20 = vpop.f32.mrb[13].mxu1  ;;  %v942_v9 = vadd.f32 %v934_v62, %v884_v60 }
 0x460   :  { %v2473_v46 = vadd.f32 %v926_v61, %v841_v19  ;;  %v2475_v47 = vadd.f32 %v934_v62, %v894_v20  ;;  %v843_v48 = vpop.f32.mrb[14].mxu0  ;;  %v896_v49 = vpop.f32.mrb[14].mxu1 }
 0x461   :  { %2610 = vst [vmem:[#allocation2_spill] sm:$0xff] %v2469_v13  ;;  %2611 = vst [vmem:[#allocation3_spill] sm:$0xff] %v2471_v16  ;;  %v2477_v50 = vadd.f32 %v922_v57, %v843_v48  ;;  %v2479_v51 = vadd.f32 %v930_v58, %v896_v49  ;;  %v845_v52 = vpop.f32.mrb[15].mxu0  ;;  %v898_v53 = vpop.f32.mrb[15].mxu1 }
 0x462   :  { %2612 = vst [vmem:[#allocation4_spill] sm:$0xff] %v2473_v46  ;;  %2613 = vst [vmem:[#allocation5_spill] sm:$0xff] %v2475_v47  ;;  %v2481_v54 = vadd.f32 %v926_v61, %v845_v52  ;;  %v2483_v63 = vadd.f32 %v934_v62, %v898_v53  ;;  %v988_v62 = vld [vmem:[%s2604_s12] sm:$0xff] }
 0x463   :  { %2614 = vst [vmem:[#allocation6_spill] sm:$0xff] %v2477_v50  ;;  %2615 = vst [vmem:[#allocation7_spill] sm:$0xff] %v2479_v51 }
 0x464   :  { %2616 = vst [vmem:[#allocation8_spill] sm:$0xff] %v2481_v54 }
 0x476   :  { %v1184_v10 = vpop.f32.mrb[16].mxu0  ;;  %v1225_v19 = vpop.f32.mrb[16].mxu1 }
 0x477   :  { %v1232_v20 = vadd.f32 %v1184_v10, %v939_v0  ;;  %v1234_v44 = vadd.f32 %v1225_v19, %v941_v3  ;;  %v1186_v47 = vpop.f32.mrb[17].mxu0  ;;  %v1227_v46 = vpop.f32.mrb[17].mxu1  ;;  %v2617_v3 = vmov 0  }
 0x478   :  { %v1233_v48 = vadd.f32 %v1186_v47, %v940_v4  ;;  %v1235_v50 = vadd.f32 %v1227_v46, %v942_v9  ;;  %v1188_v49 = vpop.f32.mrb[18].mxu0  ;;  %v1229_v51 = vpop.f32.mrb[18].mxu1 }
 0x479   :  { %v1702_v16 = vmul.f32 -1.442695, %v1232_v20  ;;  %v1189_v13 = vpop.f32.mrb[19].mxu0  ;;  %v1230_v52 = vpop.f32.mrb[19].mxu1 }
 0x47a   :  { %v1703_v54 = vmul.f32 -1.442695, %v1233_v48  ;;  %v1704_v55 = vmul.f32 -1.442695, %v1235_v50 }
 0x47b   :  { %1924 = vpow2.f32 %v1702_v16 }
 0x47c   :  { %1926 = vpow2.f32 %v1703_v54 }
 0x47d   :  { %1928 = vpow2.f32 %v1704_v55 }
 0x47e   :  { %1930 = vtanh.f32 %v1234_v44 }
 0x485   :  { %v1925_v56 = vpop.eup %1924 }
 0x486   :  { %v1927_v57 = vpop.eup %1926  ;;  %v1239_v58 = vadd.f32 1.0, %v1925_v56 }
 0x487   :  { %v1245_v59 = vadd.f32 1.0, %v1927_v57  ;;  %v1929_v60 = vpop.eup %1928 }
 0x488   :  { %1932 = vrcp.f32 %v1239_v58  ;;  %v1931_v61 = vpop.eup %1930  ;;  %v1252_v16 = vadd.f32 1.0, %v1929_v60 }
 0x489   :  { %1934 = vrcp.f32 %v1245_v59 }
 0x48a   :  { %1936 = vrcp.f32 %v1252_v16 }
 0x492   :  { %v1933_v13 = vpop.eup %1932 }
 0x493   :  { %v1935_v46 = vpop.eup %1934  ;;  %v1256_v47 = vmul.f32 %v1933_v13, %v1931_v61 }
 0x494   :  { %v1255_v51 = vmul.f32 %v1935_v46, %v988_v62  ;;  %v1937_v44 = vpop.eup %1936 }
 0x496   :  { %v2488_v50 = vadd.f32 %v1256_v47, %v1255_v51 }
 0x498   :  { %1938 = vtanh.f32 %v2488_v50 }
 0x4a2   :  { %v1939_v53 = vpop.eup %1938 }
 0x4a3   :  { %v1259_v54 = vmul.f32 %v1939_v53, %v1937_v44 }
 0x4a5   :  { %1260 = vst [vmem:[%s2605_s13] sm:$0xff] %v1259_v54  ;;  %v1261_v0 = vpack.c.bf16 %v1259_v54, %v1259_v54 }
 0x4a7   :  { %1295 = vmatmul.mubr.bf16.vlgmr.msra.gmra.mrb[20].mxu0 %v1261_v0  ;;  %1336 = vmatmul.mubr.bf16.vlgmr.msra.gmra.mrb[20].mxu1 %v1261_v0 }
 0x4a8   :  { %1376 = vmatpush1.bf16.msra.mxu0 %v2234_v11  ;;  %1417 = vmatpush1.bf16.msra.mxu1 %v2239_v12 }
 0x4a9   :  { %1377 = vmatprep.subr.bf16.mxu0 %v2244_v14  ;;  %1418 = vmatprep.subr.bf16.mxu1 %v2249_v15 }
 0x4aa   :  { %1407 = vmatprep.mubr.bf16.mxu0 %v2617_v3  ;;  %1448 = vmatprep.mubr.bf16.mxu1 %v2617_v3 }
 0x4ac   :  { %1378 = vmatpush1.bf16.msra.mxu0 %v2258_v17  ;;  %1419 = vmatpush1.bf16.msra.mxu1 %v2263_v18 }
 0x4ad   :  { %1379 = vmatprep.subr.bf16.mxu0 %v2270_v21  ;;  %1420 = vmatprep.subr.bf16.mxu1 %v2275_v22 }
 0x4b0   :  { %1380 = vmatpush1.bf16.msra.mxu0 %v2284_v23  ;;  %1421 = vmatpush1.bf16.msra.mxu1 %v2289_v24 }
 0x4b1   :  { %1381 = vmatprep.subr.bf16.mxu0 %v2296_v25  ;;  %1422 = vmatprep.subr.bf16.mxu1 %v2301_v26 }
 0x4b4   :  { %1382 = vmatpush1.bf16.msra.mxu0 %v2310_v27  ;;  %1423 = vmatpush1.bf16.msra.mxu1 %v2315_v28 }
 0x4b5   :  { %1383 = vmatprep.subr.bf16.mxu0 %v2322_v29  ;;  %1424 = vmatprep.subr.bf16.mxu1 %v2327_v30 }
 0x4b8   :  { %1384 = vmatpush1.bf16.msra.mxu0 %v2336_v31  ;;  %1425 = vmatpush1.bf16.msra.mxu1 %v2341_v32 }
 0x4b9   :  { %1385 = vmatprep.subr.bf16.mxu0 %v2348_v33  ;;  %1426 = vmatprep.subr.bf16.mxu1 %v2353_v34 }
 0x4bc   :  { %1386 = vmatpush1.bf16.msra.mxu0 %v2360_v35  ;;  %1427 = vmatpush1.bf16.msra.mxu1 %v2365_v36 }
 0x4bd   :  { %1387 = vmatprep.subr.bf16.mxu0 %v2372_v37  ;;  %1428 = vmatprep.subr.bf16.mxu1 %v2377_v38 }
 0x4c0   :  { %1388 = vmatpush1.bf16.msra.mxu0 %v2384_v39  ;;  %1429 = vmatpush1.bf16.msra.mxu1 %v2389_v40 }
 0x4c1   :  { %1389 = vmatprep.subr.bf16.mxu0 %v2396_v41  ;;  %1430 = vmatprep.subr.bf16.mxu1 %v2401_v42 }
 0x4c4   :  { %1390 = vmatpush1.bf16.msra.mxu0 %v2408_v43  ;;  %1431 = vmatpush1.bf16.msra.mxu1 %v2413_v45 }
 0x4c5   :  { %1488 = vmatprep.subr.bf16.mxu0 %v2222_v7  ;;  %1529 = vmatprep.subr.bf16.mxu1 %v2227_v8 }
 0x57a   :  { %v1296_v4 = vpop.f32.mrb[20].mxu0  ;;  %v1337_v9 = vpop.f32.mrb[20].mxu1 }
 0x57b   :  { %v1344_v10 = vadd.f32 %v1296_v4, %v2461_v1  ;;  %v1346_v19 = vadd.f32 %v1337_v9, %v2463_v2  ;;  %v1298_v20 = vpop.f32.mrb[21].mxu0  ;;  %v1339_v48 = vpop.f32.mrb[21].mxu1 }
 0x57c   :  { %v1345_v49 = vadd.f32 %v1298_v20, %v2465_v5  ;;  %v1347_v52 = vadd.f32 %v1339_v48, %v2467_v6  ;;  %v1300_v55 = vpop.f32.mrb[22].mxu0  ;;  %v1341_v56 = vpop.f32.mrb[22].mxu1  ;;  %v2622_v48 = vld [vmem:[#allocation6_spill] sm:$0xff] }
 0x57d   :  { %v1705_v57 = vmul.f32 -1.442695, %v1344_v10  ;;  %v1301_v58 = vpop.f32.mrb[23].mxu0  ;;  %v1342_v59 = vpop.f32.mrb[23].mxu1 }
 0x57e   :  { %v1706_v7 = vmul.f32 -1.442695, %v1345_v49  ;;  %v1707_v8 = vmul.f32 -1.442695, %v1347_v52  ;;  %v2623_v52 = vld [vmem:[#allocation7_spill] sm:$0xff]  ;;  %v2624_v58 = vld [vmem:[#allocation8_spill] sm:$0xff] }
 0x57f   :  { %1940 = vpow2.f32 %v1705_v57 }
 0x580   :  { %1942 = vpow2.f32 %v1706_v7 }
 0x581   :  { %1944 = vpow2.f32 %v1707_v8 }
 0x582   :  { %1946 = vtanh.f32 %v1346_v19 }
 0x589   :  { %v1941_v60 = vpop.eup %1940 }
 0x58a   :  { %v1943_v61 = vpop.eup %1942  ;;  %v1351_v1 = vadd.f32 1.0, %v1941_v60 }
 0x58b   :  { %v1357_v2 = vadd.f32 1.0, %v1943_v61  ;;  %v1945_v5 = vpop.eup %1944 }
 0x58c   :  { %1948 = vrcp.f32 %v1351_v1  ;;  %v1947_v62 = vpop.eup %1946  ;;  %v1364_v47 = vadd.f32 1.0, %v1945_v5 }
 0x58d   :  { %1950 = vrcp.f32 %v1357_v2 }
 0x58e   :  { %1952 = vrcp.f32 %v1364_v47 }
 0x596   :  { %v1949_v6 = vpop.eup %1948 }
 0x597   :  { %v1951_v13 = vpop.eup %1950  ;;  %v1368_v46 = vmul.f32 %v1949_v6, %v1947_v62 }
 0x598   :  { %v1367_v16 = vmul.f32 %v1951_v13, %v2488_v50  ;;  %v1953_v44 = vpop.eup %1952 }
 0x59a   :  { %v2533_v51 = vadd.f32 %v1368_v46, %v1367_v16 }
 0x59c   :  { %1954 = vtanh.f32 %v2533_v51 }
 0x5a6   :  { %v1955_v53 = vpop.eup %1954 }
 0x5a7   :  { %v1371_v54 = vmul.f32 %v1955_v53, %v1953_v44 }
 0x5a9   :  { %1708 = vst [vmem:[%s2605_s13 + $0x8] sm:$0xff] %v1371_v54  ;;  %v1374_v0 = vpack.c.bf16 %v1371_v54, %v1371_v54 }
 0x5ab   :  { %1408 = vmatmul.mubr.bf16.vlgmr.msra.gmra.mrb[24].mxu0 %v1374_v0  ;;  %1449 = vmatmul.mubr.bf16.vlgmr.msra.gmra.mrb[24].mxu1 %v1374_v0 }
 0x5ac   :  { %1489 = vmatpush1.bf16.msra.mxu0 %v2234_v11  ;;  %1530 = vmatpush1.bf16.msra.mxu1 %v2239_v12 }
 0x5ad   :  { %1490 = vmatprep.subr.bf16.mxu0 %v2244_v14  ;;  %1531 = vmatprep.subr.bf16.mxu1 %v2249_v15  ;;  %v2618_v14 = vld [vmem:[#allocation2_spill] sm:$0xff] }
 0x5ae   :  { %1520 = vmatprep.mubr.bf16.mxu0 %v2617_v3  ;;  %1561 = vmatprep.mubr.bf16.mxu1 %v2617_v3 }
 0x5b0   :  { %1491 = vmatpush1.bf16.msra.mxu0 %v2258_v17  ;;  %1532 = vmatpush1.bf16.msra.mxu1 %v2263_v18  ;;  %v2619_v17 = vld [vmem:[#allocation3_spill] sm:$0xff] }
 0x5b1   :  { %1492 = vmatprep.subr.bf16.mxu0 %v2270_v21  ;;  %1533 = vmatprep.subr.bf16.mxu1 %v2275_v22 }
 0x5b4   :  { %1493 = vmatpush1.bf16.msra.mxu0 %v2284_v23  ;;  %1534 = vmatpush1.bf16.msra.mxu1 %v2289_v24  ;;  %v2620_v23 = vld [vmem:[#allocation4_spill] sm:$0xff] }
 0x5b5   :  { %1494 = vmatprep.subr.bf16.mxu0 %v2296_v25  ;;  %1535 = vmatprep.subr.bf16.mxu1 %v2301_v26  ;;  %v2621_v25 = vld [vmem:[#allocation5_spill] sm:$0xff] }
 0x5b8   :  { %1495 = vmatpush1.bf16.msra.mxu0 %v2310_v27  ;;  %1536 = vmatpush1.bf16.msra.mxu1 %v2315_v28 }
 0x5b9   :  { %1496 = vmatprep.subr.bf16.mxu0 %v2322_v29  ;;  %1537 = vmatprep.subr.bf16.mxu1 %v2327_v30 }
 0x5bc   :  { %1497 = vmatpush1.bf16.msra.mxu0 %v2336_v31  ;;  %1538 = vmatpush1.bf16.msra.mxu1 %v2341_v32 }
 0x5bd   :  { %1498 = vmatprep.subr.bf16.mxu0 %v2348_v33  ;;  %1539 = vmatprep.subr.bf16.mxu1 %v2353_v34 }
 0x5c0   :  { %1499 = vmatpush1.bf16.msra.mxu0 %v2360_v35  ;;  %1540 = vmatpush1.bf16.msra.mxu1 %v2365_v36 }
 0x5c1   :  { %1500 = vmatprep.subr.bf16.mxu0 %v2372_v37  ;;  %1541 = vmatprep.subr.bf16.mxu1 %v2377_v38 }
 0x5c4   :  { %1501 = vmatpush1.bf16.msra.mxu0 %v2384_v39  ;;  %1542 = vmatpush1.bf16.msra.mxu1 %v2389_v40 }
 0x5c5   :  { %1502 = vmatprep.subr.bf16.mxu0 %v2396_v41  ;;  %1543 = vmatprep.subr.bf16.mxu1 %v2401_v42 }
 0x5c8   :  { %1503 = vmatpush1.bf16.msra.mxu0 %v2408_v43  ;;  %1544 = vmatpush1.bf16.msra.mxu1 %v2413_v45 }
 0x67e   :  { %v1409_v11 = vpop.f32.mrb[24].mxu0  ;;  %v1450_v12 = vpop.f32.mrb[24].mxu1 }
 0x67f   :  { %v1457_v15 = vadd.f32 %v1409_v11, %v2618_v14  ;;  %v1459_v18 = vadd.f32 %v1450_v12, %v2619_v17  ;;  %v1411_v21 = vpop.f32.mrb[25].mxu0  ;;  %v1452_v22 = vpop.f32.mrb[25].mxu1 }
 0x680   :  { %v1458_v24 = vadd.f32 %v1411_v21, %v2620_v23  ;;  %v1460_v26 = vadd.f32 %v1452_v22, %v2621_v25  ;;  %v1413_v27 = vpop.f32.mrb[26].mxu0  ;;  %v1454_v28 = vpop.f32.mrb[26].mxu1 }
 0x681   :  { %v1709_v29 = vmul.f32 -1.442695, %v1457_v15  ;;  %v1414_v30 = vpop.f32.mrb[27].mxu0  ;;  %v1455_v31 = vpop.f32.mrb[27].mxu1 }
 0x682   :  { %v1710_v32 = vmul.f32 -1.442695, %v1458_v24  ;;  %v1711_v33 = vmul.f32 -1.442695, %v1460_v26 }
 0x683   :  { %1956 = vpow2.f32 %v1709_v29 }
 0x684   :  { %1958 = vpow2.f32 %v1710_v32 }
 0x685   :  { %1960 = vpow2.f32 %v1711_v33 }
 0x686   :  { %1962 = vtanh.f32 %v1459_v18 }
 0x68d   :  { %v1957_v34 = vpop.eup %1956 }
 0x68e   :  { %v1959_v35 = vpop.eup %1958  ;;  %v1464_v36 = vadd.f32 1.0, %v1957_v34 }
 0x68f   :  { %v1470_v37 = vadd.f32 1.0, %v1959_v35  ;;  %v1961_v38 = vpop.eup %1960 }
 0x690   :  { %1964 = vrcp.f32 %v1464_v36  ;;  %v1963_v39 = vpop.eup %1962  ;;  %v1477_v43 = vadd.f32 1.0, %v1961_v38 }
 0x691   :  { %1966 = vrcp.f32 %v1470_v37 }
 0x692   :  { %1968 = vrcp.f32 %v1477_v43 }
 0x69a   :  { %v1965_v40 = vpop.eup %1964 }
 0x69b   :  { %v1967_v41 = vpop.eup %1966  ;;  %v1481_v42 = vmul.f32 %v1965_v40, %v1963_v39 }
 0x69c   :  { %v1480_v45 = vmul.f32 %v1967_v41, %v2533_v51  ;;  %v1969_v3 = vpop.eup %1968 }
 0x69e   :  { %v1482_v50 = vadd.f32 %v1481_v42, %v1480_v45 }
 0x6a0   :  { %1970 = vtanh.f32 %v1482_v50 }
 0x6aa   :  { %v1971_v4 = vpop.eup %1970 }
 0x6ab   :  { %v1484_v9 = vmul.f32 %v1971_v4, %v1969_v3 }
 0x6ad   :  { %1712 = vst [vmem:[%s2605_s13 + $0x10] sm:$0xff] %v1484_v9  ;;  %v1487_v10 = vpack.c.bf16 %v1484_v9, %v1484_v9 }
 0x6af   :  { %1521 = vmatmul.mubr.bf16.vlgmr.msra.gmra.mrb[28].mxu0 %v1487_v10  ;;  %1562 = vmatmul.mubr.bf16.vlgmr.msra.gmra.mrb[28].mxu1 %v1487_v10 }
 0x782   :  { %v1522_v19 = vpop.f32.mrb[28].mxu0  ;;  %v1563_v20 = vpop.f32.mrb[28].mxu1 }
 0x783   :  { %v1570_v49 = vadd.f32 %v1522_v19, %v2622_v48  ;;  %v1572_v55 = vadd.f32 %v1563_v20, %v2623_v52  ;;  %v1524_v56 = vpop.f32.mrb[29].mxu0  ;;  %v1565_v57 = vpop.f32.mrb[29].mxu1 }
 0x784   :  { %v1571_v59 = vadd.f32 %v1524_v56, %v2624_v58  ;;  %v1573_v7 = vadd.f32 %v1565_v57, %v2483_v63  ;;  %v1526_v8 = vpop.f32.mrb[30].mxu0  ;;  %v1567_v60 = vpop.f32.mrb[30].mxu1 }
 0x785   :  { %v1713_v61 = vmul.f32 -1.442695, %v1570_v49  ;;  %v1527_v1 = vpop.f32.mrb[31].mxu0  ;;  %v1568_v2 = vpop.f32.mrb[31].mxu1 }
 0x786   :  { %v1714_v5 = vmul.f32 -1.442695, %v1571_v59  ;;  %v1715_v62 = vmul.f32 -1.442695, %v1573_v7 }
 0x787   :  { %1972 = vpow2.f32 %v1713_v61 }
 0x788   :  { %1974 = vpow2.f32 %v1714_v5 }
 0x789   :  { %1976 = vpow2.f32 %v1715_v62 }
 0x78a   :  { %1978 = vtanh.f32 %v1572_v55 }
 0x791   :  { %v1973_v6 = vpop.eup %1972 }
 0x792   :  { %v1975_v13 = vpop.eup %1974  ;;  %v1577_v46 = vadd.f32 1.0, %v1973_v6 }
 0x793   :  { %v1583_v47 = vadd.f32 1.0, %v1975_v13  ;;  %v1977_v16 = vpop.eup %1976 }
 0x794   :  { %1980 = vrcp.f32 %v1577_v46  ;;  %v1979_v51 = vpop.eup %1978  ;;  %v1590_v54 = vadd.f32 1.0, %v1977_v16 }
 0x795   :  { %1982 = vrcp.f32 %v1583_v47 }
 0x796   :  { %1984 = vrcp.f32 %v1590_v54 }
 0x79e   :  { %v1981_v63 = vpop.eup %1980 }
 0x79f   :  { %v1983_v44 = vpop.eup %1982  ;;  %v1594_v53 = vmul.f32 %v1981_v63, %v1979_v51 }
 0x7a0   :  { %v1593_v0 = vmul.f32 %v1983_v44, %v1482_v50  ;;  %v1985_v12 = vpop.eup %1984 }
 0x7a2   :  { %v1595_v11 = vadd.f32 %v1594_v53, %v1593_v0 }
 0x7a4   :  { %1986 = vtanh.f32 %v1595_v11  ;;  %1601 = vst [vmem:[%s2606_s15] sm:$0xff] %v1595_v11 }
 0x7ae   :  { %v1987_v14 = vpop.eup %1986 }
 0x7af   :  { %v1597_v15 = vmul.f32 %v1987_v14, %v1985_v12 }
 0x7b1   :  { %1716 = vst [vmem:[%s2605_s13 + $0x18] sm:$0xff] %v1597_v15  ;;  %1600 = vst [vmem:[%s2607_s14] sm:$0xff] %v1597_v15 }

</bundles_post_ra>
